<compile_context>
chip_gen: v7x
topology: tpu7x:2x2x1
jax: 0.10.0
libtpu: 0.0.40
codegen_flags: <defaults>
</compile_context>

<pallas_src>
from functools import partial

import numpy as np

import jax
import jax.numpy as jnp
from jax import lax
from jax.experimental import pallas as pl
from jax.experimental.pallas import tpu as pltpu


# ------------------------- fused Pallas kernel -------------------------

def _make_fused_kernel(B):
    """Fused conv1+pool+relu / conv2+pool+relu / fc1 / fc2 / log_softmax for B images."""

    def kernel(x_ref, t1_ref, b1_ref, t2_ref, b2_ref,
               fw1_ref, fb1_ref, fw2_ref, fb2_ref, o_ref):
        # x_ref block: (1, 4, 8*B, 28).  Inside residue class r, row j*B + b is image
        # row 4*j + r of image b (the B images of this grid step).
        xq = x_ref[0]                       # (4, 8*B, 28)
        t1 = t1_ref[...]                    # (140, 240) conv1 block-Toeplitz weights
        t2 = t2_ref[...]                    # (600, 160) conv2 block-Toeplitz weights
        fw1 = fw1_ref[...]                  # (320, 50)  fc1 weights, rows = (h, w, c)
        dt = t1.dtype                       # MXU operand dtype (f32 default, bf16 opt.)

        # ---- conv1 (5x5, 1->10) + bias + 2x2 maxpool + ReLU --------------------
        # p1[t]: (6B, 120), rows = (h6, b), lanes = ow2*10 + c, pooled row = 2*h6 + t.
        p1 = []
        for t in range(2):
            hmax = None
            for ph in range(2):             # conv output-row parity inside pool window
                taps = []
                for di in range(5):         # kernel row tap
                    off = 2 * t + ph + di   # image-row offset of this tap
                    r, q = off % 4, off // 4
                    taps.append(xq[r, q * B:(q + 6) * B, :])       # (6B, 28) contiguous
                lhs = jnp.concatenate(taps, axis=1)                # (6B, 140)
                z = jnp.dot(lhs.astype(dt), t1,
                            preferred_element_type=jnp.float32) + b1_ref[...]
                wmax = jnp.maximum(z[:, :120], z[:, 120:])         # pool over col parity
                hmax = wmax if hmax is None else jnp.maximum(hmax, wmax)
            p1.append(jnp.maximum(hmax, 0.0))                      # (6B, 120)

        # ---- conv2 (5x5, 10->20) + bias + 2x2 maxpool + ReLU -------------------
        hmax2 = None
        for ph2 in range(2):
            taps = []
            for di in range(5):
                u = ph2 + di
                t, q = u % 2, u // 2
                taps.append(p1[t][q * B:(q + 4) * B, :])           # (4B, 120) contiguous
            lhs2 = jnp.concatenate(taps, axis=1)                   # (4B, 600)
            z2 = jnp.dot(lhs2.astype(dt), t2,
                         preferred_element_type=jnp.float32) + b2_ref[...]
            wmax2 = jnp.maximum(z2[:, :80], z2[:, 80:])
            hmax2 = wmax2 if hmax2 is None else jnp.maximum(hmax2, wmax2)
        p2 = jnp.maximum(hmax2, 0.0)        # (4B, 80): rows (h4, b), lanes w4*20 + c

        # ---- fc1 + ReLU: accumulate 4 row-block matmuls (no lane re-layout) -----
        acc = None
        for h in range(4):
            part = jnp.dot(p2[h * B:(h + 1) * B, :].astype(dt),
                           fw1[h * 80:(h + 1) * 80, :],
                           preferred_element_type=jnp.float32)
            acc = part if acc is None else acc + part
        h1 = jnp.maximum(acc + fb1_ref[...], 0.0)                  # (B, 50)

        # ---- fc2 (lane-padded to 128) + log_softmax -----------------------------
        # Padded weight lanes are zero and padded bias lanes are -1e30: they never win
        # the row max and contribute exp(.) = 0 to the LSE, so lanes [:10] are exact.
        y = jnp.dot(h1.astype(dt), fw2_ref[...],
                    preferred_element_type=jnp.float32) + fb2_ref[...]   # (B, 128)
        m = jnp.max(y, axis=1, keepdims=True)
        zc = y - m
        lse = jnp.log(jnp.sum(jnp.exp(zc), axis=1, keepdims=True))
        o_ref[...] = zc - lse               # lane-dense (B, 128) store; host slices :10

    return kernel


# ------------------------- host-side weight packing -------------------------

def prepare_params(params, dot_dtype=jnp.float32):
    """Pack PyTorch-layout params into the fused-kernel layouts (done once).

    dot_dtype=jnp.bfloat16 halves MXU passes / weight VMEM but loosens accuracy beyond
    the 1e-3 parity check vs. the f32 reference, so the default stays float32.
    """
    w1, b1, w2, b2, fw1, fb1, fw2, fb2 = [np.asarray(p, np.float32) for p in params]

    # conv1 block-Toeplitz: rows = (di, iw) with iw in [0,28); cols = (pw, ow2, co).
    T1 = np.zeros((5 * 28, 2 * 12 * 10), np.float32)
    for di in range(5):
        for pw in range(2):
            for ow2 in range(12):
                ow = 2 * ow2 + pw
                col = pw * 120 + ow2 * 10
                for dj in range(5):
                    T1[di * 28 + ow + dj, col:col + 10] = w1[:, 0, di, dj]
    b1row = np.tile(b1, 24)[None, :]                         # (1, 240)

    # conv2 block-Toeplitz: rows = (di, iw, ci) with iw in [0,12); cols = (pw, ow4, co).
    T2 = np.zeros((5 * 120, 2 * 4 * 20), np.float32)
    for di in range(5):
        for pw in range(2):
            for ow4 in range(4):
                ow = 2 * ow4 + pw
                col = pw * 80 + ow4 * 20
                for dj in range(5):
                    iw = ow + dj
                    for ci in range(10):
                        T2[di * 120 + iw * 10 + ci, col:col + 20] = w2[:, ci, di, dj]
    b2row = np.tile(b2, 8)[None, :]                          # (1, 160)

    # fc1: permute input features from PyTorch NCHW flatten (c,h,w) to kernel (h,w,c)
    # order; row block h*80:(h+1)*80 then matches p2's per-spatial-row lane layout.
    FW1 = np.transpose(fw1.reshape(50, 20, 4, 4), (2, 3, 1, 0)).reshape(320, 50)

    # fc2: transpose and zero-pad the 10 output lanes to 128 for lane-dense stores.
    FW2 = np.zeros((50, 128), np.float32)
    FW2[:, :10] = fw2.T
    fb2row = np.full((1, 128), -1e30, np.float32)
    fb2row[0, :10] = fb2

    T1, T2, FW1, FW2 = (a.astype(dot_dtype) for a in (T1, T2, FW1, FW2))
    packed = (T1, b1row, T2, b2row, FW1, fb1[None, :], FW2, fb2row)
    return tuple(jnp.asarray(a) for a in packed)


# ------------------------- forward pass -------------------------

@partial(jax.jit, static_argnames=("block_b",))
def my_network_forward(x_nchw, prepared, *, block_b=16):
    """Fused forward pass; block_b images per grid step (must be a multiple of 8)."""
    assert block_b % 8 == 0, "block_b must be a multiple of 8 (sublane alignment)"
    T1, b1row, T2, b2row, FW1, fb1row, FW2, fb2row = prepared
    n = x_nchw.shape[0]
    B = block_b
    nb = pl.cdiv(n, B)
    n_pad = nb * B

    # Tiny XLA-side prep: pad batch to a multiple of B, split image rows into residue
    # classes mod 4 (so every in-kernel H slice is contiguous), pad 7 -> 8 rows, and
    # interleave each block's B images into the sublane axis (row index j*B + b) so the
    # batch folds directly into the matmul M dimension inside the kernel.
    x2 = x_nchw[:, 0, :, :].astype(jnp.float32)                   # (n, 28, 28)
    if n_pad != n:
        x2 = jnp.pad(x2, ((0, n_pad - n), (0, 0), (0, 0)))
    xq = jnp.stack([x2[:, r::4, :] for r in range(4)], axis=1)    # (n_pad, 4, 7, 28)
    xq = jnp.pad(xq, ((0, 0), (0, 0), (0, 1), (0, 0)))            # (n_pad, 4, 8, 28)
    xq = xq.reshape(nb, B, 4, 8, 28).transpose(0, 2, 3, 1, 4)     # (nb, 4, 8, B, 28)
    xq = xq.reshape(nb, 4, 8 * B, 28)                             # rows: j*B + b

    # Advisory cost estimate (helps XLA schedule surrounding ops).
    flops = 2 * (4 * 6 * 140 * 240 + 2 * 4 * 600 * 160 + 4 * 80 * 50 + 50 * 128) * n_pad
    weight_bytes = sum(int(np.prod(a.shape)) * a.dtype.itemsize for a in prepared)
    cost = pl.CostEstimate(
        flops=int(flops),
        transcendentals=int(129 * n_pad),
        bytes_accessed=int(xq.size * 4 + weight_bytes + n_pad * 128 * 4))

    out = pl.pallas_call(
        _make_fused_kernel(B),
        out_shape=jax.ShapeDtypeStruct((n_pad, 128), jnp.float32),
        grid=(nb,),
        in_specs=[
            pl.BlockSpec((1, 4, 8 * B, 28), lambda i: (i, 0, 0, 0)),
            pl.BlockSpec((140, 240), lambda i: (0, 0)),
            pl.BlockSpec((1, 240), lambda i: (0, 0)),
            pl.BlockSpec((600, 160), lambda i: (0, 0)),
            pl.BlockSpec((1, 160), lambda i: (0, 0)),
            pl.BlockSpec((320, 50), lambda i: (0, 0)),
            pl.BlockSpec((1, 50), lambda i: (0, 0)),
            pl.BlockSpec((50, 128), lambda i: (0, 0)),
            pl.BlockSpec((1, 128), lambda i: (0, 0)),
        ],
        out_specs=pl.BlockSpec((B, 128), lambda i: (i, 0)),
        compiler_params=pltpu.CompilerParams(
            dimension_semantics=("parallel",)),
        cost_estimate=cost,
    )(xq, T1, b1row, T2, b2row, FW1, fb1row, FW2, fb2row)

    return out[:n, :10]


# ------------------------- pure-JAX reference -------------------------

def reference_forward(x_nchw, params):
    w1, b1, w2, b2, fw1, fb1, fw2, fb2 = params
    dn = ('NCHW', 'OIHW', 'NCHW')

    y = lax.conv_general_dilated(x_nchw, w1, (1, 1), 'VALID',
                                 dimension_numbers=dn) + b1[None, :, None, None]
    y = jnp.maximum(y, 0.0)
    y = lax.reduce_window(y, -jnp.inf, lax.max, (1, 1, 2, 2), (1, 1, 2, 2), 'VALID')

    y = lax.conv_general_dilated(y, w2, (1, 1), 'VALID',
                                 dimension_numbers=dn) + b2[None, :, None, None]
    y = jnp.maximum(y, 0.0)
    y = lax.reduce_window(y, -jnp.inf, lax.max, (1, 1, 2, 2), (1, 1, 2, 2), 'VALID')

    y = y.reshape(y.shape[0], -1)
    y = jnp.maximum(y @ fw1.T + fb1, 0.0)
    y = y @ fw2.T + fb2
    return jax.nn.log_softmax(y, axis=1)


# ------------------------- main -------------------------

def init_params(key):
    ks = jax.random.split(key, 8)
    scale = 0.1
    w1 = scale * jax.random.normal(ks[0], (10, 1, 5, 5), jnp.float32)
    b1 = scale * jax.random.normal(ks[1], (10,), jnp.float32)
    w2 = scale * jax.random.normal(ks[2], (20, 10, 5, 5), jnp.float32)
    b2 = scale * jax.random.normal(ks[3], (20,), jnp.float32)
    fw1 = scale * jax.random.normal(ks[4], (50, 320), jnp.float32)
    fb1 = scale * jax.random.normal(ks[5], (50,), jnp.float32)
    fw2 = scale * jax.random.normal(ks[6], (10, 50), jnp.float32)
    fb2 = scale * jax.random.normal(ks[7], (10,), jnp.float32)
    return (w1, b1, w2, b2, fw1, fb1, fw2, fb2)


if __name__ == "__main__":
    key = jax.random.PRNGKey(0)
    kx, kp = jax.random.split(key)
    # MNIST-shaped input (the 320-dim flatten implies 28x28 single-channel).
    # n=32 with block_b=16 -> 2 grid steps, so both v7x TensorCores get work.
    n = 32
    x = jax.random.normal(kx, (n, 1, 28, 28), jnp.float32)
    params = init_params(kp)
    prepared = prepare_params(params)          # f32 MXU operands (bf16 optional)

    out = my_network_forward(x, prepared, block_b=16)
    out = jax.block_until_ready(out)

    ref = reference_forward(x, params)
    assert out.shape == (n, 10), out.shape
    assert jnp.allclose(out, ref, atol=1e-3, rtol=1e-3), (
        "mismatch vs reference: max abs diff = "
        f"{float(jnp.max(jnp.abs(out - ref)))}")

    print("KERNEL_OK")
</pallas_src>

<mosaic_0001>
module attributes {stable_mosaic.version = 11 : i64} {
  func.func @kernel(%arg0: i32, %arg1: memref<1x4x128x28xf32, #tpu.memory_space<vmem>>, %arg2: memref<140x240xf32, #tpu.memory_space<vmem>>, %arg3: memref<1x240xf32, #tpu.memory_space<vmem>>, %arg4: memref<600x160xf32, #tpu.memory_space<vmem>>, %arg5: memref<1x160xf32, #tpu.memory_space<vmem>>, %arg6: memref<320x50xf32, #tpu.memory_space<vmem>>, %arg7: memref<1x50xf32, #tpu.memory_space<vmem>>, %arg8: memref<50x128xf32, #tpu.memory_space<vmem>>, %arg9: memref<1x128xf32, #tpu.memory_space<vmem>>, %arg10: memref<16x128xf32, #tpu.memory_space<vmem>>) attributes {dimension_semantics = [#tpu.dimension_semantics<parallel>], iteration_bounds = array<i64: 2>, scalar_prefetch = 0 : i64, scratch_operands = 0 : i64, tpu.core_type = #tpu.core_type<tc>, window_params = [{transform_indices = @transform_0, window_bounds = array<i64: 1, 4, 128, 28>}, {pipeline_mode = #tpu.pipeline_mode<synchronous>, transform_indices = @transform_1, window_bounds = array<i64: 140, 240>}, {pipeline_mode = #tpu.pipeline_mode<synchronous>, transform_indices = @transform_2, window_bounds = array<i64: 1, 240>}, {pipeline_mode = #tpu.pipeline_mode<synchronous>, transform_indices = @transform_3, window_bounds = array<i64: 600, 160>}, {pipeline_mode = #tpu.pipeline_mode<synchronous>, transform_indices = @transform_4, window_bounds = array<i64: 1, 160>}, {pipeline_mode = #tpu.pipeline_mode<synchronous>, transform_indices = @transform_5, window_bounds = array<i64: 320, 50>}, {pipeline_mode = #tpu.pipeline_mode<synchronous>, transform_indices = @transform_6, window_bounds = array<i64: 1, 50>}, {pipeline_mode = #tpu.pipeline_mode<synchronous>, transform_indices = @transform_7, window_bounds = array<i64: 50, 128>}, {pipeline_mode = #tpu.pipeline_mode<synchronous>, transform_indices = @transform_8, window_bounds = array<i64: 1, 128>}, {transform_indices = @transform_9, window_bounds = array<i64: 16, 128>}]} {
    %c0 = arith.constant 0 : index
    %c0_0 = arith.constant 0 : index
    %c0_1 = arith.constant 0 : index
    %c0_2 = arith.constant 0 : index
    %0 = vector.load %arg1[%c0, %c0_0, %c0_1, %c0_2] : memref<1x4x128x28xf32, #tpu.memory_space<vmem>>, vector<1x4x128x28xf32>
    %1 = vector.shape_cast %0 : vector<1x4x128x28xf32> to vector<4x128x28xf32>
    %c0_3 = arith.constant 0 : index
    %c0_4 = arith.constant 0 : index
    %2 = vector.load %arg2[%c0_3, %c0_4] : memref<140x240xf32, #tpu.memory_space<vmem>>, vector<140x240xf32>
    %c0_5 = arith.constant 0 : index
    %c0_6 = arith.constant 0 : index
    %3 = vector.load %arg4[%c0_5, %c0_6] : memref<600x160xf32, #tpu.memory_space<vmem>>, vector<600x160xf32>
    %c0_7 = arith.constant 0 : index
    %c0_8 = arith.constant 0 : index
    %4 = vector.load %arg6[%c0_7, %c0_8] : memref<320x50xf32, #tpu.memory_space<vmem>>, vector<320x50xf32>
    %5 = vector.extract_strided_slice %1 {offsets = [0, 0, 0], sizes = [1, 96, 28], strides = [1, 1, 1]} : vector<4x128x28xf32> to vector<1x96x28xf32>
    %6 = vector.shape_cast %5 : vector<1x96x28xf32> to vector<96x28xf32>
    %7 = vector.extract_strided_slice %1 {offsets = [1, 0, 0], sizes = [1, 96, 28], strides = [1, 1, 1]} : vector<4x128x28xf32> to vector<1x96x28xf32>
    %8 = vector.shape_cast %7 : vector<1x96x28xf32> to vector<96x28xf32>
    %9 = vector.extract_strided_slice %1 {offsets = [2, 0, 0], sizes = [1, 96, 28], strides = [1, 1, 1]} : vector<4x128x28xf32> to vector<1x96x28xf32>
    %10 = vector.shape_cast %9 : vector<1x96x28xf32> to vector<96x28xf32>
    %11 = vector.extract_strided_slice %1 {offsets = [3, 0, 0], sizes = [1, 96, 28], strides = [1, 1, 1]} : vector<4x128x28xf32> to vector<1x96x28xf32>
    %12 = vector.shape_cast %11 : vector<1x96x28xf32> to vector<96x28xf32>
    %13 = vector.extract_strided_slice %1 {offsets = [0, 16, 0], sizes = [1, 96, 28], strides = [1, 1, 1]} : vector<4x128x28xf32> to vector<1x96x28xf32>
    %14 = vector.shape_cast %13 : vector<1x96x28xf32> to vector<96x28xf32>
    %15 = tpu.concatenate %6, %8, %10, %12, %14 in 1 : vector<96x28xf32>, vector<96x28xf32>, vector<96x28xf32>, vector<96x28xf32>, vector<96x28xf32> -> vector<96x140xf32>
    %cst = arith.constant dense<0.000000e+00> : vector<96x240xf32>
    %16 = tpu.matmul %15, %2, %cst {dimension_numbers = #tpu.dot_dimension_numbers<[1], [0], [0], [1], [0, 0, 1, 1], [], []>} : vector<96x140xf32>, vector<140x240xf32>, vector<96x240xf32> -> vector<96x240xf32>
    %c0_9 = arith.constant 0 : index
    %c0_10 = arith.constant 0 : index
    %17 = vector.load %arg3[%c0_9, %c0_10] : memref<1x240xf32, #tpu.memory_space<vmem>>, vector<1x240xf32>
    %18 = vector.broadcast %17 : vector<1x240xf32> to vector<96x240xf32>
    %19 = arith.addf %16, %18 : vector<96x240xf32>
    %20 = vector.extract_strided_slice %19 {offsets = [0, 0], sizes = [96, 120], strides = [1, 1]} : vector<96x240xf32> to vector<96x120xf32>
    %21 = vector.extract_strided_slice %19 {offsets = [0, 120], sizes = [96, 120], strides = [1, 1]} : vector<96x240xf32> to vector<96x120xf32>
    %22 = arith.maximumf %20, %21 : vector<96x120xf32>
    %23 = vector.extract_strided_slice %1 {offsets = [1, 0, 0], sizes = [1, 96, 28], strides = [1, 1, 1]} : vector<4x128x28xf32> to vector<1x96x28xf32>
    %24 = vector.shape_cast %23 : vector<1x96x28xf32> to vector<96x28xf32>
    %25 = vector.extract_strided_slice %1 {offsets = [2, 0, 0], sizes = [1, 96, 28], strides = [1, 1, 1]} : vector<4x128x28xf32> to vector<1x96x28xf32>
    %26 = vector.shape_cast %25 : vector<1x96x28xf32> to vector<96x28xf32>
    %27 = vector.extract_strided_slice %1 {offsets = [3, 0, 0], sizes = [1, 96, 28], strides = [1, 1, 1]} : vector<4x128x28xf32> to vector<1x96x28xf32>
    %28 = vector.shape_cast %27 : vector<1x96x28xf32> to vector<96x28xf32>
    %29 = vector.extract_strided_slice %1 {offsets = [0, 16, 0], sizes = [1, 96, 28], strides = [1, 1, 1]} : vector<4x128x28xf32> to vector<1x96x28xf32>
    %30 = vector.shape_cast %29 : vector<1x96x28xf32> to vector<96x28xf32>
    %31 = vector.extract_strided_slice %1 {offsets = [1, 16, 0], sizes = [1, 96, 28], strides = [1, 1, 1]} : vector<4x128x28xf32> to vector<1x96x28xf32>
    %32 = vector.shape_cast %31 : vector<1x96x28xf32> to vector<96x28xf32>
    %33 = tpu.concatenate %24, %26, %28, %30, %32 in 1 : vector<96x28xf32>, vector<96x28xf32>, vector<96x28xf32>, vector<96x28xf32>, vector<96x28xf32> -> vector<96x140xf32>
    %cst_11 = arith.constant dense<0.000000e+00> : vector<96x240xf32>
    %34 = tpu.matmul %33, %2, %cst_11 {dimension_numbers = #tpu.dot_dimension_numbers<[1], [0], [0], [1], [0, 0, 1, 1], [], []>} : vector<96x140xf32>, vector<140x240xf32>, vector<96x240xf32> -> vector<96x240xf32>
    %c0_12 = arith.constant 0 : index
    %c0_13 = arith.constant 0 : index
    %35 = vector.load %arg3[%c0_12, %c0_13] : memref<1x240xf32, #tpu.memory_space<vmem>>, vector<1x240xf32>
    %36 = vector.broadcast %35 : vector<1x240xf32> to vector<96x240xf32>
    %37 = arith.addf %34, %36 : vector<96x240xf32>
    %38 = vector.extract_strided_slice %37 {offsets = [0, 0], sizes = [96, 120], strides = [1, 1]} : vector<96x240xf32> to vector<96x120xf32>
    %39 = vector.extract_strided_slice %37 {offsets = [0, 120], sizes = [96, 120], strides = [1, 1]} : vector<96x240xf32> to vector<96x120xf32>
    %40 = arith.maximumf %38, %39 : vector<96x120xf32>
    %41 = arith.maximumf %22, %40 : vector<96x120xf32>
    %cst_14 = arith.constant 0.000000e+00 : f32
    %42 = vector.broadcast %cst_14 : f32 to vector<96x120xf32>
    %43 = arith.maximumf %41, %42 : vector<96x120xf32>
    %44 = vector.extract_strided_slice %1 {offsets = [2, 0, 0], sizes = [1, 96, 28], strides = [1, 1, 1]} : vector<4x128x28xf32> to vector<1x96x28xf32>
    %45 = vector.shape_cast %44 : vector<1x96x28xf32> to vector<96x28xf32>
    %46 = vector.extract_strided_slice %1 {offsets = [3, 0, 0], sizes = [1, 96, 28], strides = [1, 1, 1]} : vector<4x128x28xf32> to vector<1x96x28xf32>
    %47 = vector.shape_cast %46 : vector<1x96x28xf32> to vector<96x28xf32>
    %48 = vector.extract_strided_slice %1 {offsets = [0, 16, 0], sizes = [1, 96, 28], strides = [1, 1, 1]} : vector<4x128x28xf32> to vector<1x96x28xf32>
    %49 = vector.shape_cast %48 : vector<1x96x28xf32> to vector<96x28xf32>
    %50 = vector.extract_strided_slice %1 {offsets = [1, 16, 0], sizes = [1, 96, 28], strides = [1, 1, 1]} : vector<4x128x28xf32> to vector<1x96x28xf32>
    %51 = vector.shape_cast %50 : vector<1x96x28xf32> to vector<96x28xf32>
    %52 = vector.extract_strided_slice %1 {offsets = [2, 16, 0], sizes = [1, 96, 28], strides = [1, 1, 1]} : vector<4x128x28xf32> to vector<1x96x28xf32>
    %53 = vector.shape_cast %52 : vector<1x96x28xf32> to vector<96x28xf32>
    %54 = tpu.concatenate %45, %47, %49, %51, %53 in 1 : vector<96x28xf32>, vector<96x28xf32>, vector<96x28xf32>, vector<96x28xf32>, vector<96x28xf32> -> vector<96x140xf32>
    %cst_15 = arith.constant dense<0.000000e+00> : vector<96x240xf32>
    %55 = tpu.matmul %54, %2, %cst_15 {dimension_numbers = #tpu.dot_dimension_numbers<[1], [0], [0], [1], [0, 0, 1, 1], [], []>} : vector<96x140xf32>, vector<140x240xf32>, vector<96x240xf32> -> vector<96x240xf32>
    %c0_16 = arith.constant 0 : index
    %c0_17 = arith.constant 0 : index
    %56 = vector.load %arg3[%c0_16, %c0_17] : memref<1x240xf32, #tpu.memory_space<vmem>>, vector<1x240xf32>
    %57 = vector.broadcast %56 : vector<1x240xf32> to vector<96x240xf32>
    %58 = arith.addf %55, %57 : vector<96x240xf32>
    %59 = vector.extract_strided_slice %58 {offsets = [0, 0], sizes = [96, 120], strides = [1, 1]} : vector<96x240xf32> to vector<96x120xf32>
    %60 = vector.extract_strided_slice %58 {offsets = [0, 120], sizes = [96, 120], strides = [1, 1]} : vector<96x240xf32> to vector<96x120xf32>
    %61 = arith.maximumf %59, %60 : vector<96x120xf32>
    %62 = vector.extract_strided_slice %1 {offsets = [3, 0, 0], sizes = [1, 96, 28], strides = [1, 1, 1]} : vector<4x128x28xf32> to vector<1x96x28xf32>
    %63 = vector.shape_cast %62 : vector<1x96x28xf32> to vector<96x28xf32>
    %64 = vector.extract_strided_slice %1 {offsets = [0, 16, 0], sizes = [1, 96, 28], strides = [1, 1, 1]} : vector<4x128x28xf32> to vector<1x96x28xf32>
    %65 = vector.shape_cast %64 : vector<1x96x28xf32> to vector<96x28xf32>
    %66 = vector.extract_strided_slice %1 {offsets = [1, 16, 0], sizes = [1, 96, 28], strides = [1, 1, 1]} : vector<4x128x28xf32> to vector<1x96x28xf32>
    %67 = vector.shape_cast %66 : vector<1x96x28xf32> to vector<96x28xf32>
    %68 = vector.extract_strided_slice %1 {offsets = [2, 16, 0], sizes = [1, 96, 28], strides = [1, 1, 1]} : vector<4x128x28xf32> to vector<1x96x28xf32>
    %69 = vector.shape_cast %68 : vector<1x96x28xf32> to vector<96x28xf32>
    %70 = vector.extract_strided_slice %1 {offsets = [3, 16, 0], sizes = [1, 96, 28], strides = [1, 1, 1]} : vector<4x128x28xf32> to vector<1x96x28xf32>
    %71 = vector.shape_cast %70 : vector<1x96x28xf32> to vector<96x28xf32>
    %72 = tpu.concatenate %63, %65, %67, %69, %71 in 1 : vector<96x28xf32>, vector<96x28xf32>, vector<96x28xf32>, vector<96x28xf32>, vector<96x28xf32> -> vector<96x140xf32>
    %cst_18 = arith.constant dense<0.000000e+00> : vector<96x240xf32>
    %73 = tpu.matmul %72, %2, %cst_18 {dimension_numbers = #tpu.dot_dimension_numbers<[1], [0], [0], [1], [0, 0, 1, 1], [], []>} : vector<96x140xf32>, vector<140x240xf32>, vector<96x240xf32> -> vector<96x240xf32>
    %c0_19 = arith.constant 0 : index
    %c0_20 = arith.constant 0 : index
    %74 = vector.load %arg3[%c0_19, %c0_20] : memref<1x240xf32, #tpu.memory_space<vmem>>, vector<1x240xf32>
    %75 = vector.broadcast %74 : vector<1x240xf32> to vector<96x240xf32>
    %76 = arith.addf %73, %75 : vector<96x240xf32>
    %77 = vector.extract_strided_slice %76 {offsets = [0, 0], sizes = [96, 120], strides = [1, 1]} : vector<96x240xf32> to vector<96x120xf32>
    %78 = vector.extract_strided_slice %76 {offsets = [0, 120], sizes = [96, 120], strides = [1, 1]} : vector<96x240xf32> to vector<96x120xf32>
    %79 = arith.maximumf %77, %78 : vector<96x120xf32>
    %80 = arith.maximumf %61, %79 : vector<96x120xf32>
    %cst_21 = arith.constant 0.000000e+00 : f32
    %81 = vector.broadcast %cst_21 : f32 to vector<96x120xf32>
    %82 = arith.maximumf %80, %81 : vector<96x120xf32>
    %83 = vector.extract_strided_slice %43 {offsets = [0, 0], sizes = [64, 120], strides = [1, 1]} : vector<96x120xf32> to vector<64x120xf32>
    %84 = vector.extract_strided_slice %82 {offsets = [0, 0], sizes = [64, 120], strides = [1, 1]} : vector<96x120xf32> to vector<64x120xf32>
    %85 = vector.extract_strided_slice %43 {offsets = [16, 0], sizes = [64, 120], strides = [1, 1]} : vector<96x120xf32> to vector<64x120xf32>
    %86 = vector.extract_strided_slice %82 {offsets = [16, 0], sizes = [64, 120], strides = [1, 1]} : vector<96x120xf32> to vector<64x120xf32>
    %87 = vector.extract_strided_slice %43 {offsets = [32, 0], sizes = [64, 120], strides = [1, 1]} : vector<96x120xf32> to vector<64x120xf32>
    %88 = tpu.concatenate %83, %84, %85, %86, %87 in 1 : vector<64x120xf32>, vector<64x120xf32>, vector<64x120xf32>, vector<64x120xf32>, vector<64x120xf32> -> vector<64x600xf32>
    %cst_22 = arith.constant dense<0.000000e+00> : vector<64x160xf32>
    %89 = tpu.matmul %88, %3, %cst_22 {dimension_numbers = #tpu.dot_dimension_numbers<[1], [0], [0], [1], [0, 0, 1, 1], [], []>} : vector<64x600xf32>, vector<600x160xf32>, vector<64x160xf32> -> vector<64x160xf32>
    %c0_23 = arith.constant 0 : index
    %c0_24 = arith.constant 0 : index
    %90 = vector.load %arg5[%c0_23, %c0_24] : memref<1x160xf32, #tpu.memory_space<vmem>>, vector<1x160xf32>
    %91 = vector.broadcast %90 : vector<1x160xf32> to vector<64x160xf32>
    %92 = arith.addf %89, %91 : vector<64x160xf32>
    %93 = vector.extract_strided_slice %92 {offsets = [0, 0], sizes = [64, 80], strides = [1, 1]} : vector<64x160xf32> to vector<64x80xf32>
    %94 = vector.extract_strided_slice %92 {offsets = [0, 80], sizes = [64, 80], strides = [1, 1]} : vector<64x160xf32> to vector<64x80xf32>
    %95 = arith.maximumf %93, %94 : vector<64x80xf32>
    %96 = vector.extract_strided_slice %82 {offsets = [0, 0], sizes = [64, 120], strides = [1, 1]} : vector<96x120xf32> to vector<64x120xf32>
    %97 = vector.extract_strided_slice %43 {offsets = [16, 0], sizes = [64, 120], strides = [1, 1]} : vector<96x120xf32> to vector<64x120xf32>
    %98 = vector.extract_strided_slice %82 {offsets = [16, 0], sizes = [64, 120], strides = [1, 1]} : vector<96x120xf32> to vector<64x120xf32>
    %99 = vector.extract_strided_slice %43 {offsets = [32, 0], sizes = [64, 120], strides = [1, 1]} : vector<96x120xf32> to vector<64x120xf32>
    %100 = vector.extract_strided_slice %82 {offsets = [32, 0], sizes = [64, 120], strides = [1, 1]} : vector<96x120xf32> to vector<64x120xf32>
    %101 = tpu.concatenate %96, %97, %98, %99, %100 in 1 : vector<64x120xf32>, vector<64x120xf32>, vector<64x120xf32>, vector<64x120xf32>, vector<64x120xf32> -> vector<64x600xf32>
    %cst_25 = arith.constant dense<0.000000e+00> : vector<64x160xf32>
    %102 = tpu.matmul %101, %3, %cst_25 {dimension_numbers = #tpu.dot_dimension_numbers<[1], [0], [0], [1], [0, 0, 1, 1], [], []>} : vector<64x600xf32>, vector<600x160xf32>, vector<64x160xf32> -> vector<64x160xf32>
    %c0_26 = arith.constant 0 : index
    %c0_27 = arith.constant 0 : index
    %103 = vector.load %arg5[%c0_26, %c0_27] : memref<1x160xf32, #tpu.memory_space<vmem>>, vector<1x160xf32>
    %104 = vector.broadcast %103 : vector<1x160xf32> to vector<64x160xf32>
    %105 = arith.addf %102, %104 : vector<64x160xf32>
    %106 = vector.extract_strided_slice %105 {offsets = [0, 0], sizes = [64, 80], strides = [1, 1]} : vector<64x160xf32> to vector<64x80xf32>
    %107 = vector.extract_strided_slice %105 {offsets = [0, 80], sizes = [64, 80], strides = [1, 1]} : vector<64x160xf32> to vector<64x80xf32>
    %108 = arith.maximumf %106, %107 : vector<64x80xf32>
    %109 = arith.maximumf %95, %108 : vector<64x80xf32>
    %cst_28 = arith.constant 0.000000e+00 : f32
    %110 = vector.broadcast %cst_28 : f32 to vector<64x80xf32>
    %111 = arith.maximumf %109, %110 : vector<64x80xf32>
    %112 = vector.extract_strided_slice %111 {offsets = [0, 0], sizes = [16, 80], strides = [1, 1]} : vector<64x80xf32> to vector<16x80xf32>
    %113 = vector.extract_strided_slice %4 {offsets = [0, 0], sizes = [80, 50], strides = [1, 1]} : vector<320x50xf32> to vector<80x50xf32>
    %cst_29 = arith.constant dense<0.000000e+00> : vector<16x50xf32>
    %114 = tpu.matmul %112, %113, %cst_29 {dimension_numbers = #tpu.dot_dimension_numbers<[1], [0], [0], [1], [0, 0, 1, 1], [], []>} : vector<16x80xf32>, vector<80x50xf32>, vector<16x50xf32> -> vector<16x50xf32>
    %115 = vector.extract_strided_slice %111 {offsets = [16, 0], sizes = [16, 80], strides = [1, 1]} : vector<64x80xf32> to vector<16x80xf32>
    %116 = vector.extract_strided_slice %4 {offsets = [80, 0], sizes = [80, 50], strides = [1, 1]} : vector<320x50xf32> to vector<80x50xf32>
    %cst_30 = arith.constant dense<0.000000e+00> : vector<16x50xf32>
    %117 = tpu.matmul %115, %116, %cst_30 {dimension_numbers = #tpu.dot_dimension_numbers<[1], [0], [0], [1], [0, 0, 1, 1], [], []>} : vector<16x80xf32>, vector<80x50xf32>, vector<16x50xf32> -> vector<16x50xf32>
    %118 = arith.addf %114, %117 : vector<16x50xf32>
    %119 = vector.extract_strided_slice %111 {offsets = [32, 0], sizes = [16, 80], strides = [1, 1]} : vector<64x80xf32> to vector<16x80xf32>
    %120 = vector.extract_strided_slice %4 {offsets = [160, 0], sizes = [80, 50], strides = [1, 1]} : vector<320x50xf32> to vector<80x50xf32>
    %cst_31 = arith.constant dense<0.000000e+00> : vector<16x50xf32>
    %121 = tpu.matmul %119, %120, %cst_31 {dimension_numbers = #tpu.dot_dimension_numbers<[1], [0], [0], [1], [0, 0, 1, 1], [], []>} : vector<16x80xf32>, vector<80x50xf32>, vector<16x50xf32> -> vector<16x50xf32>
    %122 = arith.addf %118, %121 : vector<16x50xf32>
    %123 = vector.extract_strided_slice %111 {offsets = [48, 0], sizes = [16, 80], strides = [1, 1]} : vector<64x80xf32> to vector<16x80xf32>
    %124 = vector.extract_strided_slice %4 {offsets = [240, 0], sizes = [80, 50], strides = [1, 1]} : vector<320x50xf32> to vector<80x50xf32>
    %cst_32 = arith.constant dense<0.000000e+00> : vector<16x50xf32>
    %125 = tpu.matmul %123, %124, %cst_32 {dimension_numbers = #tpu.dot_dimension_numbers<[1], [0], [0], [1], [0, 0, 1, 1], [], []>} : vector<16x80xf32>, vector<80x50xf32>, vector<16x50xf32> -> vector<16x50xf32>
    %126 = arith.addf %122, %125 : vector<16x50xf32>
    %c0_33 = arith.constant 0 : index
    %c0_34 = arith.constant 0 : index
    %127 = vector.load %arg7[%c0_33, %c0_34] : memref<1x50xf32, #tpu.memory_space<vmem>>, vector<1x50xf32>
    %128 = vector.broadcast %127 : vector<1x50xf32> to vector<16x50xf32>
    %129 = arith.addf %126, %128 : vector<16x50xf32>
    %cst_35 = arith.constant 0.000000e+00 : f32
    %130 = vector.broadcast %cst_35 : f32 to vector<16x50xf32>
    %131 = arith.maximumf %129, %130 : vector<16x50xf32>
    %c0_36 = arith.constant 0 : index
    %c0_37 = arith.constant 0 : index
    %132 = vector.load %arg8[%c0_36, %c0_37] : memref<50x128xf32, #tpu.memory_space<vmem>>, vector<50x128xf32>
    %cst_38 = arith.constant dense<0.000000e+00> : vector<16x128xf32>
    %133 = tpu.matmul %131, %132, %cst_38 {dimension_numbers = #tpu.dot_dimension_numbers<[1], [0], [0], [1], [0, 0, 1, 1], [], []>} : vector<16x50xf32>, vector<50x128xf32>, vector<16x128xf32> -> vector<16x128xf32>
    %c0_39 = arith.constant 0 : index
    %c0_40 = arith.constant 0 : index
    %134 = vector.load %arg9[%c0_39, %c0_40] : memref<1x128xf32, #tpu.memory_space<vmem>>, vector<1x128xf32>
    %135 = vector.broadcast %134 : vector<1x128xf32> to vector<16x128xf32>
    %136 = arith.addf %133, %135 : vector<16x128xf32>
    %cst_41 = arith.constant dense<0xFF800000> : vector<16xf32>
    %137 = vector.multi_reduction <maximumf>, %136, %cst_41 [1] : vector<16x128xf32> to vector<16xf32>
    %138 = vector.shape_cast %137 : vector<16xf32> to vector<16x1xf32>
    %139 = vector.broadcast %138 : vector<16x1xf32> to vector<16x128xf32>
    %140 = arith.subf %136, %139 : vector<16x128xf32>
    %141 = math.exp %140 : vector<16x128xf32>
    %cst_42 = arith.constant dense<0.000000e+00> : vector<16xf32>
    %142 = vector.multi_reduction <add>, %141, %cst_42 [1] : vector<16x128xf32> to vector<16xf32>
    %143 = vector.shape_cast %142 : vector<16xf32> to vector<16x1xf32>
    %144 = math.log %143 : vector<16x1xf32>
    %145 = vector.broadcast %144 : vector<16x1xf32> to vector<16x128xf32>
    %146 = arith.subf %140, %145 : vector<16x128xf32>
    %c0_43 = arith.constant 0 : index
    %c0_44 = arith.constant 0 : index
    %147 = vector.load %arg10[%c0_43, %c0_44] : memref<16x128xf32, #tpu.memory_space<vmem>>, vector<16x128xf32>
    tpu.vector_store %arg10[%c0_43, %c0_44], %146 {strides = array<i32>} : memref<16x128xf32, #tpu.memory_space<vmem>>, vector<16x128xf32>,
    return
  }
  func.func @transform_0(%arg0: i32) -> (i32, i32, i32, i32) {
    %c0_i32 = arith.constant 0 : i32
    %c0_i32_0 = arith.constant 0 : i32
    %c0_i32_1 = arith.constant 0 : i32
    %c0_i32_2 = arith.constant 0 : i32
    return %arg0, %c0_i32, %c0_i32_0, %c0_i32_1 : i32, i32, i32, i32
  }
  func.func @transform_1(%arg0: i32) -> (i32, i32) {
    %c0_i32 = arith.constant 0 : i32
    %c0_i32_0 = arith.constant 0 : i32
    %c0_i32_1 = arith.constant 0 : i32
    return %c0_i32, %c0_i32_0 : i32, i32
  }
  func.func @transform_2(%arg0: i32) -> (i32, i32) {
    %c0_i32 = arith.constant 0 : i32
    %c0_i32_0 = arith.constant 0 : i32
    %c0_i32_1 = arith.constant 0 : i32
    return %c0_i32, %c0_i32_0 : i32, i32
  }
  func.func @transform_3(%arg0: i32) -> (i32, i32) {
    %c0_i32 = arith.constant 0 : i32
    %c0_i32_0 = arith.constant 0 : i32
    %c0_i32_1 = arith.constant 0 : i32
    return %c0_i32, %c0_i32_0 : i32, i32
  }
  func.func @transform_4(%arg0: i32) -> (i32, i32) {
    %c0_i32 = arith.constant 0 : i32
    %c0_i32_0 = arith.constant 0 : i32
    %c0_i32_1 = arith.constant 0 : i32
    return %c0_i32, %c0_i32_0 : i32, i32
  }
  func.func @transform_5(%arg0: i32) -> (i32, i32) {
    %c0_i32 = arith.constant 0 : i32
    %c0_i32_0 = arith.constant 0 : i32
    %c0_i32_1 = arith.constant 0 : i32
    return %c0_i32, %c0_i32_0 : i32, i32
  }
  func.func @transform_6(%arg0: i32) -> (i32, i32) {
    %c0_i32 = arith.constant 0 : i32
    %c0_i32_0 = arith.constant 0 : i32
    %c0_i32_1 = arith.constant 0 : i32
    return %c0_i32, %c0_i32_0 : i32, i32
  }
  func.func @transform_7(%arg0: i32) -> (i32, i32) {
    %c0_i32 = arith.constant 0 : i32
    %c0_i32_0 = arith.constant 0 : i32
    %c0_i32_1 = arith.constant 0 : i32
    return %c0_i32, %c0_i32_0 : i32, i32
  }
  func.func @transform_8(%arg0: i32) -> (i32, i32) {
    %c0_i32 = arith.constant 0 : i32
    %c0_i32_0 = arith.constant 0 : i32
    %c0_i32_1 = arith.constant 0 : i32
    return %c0_i32, %c0_i32_0 : i32, i32
  }
  func.func @transform_9(%arg0: i32) -> (i32, i32) {
    %c0_i32 = arith.constant 0 : i32
    %c0_i32_0 = arith.constant 0 : i32
    return %arg0, %c0_i32 : i32, i32
  }
}

</mosaic_0001>

<bundles_post_ra>
// kernel: my_network_forward.1
= control target key start
LH: loop header
LB: loop body
LE: loop exit
PB: predicated region body
PF: predicated region fallthrough
CT: control target
= control target key end

     0   :  { %s5855_s30 = smov 0   ;;  %s8682_s0 = inlined_call_operand.vmem [shape: f32[2,4,128,28], index: 0, kind: input, shape index: {}]   ;;  %s8683_s1 = inlined_call_operand.vmem [shape: f32[140,240], index: 1, kind: input, shape index: {}]   ;;  %s8684_s2 = inlined_call_operand.vmem [shape: f32[1,240], index: 2, kind: input, shape index: {}]   ;;  %s8685_s3 = inlined_call_operand.vmem [shape: f32[600,160], index: 3, kind: input, shape index: {}]   ;;  %s8686_s4 = inlined_call_operand.vmem [shape: f32[1,160], index: 4, kind: input, shape index: {}]   ;;  %s8687_s5 = inlined_call_operand.vmem [shape: f32[320,50], index: 5, kind: input, shape index: {}]   ;;  %s8688_s6 = inlined_call_operand.vmem [shape: f32[1,50], index: 6, kind: input, shape index: {}]   ;;  %s8689_s7 = inlined_call_operand.vmem [shape: f32[50,128], index: 7, kind: input, shape index: {}]   ;;  %s8690_s8 = inlined_call_operand.vmem [shape: f32[1,128], index: 8, kind: input, shape index: {}]   ;;  %s8691_s9 = inlined_call_operand.vmem [shape: f32[32,128], index: 9, kind: output, shape index: {}]  }
   0x1 LB: > { %s5861_s10 = sadd.s32 4294967295, %s5792_s30   ;;  %p4274_p0 = scmp.ge.s32.totalorder %s5792_s30, 1  ;;  %s5792_s30 = sphi %s5855_s30, %s19_s30  }
   0x2   : > { %p287_p1 = scmp.lt.s32.totalorder %s5792_s30, 3 }
   0x4   : > { %p288_p2 = pnand %p4274_p0, %p287_p1 }
   0x6   : > { %291 = sbr.rel (%p288_p2) target bundleno = 2039 (0x7f7), region = 56 }
   0xd   : > { %p323_p3 = scmp.lt.s32.totalorder %s5861_s10, 1  ;;  %v391_v0 = vld [vmem:[%s8683_s1 + $0x8] sm:$0xff]  ;;  %v393_v1 = vld [vmem:[%s8683_s1 + $0x18] sm:$0xff]  ;;  %v390_v2 = vld [vmem:[%s8683_s1] sm:$0xff]  ;;  %s5794_s25 = smov 28   ;;  %vm897_vm0 = vcmask 1043456  }
   0xe   : > { %v5875_v3 = vpack.c.bf16 %v393_v1, %v391_v0  ;;  %v392_v4 = vld [vmem:[%s8683_s1 + $0x10] sm:$0xff]  ;;  %v395_v5 = vld [vmem:[%s8683_s1 + $0x28] sm:$0xff]  ;;  %v397_v6 = vld [vmem:[%s8683_s1 + $0x38] sm:$0xff]  ;;  %s5795_s11 = smov 84   ;;  %s5796_s16 = smov 56   ;;  %vm5798_vm1 = vmmov 1  }
   0xf   : > { %s324_s23 = scalar_select %p323_p3, %s5861_s10, 1  ;;  %v5887_v7 = vpack.c.bf16 %v392_v4, %v390_v2  ;;  %v5889_v8 = vpack.c.bf16 %v397_v6, %v395_v5  ;;  %v394_v9 = vld [vmem:[%s8683_s1 + $0x20] sm:$0xff]  ;;  %v396_v10 = vld [vmem:[%s8683_s1 + $0x30] sm:$0xff]  ;;  %v399_v11 = vld [vmem:[%s8683_s1 + $0x48] sm:$0xff]  ;;  %vm808_vm3 = vcmask 228352   ;;  %vm872_vm4 = vcmask 97280  }
  0x10   : > { %4534 = vmatprep.subr.bf16.mxu0 %v5875_v3  ;;  %4572 = vmatprep.subr.bf16.mxu1 %v5875_v3  ;;  %v401_v12 = vld [vmem:[%s8683_s1 + $0x58] sm:$0xff]  ;;  %v5907_v13 = vpack.c.bf16 %v396_v10, %v394_v9  ;;  %v398_v14 = vld [vmem:[%s8683_s1 + $0x40] sm:$0xff]  ;;  %v400_v16 = vld [vmem:[%s8683_s1 + $0x50] sm:$0xff]  ;;  %s5797_s17 = smov 112   ;;  %vm821_vm5 = vcmask 457728   ;;  %vm834_vm6 = vcmask 687104  }
  0x11   : > { %s4366_s13 = sshll.u32 %s324_s23, 9  ;;  %4536 = vmatpush1.bf16.msra.mxu0 %v5887_v7  ;;  %4574 = vmatpush1.bf16.msra.mxu1 %v5887_v7  ;;  %v5919_v15 = vpack.c.bf16 %v401_v12, %v399_v11  ;;  %v403_v17 = vld [vmem:[%s8683_s1 + $0x68] sm:$0xff]  ;;  %v405_v18 = vld [vmem:[%s8683_s1 + $0x78] sm:$0xff]  ;;  %v5944_v25 = vpack.c.bf16 %v400_v16, %v398_v14  ;;  %v402_v28 = vld [vmem:[%s8683_s1 + $0x60] sm:$0xff]  ;;  %vm847_vm7 = vcmask 916480   ;;  %vm1113_vm8 = vcmask 64512  }
  0x12   : > { %s5915_s18 = scalar_lea.vmem %s8682_s0, %s4366_s13  ;;  %4538 = vmatprep.subr.bf16.mxu0 %v5889_v8  ;;  %4576 = vmatprep.subr.bf16.mxu1 %v5889_v8  ;;  %v5948_v27 = vpack.c.bf16 %v405_v18, %v403_v17  ;;  %v404_v29 = vld [vmem:[%s8683_s1 + $0x70] sm:$0xff]  ;;  %v407_v30 = vld [vmem:[%s8683_s1 + $0x88] sm:$0xff]  ;;  %v409_v31 = vld [vmem:[%s8683_s1 + $0x98] sm:$0xff]  ;;  %s5800_s22 = smov 120   ;;  %vm2703_vm9 = vcmask 982016   ;;  %vm2729_vm10 = vcmask 785408  }
  0x13   : > { %v5931_v19 = vld [vmem:[%s5915_s18 + $0x80] sm:$0xff]  ;;  %v5935_v21 = vld [vmem:[%s5915_s18 + $0x10] sm:$0xff]  ;;  %v5966_v32 = vld [vmem:[%s5915_s18 + $0x88] sm:$0xff]  ;;  %v5971_v34 = vpack.c.bf16 %v404_v29, %v402_v28  ;;  %v5975_v35 = vpack.c.bf16 %v409_v31, %v407_v30  ;;  %vm2720_vm11 = vcmask 850944   ;;  %vm2750_vm12 = vcmask 719872   ;;  %s4277_s14 = sshll.u32 %s5861_s10, 1 }
  0x14   : > { %v362_v20 = vld [vmem:[%s5915_s18 + $0x100] sm:$0xff]  ;;  %v363_v33 = vld [vmem:[%s5915_s18 + $0x108] sm:$0xff]  ;;  %v5980_v36 = vld [vmem:[%s5915_s18 + $0x90] sm:$0xff]  ;;  %vm3154_vm13 = vcmask 392192   ;;  %vm3752_vm14 = vcmask 654336   ;;  %vm4113_vm15 = vcmask 1041408  }
  0x15   : > { %v5194_v22 = vpack.i.bf16 %v362_v20, %v5931_v19  ;;  %v376_v23 = vld [vmem:[%s5915_s18 + $0x180] sm:$0xff]  ;;  %4540 = vmatpush1.bf16.msra.mxu0 %v5907_v13  ;;  %4578 = vmatpush1.bf16.msra.mxu1 %v5907_v13  ;;  %v5209_v37 = vpack.i.bf16 %v363_v33, %v5966_v32  ;;  %v377_v38 = vld [vmem:[%s5915_s18 + $0x188] sm:$0xff]  ;;  %v5986_v39 = vld [vmem:[%s5915_s18 + $0x18] sm:$0xff]  ;;  %p329_p4 = scmp.lt.s32.totalorder %s4277_s14, 3 }
  0x16   : > { %v5940_v24 = vpack.i.bf16 %v5935_v21, %v376_v23  ;;  %v5199_v26 = vpack.i.bf16 %v376_v23, %v362_v20  ;;  %4542 = vmatprep.subr.bf16.mxu0 %v5919_v15  ;;  %4580 = vmatprep.subr.bf16.mxu1 %v5919_v15  ;;  %v5214_v40 = vpack.i.bf16 %v377_v38, %v363_v33  ;;  %v406_v42 = vld [vmem:[%s8683_s1 + $0x80] sm:$0xff]  ;;  %v408_v43 = vld [vmem:[%s8683_s1 + $0x90] sm:$0xff]  ;;  %v411_v44 = vld [vmem:[%s8683_s1 + $0xa8] sm:$0xff] }
  0x17   : > { %5195 = vrot.lane.b32.xlu0 %v5194_v22, %s5794_s25  ;;  %v5995_v41 = vpack.i.bf16 %v5986_v39, %v377_v38  ;;  %v6011_v45 = vld [vmem:[%s5915_s18 + $0x98] sm:$0xff]  ;;  %v6014_v46 = vld [vmem:[%s5915_s18 + $0x110] sm:$0xff]  ;;  %v6016_v47 = vpack.c.bf16 %v408_v43, %v406_v42  ;;  %v410_v51 = vld [vmem:[%s8683_s1 + $0xa0] sm:$0xff]  ;;  %s8940_s14 = smov (!%p329_p4, %s4277_s14), 3 }
  0x18   : > { %5205 = vrot.lane.b32.xlu1 %v5940_v24, %s5795_s11  ;;  %v413_v48 = vld [vmem:[%s8683_s1 + $0xb8] sm:$0xff]  ;;  %v6022_v49 = vld [vmem:[%s5915_s18 + $0x190] sm:$0xff]  ;;  %v415_v54 = vld [vmem:[%s8683_s1 + $0xc8] sm:$0xff]  ;;  %v6046_v56 = vpack.i.bf16 %v6014_v46, %v5980_v36  ;;  %s4278_s15 = sshll.u32 %s8940_s14, 3 }
  0x19   : > { %4544 = vmatpush1.bf16.msra.mxu0 %v5944_v25  ;;  %4582 = vmatpush1.bf16.msra.mxu1 %v5944_v25  ;;  %v6024_v50 = vpack.c.bf16 %v413_v48, %v411_v44  ;;  %v412_v52 = vld [vmem:[%s8683_s1 + $0xb0] sm:$0xff]  ;;  %v417_v55 = vld [vmem:[%s8683_s1 + $0xd8] sm:$0xff]  ;;  %v414_v58 = vld [vmem:[%s8683_s1 + $0xc0] sm:$0xff]  ;;  %v5229_v60 = vpack.i.bf16 %v6022_v49, %v6014_v46  ;;  %s332_s21 = scalar_lea.vmem %s8691_s9, %s4278_s15 }
  0x1a   : > { %4546 = vmatprep.subr.bf16.mxu0 %v5948_v27  ;;  %4584 = vmatprep.subr.bf16.mxu1 %v5948_v27  ;;  %v6034_v53 = vpack.c.bf16 %v412_v52, %v410_v51  ;;  %v6049_v57 = vpack.c.bf16 %v417_v55, %v415_v54  ;;  %v416_v59 = vld [vmem:[%s8683_s1 + $0xd0] sm:$0xff]  ;;  %v6062_v61 = vld [vmem:[%s5915_s18 + $0x20] sm:$0xff]  ;;  %v419_v62 = vld [vmem:[%s8683_s1 + $0xe8] sm:$0xff] }
  0x1b   : > { %5200 = vrot.lane.b32.xlu0 %v5199_v26, %s5796_s16  ;;  %v421_v63 = vld [vmem:[%s8683_s1 + $0xf8] sm:$0xff]  ;;  %v6073_v0 = vpack.c.bf16 %v416_v59, %v414_v58  ;;  %v6079_v1 = vpack.i.bf16 %v6062_v61, %v6022_v49  ;;  %v418_v4 = vld [vmem:[%s8683_s1 + $0xe0] sm:$0xff]  ;;  %v420_v5 = vld [vmem:[%s8683_s1 + $0xf0] sm:$0xff] }
  0x1c   : > { %772 = vrot.lane.b32.xlu1 %v5935_v21, %s5797_s17  ;;  %v6082_v2 = vpack.c.bf16 %v421_v63, %v419_v62  ;;  %v423_v6 = vld [vmem:[%s8683_s1 + $0x108] sm:$0xff]  ;;  %v425_v9 = vld [vmem:[%s8683_s1 + $0x118] sm:$0xf]  ;;  %v6103_v11 = vpack.c.bf16 %v420_v5, %v418_v4  ;;  %v422_v14 = vld [vmem:[%s8683_s1 + $0x100] sm:$0xff] }
  0x1d   : > { %4548 = vmatpush1.bf16.msra.mxu0 %v5971_v34  ;;  %4586 = vmatpush1.bf16.msra.mxu1 %v5971_v34  ;;  %v6099_v10 = vld [vmem:[%s5915_s18 + $0x118] sm:$0xff]  ;;  %v6108_v12 = vpack.c.bf16 %v425_v9, %v423_v6  ;;  %v424_v16 = vld [vmem:[%s8683_s1 + $0x110] sm:$0xf]  ;;  %v6119_v17 = vld [vmem:[%s5915_s18 + $0xa0] sm:$0xff] }
  0x1e   : > { %4550 = vmatprep.subr.bf16.mxu0 %v5975_v35  ;;  %4588 = vmatprep.subr.bf16.mxu1 %v5975_v35  ;;  %v6123_v18 = vpack.i.bf16 %v6099_v10, %v6011_v45  ;;  %v6126_v20 = vld [vmem:[%s5915_s18 + $0x198] sm:$0xff]  ;;  %vm6130_vm2 = vmpackc.low %vm897_vm0, %vm5798_vm1  ;;  %v6135_v23 = vld [vmem:[%s5915_s18 + $0x28] sm:$0xff]  ;;  %v6139_v26 = vpack.c.bf16 %v424_v16, %v422_v14  ;;  %vm4106_vm0 = vcmask 408576  }
  0x1f   : > { %1260 = vrot.lane.b32.xlu0 %v5980_v36, %s5797_s17  ;;  %v5244_v28 = vpack.i.bf16 %v6126_v20, %v6099_v10  ;;  %v6152_v29 = vpack.i.bf16 %v6135_v23, %v6126_v20  ;;  %v6168_v30 = vld [vmem:[%s5915_s18 + $0x120] sm:$0xff]  ;;  %v6172_v31 = vld [vmem:[%s5915_s18 + $0xa8] sm:$0xff]  ;;  %v6205_v43 = vld [vmem:[%s5915_s18 + $0xb0] sm:$0xff] }
  0x20   : > { %5210 = vrot.lane.b32.xlu1 %v5209_v37, %s5794_s25  ;;  %v6175_v33 = vld [vmem:[%s5915_s18 + $0x1a0] sm:$0xff]  ;;  %v6181_v37 = vpack.i.bf16 %v6168_v30, %v6119_v17  ;;  %v6198_v42 = vld [vmem:[%s5915_s18 + $0x128] sm:$0xff]  ;;  %v6215_v51 = vld [vmem:[%s5915_s18 + $0x38] sm:$0xff] }
  0x21   : > { %4552 = vmatpush1.bf16.msra.mxu0 %v6016_v47  ;;  %4590 = vmatpush1.bf16.msra.mxu1 %v6016_v47  ;;  %v5259_v38 = vpack.i.bf16 %v6175_v33, %v6168_v30  ;;  %v6209_v44 = vpack.i.bf16 %v6198_v42, %v6172_v31  ;;  %v6212_v48 = vld [vmem:[%s5915_s18 + $0x1a8] sm:$0xff]  ;;  %8776 = vst [vmem:[#allocation2_spill] sm:$0xff] %v6215_v51  ;;  %v6231_v55 = vld [vmem:[%s5915_s18 + $0x130] sm:$0xff]  ;;  %v6234_v58 = vld [vmem:[%s5915_s18 + $0xb8] sm:$0xff] }
  0x22   : > { %4554 = vmatprep.subr.bf16.mxu0 %v6024_v50  ;;  %4592 = vmatprep.subr.bf16.mxu1 %v6024_v50  ;;  %v5274_v52 = vpack.i.bf16 %v6212_v48, %v6198_v42  ;;  %v6225_v54 = vpack.i.bf16 %v6215_v51, %v6212_v48  ;;  %8778 = vst [vmem:[#allocation4_spill] sm:$0xff] %v6231_v55  ;;  %8779 = vst [vmem:[#allocation5_spill] sm:$0xff] %v6234_v58  ;;  %v6237_v59 = vld [vmem:[%s5915_s18 + $0x1b0] sm:$0xff]  ;;  %v6250_v63 = vld [vmem:[%s5915_s18 + $0x40] sm:$0xff] }
  0x23   : > { %5215 = vrot.lane.b32.xlu0 %v5214_v40, %s5796_s16  ;;  %8780 = vst [vmem:[#allocation6_spill] sm:$0xff] %v6237_v59  ;;  %v5289_v62 = vpack.i.bf16 %v6237_v59, %v6231_v55  ;;  %8782 = vst [vmem:[#allocation8_spill] sm:$0xff] %v6250_v63  ;;  %v6256_v4 = vpack.i.bf16 %v6250_v63, %v6237_v59  ;;  %v6260_v5 = vld [vmem:[%s5915_s18 + $0x138] sm:$0xff]  ;;  %v6267_v6 = vld [vmem:[%s5915_s18 + $0xc0] sm:$0xff] }
  0x24   : > { %5220 = vrot.lane.b32.xlu1 %v5995_v41, %s5795_s11  ;;  %8777 = vst [vmem:[#allocation3_spill] sm:$0xff] %v6225_v54  ;;  %8784 = vst [vmem:[#allocation10_spill] sm:$0xff] %v6260_v5  ;;  %v6271_v9 = vpack.i.bf16 %v6260_v5, %v6234_v58  ;;  %v6274_v14 = vld [vmem:[%s5915_s18 + $0x1b8] sm:$0xff]  ;;  %v6277_v16 = vld [vmem:[%s5915_s18 + $0x48] sm:$0xff] }
  0x25   : > { %4556 = vmatpush1.bf16.msra.mxu0 %v6034_v53  ;;  %4594 = vmatpush1.bf16.msra.mxu1 %v6034_v53  ;;  %8783 = vst [vmem:[#allocation9_spill] sm:$0xff] %v6256_v4  ;;  %8785 = vst [vmem:[#allocation11_spill] sm:$0xff] %v6267_v6 }
  0x26   : > { %4558 = vmatprep.subr.bf16.mxu0 %v6049_v57  ;;  %4596 = vmatprep.subr.bf16.mxu1 %v6049_v57  ;;  %8786 = vst [vmem:[#allocation12_spill] sm:$0xff] %v6271_v9  ;;  %8787 = vst [vmem:[#allocation13_spill] sm:$0xff] %v6274_v14 }
  0x27   : > { %774 = vrot.lane.b32.xlu0 %v5986_v39, %s5797_s17  ;;  %8788 = vst [vmem:[#allocation14_spill] sm:$0xff] %v6277_v16 }
  0x28   : > { %1262 = vrot.lane.b32.xlu1 %v6011_v45, %s5797_s17 }
  0x29   : > { %4560 = vmatpush1.bf16.msra.mxu0 %v6073_v0  ;;  %4598 = vmatpush1.bf16.msra.mxu1 %v6073_v0  ;;  %v8816_v22 = vld [vmem:[#allocation4_spill] sm:$0xff] }
  0x2a   : > { %4562 = vmatprep.subr.bf16.mxu0 %v6082_v2  ;;  %4600 = vmatprep.subr.bf16.mxu1 %v6082_v2 }
  0x2b   : > { %5225 = vrot.lane.b32.xlu0 %v6046_v56, %s5794_s25 }
  0x2c   : > { %5230 = vrot.lane.b32.xlu1 %v5229_v60, %s5796_s16  ;;  %v6243_v60 = vpack.i.bf16 %v6231_v55, %v6205_v43 }
  0x2d   : > { %4564 = vmatpush1.bf16.msra.mxu0 %v6103_v11  ;;  %4602 = vmatpush1.bf16.msra.mxu1 %v6103_v11 }
  0x2e   : > { %4567 = vmatprep.subr.msk.bf16.mxu0 %vm6130_vm2, %v6108_v12  ;;  %4605 = vmatprep.subr.msk.bf16.mxu1 %vm6130_vm2, %v6108_v12  ;;  %8781 = vst [vmem:[#allocation7_spill] sm:$0xff] %v6243_v60 }
  0x2f   : > { %5235 = vrot.lane.b32.xlu0 %v6079_v1, %s5795_s11 }
  0x30   : > { %776 = vrot.lane.b32.xlu1 %v6062_v61, %s5797_s17 }
  0x31   : > { %4570 = vmatpush1.bf16.msk.msra.mxu0 %vm6130_vm2, %v6139_v26  ;;  %4608 = vmatpush1.bf16.msk.msra.mxu1 %vm6130_vm2, %v6139_v26 }
  0x32   : > { %4610 = vmatprep.subr.bf16.mxu0 %v5875_v3  ;;  %4648 = vmatprep.subr.bf16.mxu1 %v5875_v3  ;;  %v6188_v3 = vld [vmem:[%s5915_s18 + $0x30] sm:$0xff] }
  0x33   : > { %1264 = vrot.lane.b32.xlu0 %v6119_v17, %s5797_s17  ;;  %v6194_v40 = vpack.i.bf16 %v6188_v3, %v6175_v33 }
  0x34   : > { %5240 = vrot.lane.b32.xlu1 %v6123_v18, %s5794_s25 }
  0x37   : > { %5245 = vrot.lane.b32.xlu0 %v5244_v28, %s5796_s16  ;;  %v5304_v28 = vpack.i.bf16 %v6274_v14, %v6260_v5 }
  0x38   : > { %5250 = vrot.lane.b32.xlu1 %v6152_v29, %s5795_s11 }
  0x3b   : > { %778 = vrot.lane.b32.xlu0 %v6135_v23, %s5797_s17 }
  0x3c   : > { %1266 = vrot.lane.b32.xlu1 %v6172_v31, %s5797_s17 }
  0x3f   : > { %5255 = vrot.lane.b32.xlu0 %v6181_v37, %s5794_s25 }
  0x40   : > { %5260 = vrot.lane.b32.xlu1 %v5259_v38, %s5796_s16  ;;  %v6287_v38 = vpack.i.bf16 %v6277_v16, %v6274_v14 }
  0x42   : > { %8789 = vst [vmem:[#allocation15_spill] sm:$0xff] %v6287_v38 }
  0x43   : > { %5265 = vrot.lane.b32.xlu0 %v6194_v40, %s5795_s11 }
  0x44   : > { %780 = vrot.lane.b32.xlu1 %v6188_v3, %s5797_s17 }
  0x47   : > { %1268 = vrot.lane.b32.xlu0 %v6205_v43, %s5797_s17 }
  0x48   : > { %5270 = vrot.lane.b32.xlu1 %v6209_v44, %s5794_s25 }
  0x4b   : > { %5275 = vrot.lane.b32.xlu0 %v5274_v52, %s5796_s16  ;;  %v6293_v52 = vld [vmem:[%s5915_s18 + $0x140] sm:$0xff] }
  0x4c   : > { %5280 = vrot.lane.b32.xlu1 %v6225_v54, %s5795_s11  ;;  %8790 = vst [vmem:[#allocation16_spill] sm:$0xff] %v6293_v52 }
  0x4f   : > { %782 = vrot.lane.b32.xlu0 %v6215_v51, %s5797_s17 }
  0x50   : > { %1270 = vrot.lane.b32.xlu1 %v6234_v58, %s5797_s17 }
  0x53   : > { %5285 = vrot.lane.b32.xlu0 %v6243_v60, %s5794_s25 }
  0x54   : > { %5290 = vrot.lane.b32.xlu1 %v5289_v62, %s5796_s16  ;;  %v6296_v62 = vld [vmem:[%s5915_s18 + $0xc8] sm:$0xff] }
  0x55   : > { %8791 = vst [vmem:[#allocation17_spill] sm:$0xff] %v6296_v62 }
  0x57   : > { %5295 = vrot.lane.b32.xlu0 %v6256_v4, %s5795_s11  ;;  %v6299_v4 = vld [vmem:[%s5915_s18 + $0x1c0] sm:$0xff] }
  0x58   : > { %784 = vrot.lane.b32.xlu1 %v6250_v63, %s5797_s17  ;;  %8792 = vst [vmem:[#allocation18_spill] sm:$0xff] %v6299_v4  ;;  %v6305_v63 = vpack.i.bf16 %v6293_v52, %v6267_v6 }
  0x5a   : > { %8793 = vst [vmem:[#allocation19_spill] sm:$0xff] %v6305_v63 }
  0x5b   : > { %1272 = vrot.lane.b32.xlu0 %v6267_v6, %s5797_s17  ;;  %v6339_v6 = vld [vmem:[%s5915_s18 + $0x58] sm:$0xff] }
  0x5c   : > { %5300 = vrot.lane.b32.xlu1 %v6271_v9, %s5794_s25  ;;  %8800 = vst [vmem:[#allocation26_spill] sm:$0xff] %v6339_v6 }
  0x5f   : > { %5305 = vrot.lane.b32.xlu0 %v5304_v28, %s5796_s16  ;;  %v5319_v28 = vpack.i.bf16 %v6299_v4, %v6293_v52  ;;  %v6329_v52 = vld [vmem:[%s5915_s18 + $0xd0] sm:$0xff] }
  0x60   : > { %5310 = vrot.lane.b32.xlu1 %v6287_v38, %s5795_s11  ;;  %v6312_v38 = vld [vmem:[%s5915_s18 + $0x50] sm:$0xff]  ;;  %8797 = vst [vmem:[#allocation23_spill] sm:$0xff] %v6329_v52 }
  0x61   : > { %8794 = vst [vmem:[#allocation20_spill] sm:$0xff] %v6312_v38  ;;  %v6318_v14 = vpack.i.bf16 %v6312_v38, %v6299_v4  ;;  %v6336_v4 = vld [vmem:[%s5915_s18 + $0x1c8] sm:$0xff] }
  0x62   : > { %8799 = vst [vmem:[#allocation25_spill] sm:$0xff] %v6336_v4 }
  0x63   : > { %786 = vrot.lane.b32.xlu0 %v6277_v16, %s5797_s17  ;;  %8795 = vst [vmem:[#allocation21_spill] sm:$0xff] %v6318_v14  ;;  %v6322_v16 = vld [vmem:[%s5915_s18 + $0x148] sm:$0xff] }
  0x64   : > { %1274 = vrot.lane.b32.xlu1 %v6296_v62, %s5797_s17  ;;  %8796 = vst [vmem:[#allocation22_spill] sm:$0xff] %v6322_v16 }
  0x67   : > { %5315 = vrot.lane.b32.xlu0 %v6305_v63, %s5794_s25  ;;  %v6333_v63 = vpack.i.bf16 %v6322_v16, %v6296_v62  ;;  %v6358_v62 = vld [vmem:[%s5915_s18 + $0xd8] sm:$0xff] }
  0x68   : > { %5320 = vrot.lane.b32.xlu1 %v5319_v28, %s5796_s16  ;;  %v5334_v28 = vpack.i.bf16 %v6336_v4, %v6322_v16  ;;  %8803 = vst [vmem:[#allocation29_spill] sm:$0xff] %v6358_v62  ;;  %v6361_v16 = vld [vmem:[%s5915_s18 + $0x1d0] sm:$0xff] }
  0x69   : > { %8798 = vst [vmem:[#allocation24_spill] sm:$0xff] %v6333_v63  ;;  %8804 = vst [vmem:[#allocation30_spill] sm:$0xff] %v6361_v16 }
  0x6b   : > { %5325 = vrot.lane.b32.xlu0 %v6318_v14, %s5795_s11  ;;  %v6349_v14 = vpack.i.bf16 %v6339_v6, %v6336_v4 }
  0x6c   : > { %788 = vrot.lane.b32.xlu1 %v6312_v38, %s5797_s17  ;;  %v6355_v38 = vld [vmem:[%s5915_s18 + $0x150] sm:$0xff] }
  0x6d   : > { %8801 = vst [vmem:[#allocation27_spill] sm:$0xff] %v6349_v14  ;;  %8802 = vst [vmem:[#allocation28_spill] sm:$0xff] %v6355_v38  ;;  %v6367_v4 = vpack.i.bf16 %v6355_v38, %v6329_v52 }
  0x6f   : > { %1276 = vrot.lane.b32.xlu0 %v6329_v52, %s5797_s17  ;;  %8805 = vst [vmem:[#allocation31_spill] sm:$0xff] %v6367_v4  ;;  %v6401_v52 = vld [vmem:[%s5915_s18 + $0x68] sm:$0xff] }
  0x70   : > { %5330 = vrot.lane.b32.xlu1 %v6333_v63, %s5794_s25  ;;  %8812 = vst [vmem:[#allocation38_spill] sm:$0xff] %v6401_v52 }
  0x73   : > { %5335 = vrot.lane.b32.xlu0 %v5334_v28, %s5796_s16  ;;  %v5349_v28 = vpack.i.bf16 %v6361_v16, %v6355_v38  ;;  %v6391_v38 = vld [vmem:[%s5915_s18 + $0xe0] sm:$0xff] }
  0x74   : > { %5340 = vrot.lane.b32.xlu1 %v6349_v14, %s5795_s11  ;;  %v6374_v14 = vld [vmem:[%s5915_s18 + $0x60] sm:$0xff]  ;;  %8809 = vst [vmem:[#allocation35_spill] sm:$0xff] %v6391_v38 }
  0x75   : > { %8806 = vst [vmem:[#allocation32_spill] sm:$0xff] %v6374_v14  ;;  %v6380_v63 = vpack.i.bf16 %v6374_v14, %v6361_v16  ;;  %v6398_v16 = vld [vmem:[%s5915_s18 + $0x1d8] sm:$0xff] }
  0x76   : > { %8811 = vst [vmem:[#allocation37_spill] sm:$0xff] %v6398_v16 }
  0x77   : > { %790 = vrot.lane.b32.xlu0 %v6339_v6, %s5797_s17  ;;  %8807 = vst [vmem:[#allocation33_spill] sm:$0xff] %v6380_v63  ;;  %v6384_v6 = vld [vmem:[%s5915_s18 + $0x158] sm:$0xff] }
  0x78   : > { %1278 = vrot.lane.b32.xlu1 %v6358_v62, %s5797_s17  ;;  %8808 = vst [vmem:[#allocation34_spill] sm:$0xff] %v6384_v6 }
  0x7b   : > { %5345 = vrot.lane.b32.xlu0 %v6367_v4, %s5794_s25  ;;  %v6395_v4 = vpack.i.bf16 %v6384_v6, %v6358_v62  ;;  %v6417_v62 = vld [vmem:[%s5915_s18 + $0xe8] sm:$0xff] }
  0x7c   : > { %5350 = vrot.lane.b32.xlu1 %v5349_v28, %s5796_s16  ;;  %v5364_v28 = vpack.i.bf16 %v6398_v16, %v6384_v6  ;;  %8814 = vst [vmem:[#allocation40_spill] sm:$0xff] %v6417_v62  ;;  %v334_v6 = vld [vmem:[%s5915_s18] sm:$0xff] }
  0x7d   : > { %8810 = vst [vmem:[#allocation36_spill] sm:$0xff] %v6395_v4 }
  0x7f   : > { %5355 = vrot.lane.b32.xlu0 %v6380_v63, %s5795_s11  ;;  %v6411_v63 = vpack.i.bf16 %v6401_v52, %v6398_v16 }
  0x80   : > { %792 = vrot.lane.b32.xlu1 %v6374_v14, %s5797_s17 }
  0x81   : > { %8813 = vst [vmem:[#allocation39_spill] sm:$0xff] %v6411_v63 }
  0x83   : > { %1280 = vrot.lane.b32.xlu0 %v6391_v38, %s5797_s17 }
  0x84   : > { %5360 = vrot.lane.b32.xlu1 %v6395_v4, %s5794_s25 }
  0x87   : > { %5365 = vrot.lane.b32.xlu0 %v5364_v28, %s5796_s16  ;;  %v5379_v28 = vpack.i.bf16 %v5980_v36, %v5935_v21 }
  0x88   : > { %5370 = vrot.lane.b32.xlu1 %v6411_v63, %s5795_s11 }
  0x89   : > { %v5196_v14 = vpop.permute.xlu0 %5195 }
  0x8a   : > { %v5206_v5 = vpop.permute.xlu1 %5205  ;;  %v5198_v38 = vunpack.i.h.bf16 %v5196_v14  ;;  %v5197_v9 = vunpack.i.l.bf16 %v5196_v14 }
  0x8b   : > { %794 = vrot.lane.b32.xlu0 %v6401_v52, %s5797_s17  ;;  %v5208_v58 = vunpack.i.h.bf16 %v5206_v5  ;;  %v5207_v51 = vunpack.i.l.bf16 %v5206_v5 }
  0x8c   : > { %1282 = vrot.lane.b32.xlu1 %v6417_v62, %s5797_s17  ;;  %v1296_v14 = vsel %vm808_vm3, %v5931_v19, %v5198_v38  ;;  %v809_v52 = vsel %vm808_vm3, %v334_v6, %v5197_v9  ;;  %v335_v6 = vld [vmem:[%s5915_s18 + $0x8] sm:$0xff] }
  0x8d   : > { %v5201_v16 = vpop.permute.xlu0 %5200 }
  0x8e   : > { %v5203_v63 = vunpack.i.h.bf16 %v5201_v16  ;;  %v5202_v4 = vunpack.i.l.bf16 %v5201_v16  ;;  %v773_v54 = vpop.permute.xlu1 %772 }
  0x8f   : > { %5375 = vrot.lane.b32.xlu0 %v5940_v24, %s5794_s25  ;;  %4281 = vmatprep.mubr.msk.f32.mxu0 %vm872_vm4, %v773_v54 }
  0x90   : > { %5380 = vrot.lane.b32.xlu1 %v5379_v28, %s5796_s16  ;;  %v822_v62 = vsel %vm821_vm5, %v809_v52, %v5202_v4  ;;  %v1308_v16 = vsel %vm821_vm5, %v1296_v14, %v5203_v63 }
  0x91   : > { %v1261_v59 = vpop.permute.xlu0 %1260  ;;  %v835_v55 = vsel %vm834_vm6, %v822_v62, %v5207_v51  ;;  %v1320_v19 = vsel %vm834_vm6, %v1308_v16, %v5208_v58 }
  0x92   : > { %v5211_v38 = vpop.permute.xlu1 %5210  ;;  %4295 = vmatprep.mubr.msk.f32.mxu1 %vm872_vm4, %v1261_v59  ;;  %v848_v5 = vsel %vm847_vm7, %v835_v55, %v773_v54  ;;  %v1332_v24 = vsel %vm847_vm7, %v1320_v19, %v1261_v59 }
  0x93   : > { %v5213_v9 = vunpack.i.h.bf16 %v5211_v38  ;;  %v5212_v60 = vunpack.i.l.bf16 %v5211_v38  ;;  %5385 = vrot.lane.b32.xlu0 %v6046_v56, %s5795_s11  ;;  %969 = vmatmul.mubr.f32.vlgmr.msra.gmra.mrb[0].mxu0 %v848_v5 }
  0x94   : > { %1747 = vrot.lane.b32.xlu1 %v6014_v46, %s5797_s17  ;;  %1433 = vmatmul.mubr.f32.vlgmr.msra.gmra.mrb[0].mxu1 %v1332_v24 }
  0x95   : > { %v1297_v51 = vsel %vm808_vm3, %v5966_v32, %v5213_v9  ;;  %v810_v58 = vsel %vm808_vm3, %v335_v6, %v5212_v60  ;;  %v5216_v63 = vpop.permute.xlu0 %5215  ;;  %4612 = vmatpush1.bf16.msra.mxu0 %v5887_v7  ;;  %4650 = vmatpush1.bf16.msra.mxu1 %v5887_v7  ;;  %v5394_v32 = vpack.i.bf16 %v6011_v45, %v5986_v39 }
  0x96   : > { %v5218_v54 = vunpack.i.h.bf16 %v5216_v63  ;;  %v5217_v55 = vunpack.i.l.bf16 %v5216_v63  ;;  %v5221_v59 = vpop.permute.xlu1 %5220  ;;  %4614 = vmatprep.subr.bf16.mxu0 %v5889_v8  ;;  %4652 = vmatprep.subr.bf16.mxu1 %v5889_v8 }
  0x97   : > { %v5223_v56 = vunpack.i.h.bf16 %v5221_v59  ;;  %v5222_v46 = vunpack.i.l.bf16 %v5221_v59  ;;  %2210 = vrot.lane.b32.xlu0 %v6022_v49, %s5797_s17 }
  0x98   : > { %5390 = vrot.lane.b32.xlu1 %v5995_v41, %s5794_s25  ;;  %v823_v7 = vsel %vm821_vm5, %v810_v58, %v5217_v55  ;;  %v1309_v60 = vsel %vm821_vm5, %v1297_v51, %v5218_v54 }
  0x99   : > { %v775_v4 = vpop.permute.xlu0 %774  ;;  %v836_v52 = vsel %vm834_vm6, %v823_v7, %v5222_v46  ;;  %v1321_v8 = vsel %vm834_vm6, %v1309_v60, %v5223_v56  ;;  %4616 = vmatpush1.bf16.msra.mxu0 %v5907_v13  ;;  %4654 = vmatpush1.bf16.msra.mxu1 %v5907_v13 }
  0x9a   : > { %v1263_v49 = vpop.permute.xlu1 %1262  ;;  %4282 = vmatprep.mubr.msk.f32.mxu0 %vm872_vm4, %v775_v4  ;;  %v849_v62 = vsel %vm847_vm7, %v836_v52, %v775_v4  ;;  %4618 = vmatprep.subr.bf16.mxu0 %v5919_v15 }
  0x9b   : > { %4296 = vmatprep.mubr.msk.f32.mxu1 %vm872_vm4, %v1263_v49  ;;  %5395 = vrot.lane.b32.xlu0 %v5394_v32, %s5796_s16  ;;  %v1333_v41 = vsel %vm847_vm7, %v1321_v8, %v1263_v49 }
  0x9c   : > { %5400 = vrot.lane.b32.xlu1 %v6123_v18, %s5795_s11  ;;  %975 = vmatmul.mubr.f32.gmra.mrb[2].mxu0 %v849_v62  ;;  %v5439_v62 = vpack.i.bf16 %v6205_v43, %v6188_v3 }
  0x9d   : > { %1439 = vmatmul.mubr.f32.gmra.mrb[2].mxu1 %v1333_v41  ;;  %v5226_v28 = vpop.permute.xlu0 %5225  ;;  %4620 = vmatpush1.bf16.msra.mxu0 %v5944_v25 }
  0x9e   : > { %v5228_v13 = vunpack.i.h.bf16 %v5226_v28  ;;  %v5227_v14 = vunpack.i.l.bf16 %v5226_v28  ;;  %v5231_v16 = vpop.permute.xlu1 %5230  ;;  %4656 = vmatprep.subr.bf16.mxu1 %v5919_v15  ;;  %4622 = vmatprep.subr.bf16.mxu0 %v5948_v27  ;;  %v5409_v15 = vpack.i.bf16 %v6119_v17, %v6062_v61 }
  0x9f   : > { %v5233_v19 = vunpack.i.h.bf16 %v5231_v16  ;;  %v5232_v38 = vunpack.i.l.bf16 %v5231_v16  ;;  %1749 = vrot.lane.b32.xlu0 %v6099_v10, %s5797_s17  ;;  %4658 = vmatpush1.bf16.msra.mxu1 %v5944_v25 }
  0xa0   : > { %v1298_v18 = vsel %vm808_vm3, %v5980_v36, %v5228_v13  ;;  %v811_v6 = vsel %vm808_vm3, %v5935_v21, %v5227_v14  ;;  %2212 = vrot.lane.b32.xlu1 %v6126_v20, %s5797_s17  ;;  %4660 = vmatprep.subr.bf16.mxu1 %v5948_v27 }
  0xa1   : > { %v5236_v5 = vpop.permute.xlu0 %5235  ;;  %4624 = vmatpush1.bf16.msra.mxu0 %v5971_v34  ;;  %v824_v21 = vsel %vm821_vm5, %v811_v6, %v5232_v38  ;;  %v1310_v36 = vsel %vm821_vm5, %v1298_v18, %v5233_v19  ;;  %v8815_v38 = vld [vmem:[#allocation7_spill] sm:$0xff] }
  0xa2   : > { %v5238_v10 = vunpack.i.h.bf16 %v5236_v5  ;;  %v5237_v24 = vunpack.i.l.bf16 %v5236_v5  ;;  %v777_v25 = vpop.permute.xlu1 %776  ;;  %4626 = vmatprep.subr.bf16.mxu0 %v5975_v35 }
  0xa3   : > { %5405 = vrot.lane.b32.xlu0 %v6079_v1, %s5794_s25  ;;  %4283 = vmatprep.mubr.msk.f32.mxu0 %vm872_vm4, %v777_v25 }
  0xa4   : > { %5410 = vrot.lane.b32.xlu1 %v5409_v15, %s5796_s16  ;;  %v837_v27 = vsel %vm834_vm6, %v824_v21, %v5237_v24  ;;  %v1322_v20 = vsel %vm834_vm6, %v1310_v36, %v5238_v10  ;;  %4662 = vmatpush1.bf16.msra.mxu1 %v5971_v34  ;;  %v8817_v21 = vld [vmem:[#allocation6_spill] sm:$0xff] }
  0xa5   : > { %v1265_v9 = vpop.permute.xlu0 %1264  ;;  %v850_v51 = vsel %vm847_vm7, %v837_v27, %v777_v25  ;;  %4628 = vmatpush1.bf16.msra.mxu0 %v6016_v47  ;;  %4664 = vmatprep.subr.bf16.mxu1 %v5975_v35  ;;  %v8818_v36 = vld [vmem:[#allocation2_spill] sm:$0xff]  ;;  %v8819_v27 = vld [vmem:[#allocation5_spill] sm:$0xff] }
  0xa6   : > { %v5241_v1 = vpop.permute.xlu1 %5240  ;;  %981 = vmatmul.mubr.f32.gmra.mrb[4].mxu0 %v850_v51  ;;  %4297 = vmatprep.mubr.msk.f32.mxu1 %vm872_vm4, %v1265_v9  ;;  %v1334_v58 = vsel %vm847_vm7, %v1322_v20, %v1265_v9  ;;  %v5454_v20 = vpack.i.bf16 %v8819_v27, %v8818_v36 }
  0xa7   : > { %v5243_v63 = vunpack.i.h.bf16 %v5241_v1  ;;  %v5242_v54 = vunpack.i.l.bf16 %v5241_v1  ;;  %5415 = vrot.lane.b32.xlu0 %v6181_v37, %s5795_s11  ;;  %1445 = vmatmul.mubr.f32.gmra.mrb[4].mxu1 %v1334_v58 }
  0xa8   : > { %1751 = vrot.lane.b32.xlu1 %v6168_v30, %s5797_s17  ;;  %4666 = vmatpush1.bf16.msra.mxu1 %v6016_v47 }
  0xa9   : > { %v1299_v34 = vsel %vm808_vm3, %v6011_v45, %v5243_v63  ;;  %v812_v35 = vsel %vm808_vm3, %v5986_v39, %v5242_v54  ;;  %v5246_v55 = vpop.permute.xlu0 %5245  ;;  %4630 = vmatprep.subr.bf16.mxu0 %v6024_v50  ;;  %4668 = vmatprep.subr.bf16.mxu1 %v6024_v50  ;;  %v5424_v45 = vpack.i.bf16 %v6172_v31, %v6135_v23 }
  0xaa   : > { %v5248_v59 = vunpack.i.h.bf16 %v5246_v55  ;;  %v5247_v56 = vunpack.i.l.bf16 %v5246_v55  ;;  %v5251_v37 = vpop.permute.xlu1 %5250  ;;  %4632 = vmatpush1.bf16.msra.mxu0 %v6034_v53 }
  0xab   : > { %v5253_v46 = vunpack.i.h.bf16 %v5251_v37  ;;  %v5252_v30 = vunpack.i.l.bf16 %v5251_v37  ;;  %2214 = vrot.lane.b32.xlu0 %v6175_v33, %s5797_s17  ;;  %4634 = vmatprep.subr.bf16.mxu0 %v6049_v57 }
  0xac   : > { %5420 = vrot.lane.b32.xlu1 %v6152_v29, %s5794_s25  ;;  %v825_v39 = vsel %vm821_vm5, %v812_v35, %v5247_v56  ;;  %v1311_v47 = vsel %vm821_vm5, %v1299_v34, %v5248_v59  ;;  %4670 = vmatpush1.bf16.msra.mxu1 %v6034_v53  ;;  %v8821_v35 = vld [vmem:[#allocation12_spill] sm:$0xff] }
  0xad   : > { %v779_v50 = vpop.permute.xlu0 %778  ;;  %v838_v32 = vsel %vm834_vm6, %v825_v39, %v5252_v30  ;;  %v1323_v7 = vsel %vm834_vm6, %v1311_v47, %v5253_v46  ;;  %4672 = vmatprep.subr.bf16.mxu1 %v6049_v57 }
  0xae   : > { %v1267_v33 = vpop.permute.xlu1 %1266  ;;  %4284 = vmatprep.mubr.msk.f32.mxu0 %vm872_vm4, %v779_v50  ;;  %v851_v60 = vsel %vm847_vm7, %v838_v32, %v779_v50  ;;  %4636 = vmatpush1.bf16.msra.mxu0 %v6073_v0  ;;  %v8823_v50 = vld [vmem:[#allocation13_spill] sm:$0xff] }
  0xaf   : > { %4298 = vmatprep.mubr.msk.f32.mxu1 %vm872_vm4, %v1267_v33  ;;  %5425 = vrot.lane.b32.xlu0 %v5424_v45, %s5796_s16  ;;  %v1335_v53 = vsel %vm847_vm7, %v1323_v7, %v1267_v33  ;;  %v8822_v45 = vld [vmem:[#allocation10_spill] sm:$0xff]  ;;  %v8824_v7 = vld [vmem:[#allocation8_spill] sm:$0xff]  ;;  %v8825_v33 = vld [vmem:[#allocation11_spill] sm:$0xff] }
  0xb0   : > { %987 = vmatmul.mubr.f32.gmra.mrb[6].mxu0 %v851_v60  ;;  %1451 = vmatmul.mubr.f32.gmra.mrb[6].mxu1 %v1335_v53  ;;  %v5469_v60 = vpack.i.bf16 %v8825_v33, %v8824_v7 }
  0xb1   : > { %5430 = vrot.lane.b32.xlu1 %v6209_v44, %s5795_s11  ;;  %v5256_v29 = vpop.permute.xlu0 %5255  ;;  %4674 = vmatpush1.bf16.msra.mxu1 %v6073_v0 }
  0xb2   : > { %v5258_v57 = vunpack.i.h.bf16 %v5256_v29  ;;  %v5257_v4 = vunpack.i.l.bf16 %v5256_v29  ;;  %v5261_v52 = vpop.permute.xlu1 %5260  ;;  %4638 = vmatprep.subr.bf16.mxu0 %v6082_v2  ;;  %4676 = vmatprep.subr.bf16.mxu1 %v6082_v2 }
  0xb3   : > { %v5263_v8 = vunpack.i.h.bf16 %v5261_v52  ;;  %v5262_v49 = vunpack.i.l.bf16 %v5261_v52  ;;  %1753 = vrot.lane.b32.xlu0 %v6198_v42, %s5797_s17  ;;  %4640 = vmatpush1.bf16.msra.mxu0 %v6103_v11 }
  0xb4   : > { %v1300_v44 = vsel %vm808_vm3, %v6119_v17, %v5258_v57  ;;  %v813_v0 = vsel %vm808_vm3, %v6062_v61, %v5257_v4  ;;  %4643 = vmatprep.subr.msk.bf16.mxu0 %vm6130_vm2, %v6108_v12  ;;  %v8826_v4 = vld [vmem:[#allocation9_spill] sm:$0xff] }
  0xb5   : > { %2216 = vrot.lane.b32.xlu1 %v6212_v48, %s5797_s17  ;;  %v5266_v2 = vpop.permute.xlu0 %5265  ;;  %4678 = vmatpush1.bf16.msra.mxu1 %v6103_v11  ;;  %v826_v61 = vsel %vm821_vm5, %v813_v0, %v5262_v49  ;;  %v1312_v17 = vsel %vm821_vm5, %v1300_v44, %v5263_v8 }
  0xb6   : > { %v5268_v42 = vunpack.i.h.bf16 %v5266_v2  ;;  %v5267_v41 = vunpack.i.l.bf16 %v5266_v2  ;;  %v781_v28 = vpop.permute.xlu1 %780  ;;  %4681 = vmatprep.subr.msk.bf16.mxu1 %vm6130_vm2, %v6108_v12 }
  0xb7   : > { %5435 = vrot.lane.b32.xlu0 %v6194_v40, %s5794_s25  ;;  %4285 = vmatprep.mubr.msk.f32.mxu0 %vm872_vm4, %v781_v28 }
  0xb8   : > { %v839_v48 = vsel %vm834_vm6, %v826_v61, %v5267_v41  ;;  %v1324_v11 = vsel %vm834_vm6, %v1312_v17, %v5268_v42  ;;  %4646 = vmatpush1.bf16.msk.msra.mxu0 %vm6130_vm2, %v6139_v26  ;;  %v8827_v41 = vld [vmem:[#allocation19_spill] sm:$0xff]  ;;  %v8828_v17 = vld [vmem:[#allocation16_spill] sm:$0xff] }
  0xb9   : > { %5440 = vrot.lane.b32.xlu1 %v5439_v62, %s5796_s16  ;;  %v1269_v12 = vpop.permute.xlu0 %1268  ;;  %v852_v13 = vsel %vm847_vm7, %v839_v48, %v781_v28  ;;  %4684 = vmatpush1.bf16.msk.msra.mxu1 %vm6130_vm2, %v6139_v26 }
  0xba   : > { %v5271_v40 = vpop.permute.xlu1 %5270  ;;  %993 = vmatmul.mubr.f32.gmra.mrb[8].mxu0 %v852_v13  ;;  %4299 = vmatprep.mubr.msk.f32.mxu1 %vm872_vm4, %v1269_v12  ;;  %v1336_v14 = vsel %vm847_vm7, %v1324_v11, %v1269_v12 }
  0xbb   : > { %v5273_v16 = vunpack.i.h.bf16 %v5271_v40  ;;  %v5272_v19 = vunpack.i.l.bf16 %v5271_v40  ;;  %5445 = vrot.lane.b32.xlu0 %v8815_v38, %s5795_s11  ;;  %1457 = vmatmul.mubr.f32.gmra.mrb[8].mxu1 %v1336_v14  ;;  %v8831_v38 = vld [vmem:[#allocation17_spill] sm:$0xff] }
  0xbd   : > { %v1301_v18 = vsel %vm808_vm3, %v6172_v31, %v5273_v16  ;;  %v814_v6 = vsel %vm808_vm3, %v6135_v23, %v5272_v19  ;;  %1755 = vrot.lane.b32.xlu1 %v8816_v22, %s5797_s17  ;;  %v5276_v26 = vpop.permute.xlu0 %5275  ;;  %v8820_v23 = vld [vmem:[#allocation3_spill] sm:$0xff]  ;;  %v8829_v16 = vld [vmem:[#allocation18_spill] sm:$0xff] }
  0xbe   : > { %v5278_v15 = vunpack.i.h.bf16 %v5276_v26  ;;  %v5277_v5 = vunpack.i.l.bf16 %v5276_v26  ;;  %v5281_v10 = vpop.permute.xlu1 %5280  ;;  %v8830_v19 = vld [vmem:[#allocation14_spill] sm:$0xff]  ;;  %v8832_v26 = vld [vmem:[#allocation15_spill] sm:$0xff] }
  0xbf   : > { %v5283_v24 = vunpack.i.h.bf16 %v5281_v10  ;;  %v5282_v25 = vunpack.i.l.bf16 %v5281_v10  ;;  %2218 = vrot.lane.b32.xlu0 %v8817_v21, %s5797_s17 }
  0xc0   : > { %v827_v31 = vsel %vm821_vm5, %v814_v6, %v5277_v5  ;;  %v1313_v9 = vsel %vm821_vm5, %v1301_v18, %v5278_v15  ;;  %v5484_v18 = vpack.i.bf16 %v8831_v38, %v8830_v19 }
  0xc1   : > { %5450 = vrot.lane.b32.xlu1 %v8820_v23, %s5794_s25  ;;  %v783_v51 = vpop.permute.xlu0 %782  ;;  %v840_v1 = vsel %vm834_vm6, %v827_v31, %v5282_v25  ;;  %v1325_v58 = vsel %vm834_vm6, %v1313_v9, %v5283_v24 }
  0xc2   : > { %v1271_v63 = vpop.permute.xlu1 %1270  ;;  %4286 = vmatprep.mubr.msk.f32.mxu0 %vm872_vm4, %v783_v51  ;;  %v853_v54 = vsel %vm847_vm7, %v840_v1, %v783_v51  ;;  %v8834_v1 = vld [vmem:[#allocation22_spill] sm:$0xff] }
  0xc3   : > { %4300 = vmatprep.mubr.msk.f32.mxu1 %vm872_vm4, %v1271_v63  ;;  %5455 = vrot.lane.b32.xlu0 %v5454_v20, %s5796_s16  ;;  %v1337_v34 = vsel %vm847_vm7, %v1325_v58, %v1271_v63 }
  0xc4   : > { %999 = vmatmul.mubr.f32.gmra.mrb[10].mxu0 %v853_v54  ;;  %1463 = vmatmul.mubr.f32.gmra.mrb[10].mxu1 %v1337_v34  ;;  %v8835_v54 = vld [vmem:[#allocation25_spill] sm:$0xff] }
  0xc5   : > { %5460 = vrot.lane.b32.xlu1 %v8821_v35, %s5795_s11  ;;  %v5286_v55 = vpop.permute.xlu0 %5285  ;;  %v8836_v35 = vld [vmem:[#allocation20_spill] sm:$0xff] }
  0xc6   : > { %v5288_v59 = vunpack.i.h.bf16 %v5286_v55  ;;  %v5287_v56 = vunpack.i.l.bf16 %v5286_v55  ;;  %v5291_v37 = vpop.permute.xlu1 %5290  ;;  %v8837_v55 = vld [vmem:[#allocation23_spill] sm:$0xff] }
  0xc7   : > { %v5293_v46 = vunpack.i.h.bf16 %v5291_v37  ;;  %v5292_v30 = vunpack.i.l.bf16 %v5291_v37  ;;  %1757 = vrot.lane.b32.xlu0 %v8822_v45, %s5797_s17 }
  0xc8   : > { %v1302_v39 = vsel %vm808_vm3, %v6205_v43, %v5288_v59  ;;  %v815_v47 = vsel %vm808_vm3, %v6188_v3, %v5287_v56  ;;  %v5499_v59 = vpack.i.bf16 %v8837_v55, %v8836_v35 }
  0xc9   : > { %2220 = vrot.lane.b32.xlu1 %v8823_v50, %s5797_s17  ;;  %v5296_v32 = vpop.permute.xlu0 %5295  ;;  %v828_v43 = vsel %vm821_vm5, %v815_v47, %v5292_v30  ;;  %v1314_v52 = vsel %vm821_vm5, %v1302_v39, %v5293_v46  ;;  %v8838_v30 = vld [vmem:[#allocation21_spill] sm:$0xff] }
  0xca   : > { %v5298_v53 = vunpack.i.h.bf16 %v5296_v32  ;;  %v5297_v29 = vunpack.i.l.bf16 %v5296_v32  ;;  %v785_v57 = vpop.permute.xlu1 %784 }
  0xcb   : > { %5465 = vrot.lane.b32.xlu0 %v8826_v4, %s5794_s25  ;;  %4287 = vmatprep.mubr.msk.f32.mxu0 %vm872_vm4, %v785_v57 }
  0xcc   : > { %v841_v3 = vsel %vm834_vm6, %v828_v43, %v5297_v29  ;;  %v1326_v8 = vsel %vm834_vm6, %v1314_v52, %v5298_v53  ;;  %v8840_v52 = vld [vmem:[#allocation28_spill] sm:$0xff] }
  0xcd   : > { %5470 = vrot.lane.b32.xlu1 %v5469_v60, %s5796_s16  ;;  %v1273_v49 = vpop.permute.xlu0 %1272  ;;  %v854_v44 = vsel %vm847_vm7, %v841_v3, %v785_v57  ;;  %v8839_v57 = vld [vmem:[#allocation31_spill] sm:$0xff] }
  0xce   : > { %v5301_v0 = vpop.permute.xlu1 %5300  ;;  %1005 = vmatmul.mubr.f32.gmra.mrb[12].mxu0 %v854_v44  ;;  %4301 = vmatprep.mubr.msk.f32.mxu1 %vm872_vm4, %v1273_v49  ;;  %v1338_v2 = vsel %vm847_vm7, %v1326_v8, %v1273_v49 }
  0xcf   : > { %v5303_v62 = vunpack.i.h.bf16 %v5301_v0  ;;  %v5302_v42 = vunpack.i.l.bf16 %v5301_v0  ;;  %5475 = vrot.lane.b32.xlu0 %v8827_v41, %s5795_s11  ;;  %1469 = vmatmul.mubr.f32.gmra.mrb[12].mxu1 %v1338_v2  ;;  %v8843_v41 = vld [vmem:[#allocation29_spill] sm:$0xff] }
  0xd1   : > { %v1303_v28 = vsel %vm808_vm3, %v8819_v27, %v5303_v62  ;;  %v816_v61 = vsel %vm808_vm3, %v8818_v36, %v5302_v42  ;;  %1759 = vrot.lane.b32.xlu1 %v8828_v17, %s5797_s17  ;;  %v5306_v48 = vpop.permute.xlu0 %5305  ;;  %v8833_v36 = vld [vmem:[#allocation24_spill] sm:$0xff]  ;;  %v8841_v62 = vld [vmem:[#allocation30_spill] sm:$0xff] }
  0xd2   : > { %v5308_v11 = vunpack.i.h.bf16 %v5306_v48  ;;  %v5307_v12 = vunpack.i.l.bf16 %v5306_v48  ;;  %v5311_v13 = vpop.permute.xlu1 %5310  ;;  %v8842_v42 = vld [vmem:[#allocation26_spill] sm:$0xff]  ;;  %v8844_v48 = vld [vmem:[#allocation27_spill] sm:$0xff] }
  0xd3   : > { %v5313_v40 = vunpack.i.h.bf16 %v5311_v13  ;;  %v5312_v14 = vunpack.i.l.bf16 %v5311_v13  ;;  %2222 = vrot.lane.b32.xlu0 %v8829_v16, %s5797_s17 }
  0xd4   : > { %v829_v6 = vsel %vm821_vm5, %v816_v61, %v5307_v12  ;;  %v1315_v22 = vsel %vm821_vm5, %v1303_v28, %v5308_v11  ;;  %v5514_v28 = vpack.i.bf16 %v8843_v41, %v8842_v42 }
  0xd5   : > { %5480 = vrot.lane.b32.xlu1 %v8832_v26, %s5794_s25  ;;  %v787_v15 = vpop.permute.xlu0 %786  ;;  %v842_v5 = vsel %vm834_vm6, %v829_v6, %v5312_v14  ;;  %v1327_v10 = vsel %vm834_vm6, %v1315_v22, %v5313_v40 }
  0xd6   : > { %v1275_v24 = vpop.permute.xlu1 %1274  ;;  %4288 = vmatprep.mubr.msk.f32.mxu0 %vm872_vm4, %v787_v15  ;;  %v855_v25 = vsel %vm847_vm7, %v842_v5, %v787_v15  ;;  %v8846_v5 = vld [vmem:[#allocation34_spill] sm:$0xff] }
  0xd7   : > { %4302 = vmatprep.mubr.msk.f32.mxu1 %vm872_vm4, %v1275_v24  ;;  %5485 = vrot.lane.b32.xlu0 %v5484_v18, %s5796_s16  ;;  %v1339_v21 = vsel %vm847_vm7, %v1327_v10, %v1275_v24  ;;  %v374_v10 = vld [vmem:[%s5915_s18 + $0x160] sm:$0xff] }
  0xd8   : > { %1011 = vmatmul.mubr.f32.gmra.mrb[14].mxu0 %v855_v25  ;;  %1475 = vmatmul.mubr.f32.gmra.mrb[14].mxu1 %v1339_v21  ;;  %v8847_v21 = vld [vmem:[#allocation32_spill] sm:$0xff] }
  0xd9   : > { %5490 = vrot.lane.b32.xlu1 %v8833_v36, %s5795_s11  ;;  %v5316_v27 = vpop.permute.xlu0 %5315  ;;  %v8848_v36 = vld [vmem:[#allocation35_spill] sm:$0xff] }
  0xda   : > { %v5318_v20 = vunpack.i.h.bf16 %v5316_v27  ;;  %v5317_v31 = vunpack.i.l.bf16 %v5316_v27  ;;  %v5321_v9 = vpop.permute.xlu1 %5320  ;;  %v5529_v27 = vpack.i.bf16 %v8848_v36, %v8847_v21 }
  0xdb   : > { %v5323_v23 = vunpack.i.h.bf16 %v5321_v9  ;;  %v5322_v51 = vunpack.i.l.bf16 %v5321_v9  ;;  %1761 = vrot.lane.b32.xlu0 %v8834_v1, %s5797_s17  ;;  %v5534_v1 = vpack.i.bf16 %v374_v10, %v8848_v36 }
  0xdc   : > { %v1304_v58 = vsel %vm808_vm3, %v8825_v33, %v5318_v20  ;;  %v817_v63 = vsel %vm808_vm3, %v8824_v7, %v5317_v31  ;;  %v8849_v31 = vld [vmem:[#allocation37_spill] sm:$0xff] }
  0xdd   : > { %2224 = vrot.lane.b32.xlu1 %v8835_v54, %s5797_s17  ;;  %v5326_v34 = vpop.permute.xlu0 %5325  ;;  %v830_v45 = vsel %vm821_vm5, %v817_v63, %v5322_v51  ;;  %v1316_v39 = vsel %vm821_vm5, %v1304_v58, %v5323_v23  ;;  %v8850_v58 = vld [vmem:[#allocation33_spill] sm:$0xff] }
  0xde   : > { %v5328_v56 = vunpack.i.h.bf16 %v5326_v34  ;;  %v5327_v37 = vunpack.i.l.bf16 %v5326_v34  ;;  %v789_v46 = vpop.permute.xlu1 %788 }
  0xdf   : > { %5495 = vrot.lane.b32.xlu0 %v8838_v30, %s5794_s25  ;;  %4289 = vmatprep.mubr.msk.f32.mxu0 %vm872_vm4, %v789_v46 }
  0xe0   : > { %v843_v47 = vsel %vm834_vm6, %v830_v45, %v5327_v37  ;;  %v1328_v50 = vsel %vm834_vm6, %v1316_v39, %v5328_v56  ;;  %v388_v45 = vld [vmem:[%s5915_s18 + $0x1e0] sm:$0xff] }
  0xe1   : > { %5500 = vrot.lane.b32.xlu1 %v5499_v59, %s5796_s16  ;;  %v1277_v32 = vpop.permute.xlu0 %1276  ;;  %v856_v7 = vsel %vm847_vm7, %v843_v47, %v789_v46 }
  0xe2   : > { %v5331_v33 = vpop.permute.xlu1 %5330  ;;  %1017 = vmatmul.mubr.f32.gmra.mrb[16].mxu0 %v856_v7  ;;  %4303 = vmatprep.mubr.msk.f32.mxu1 %vm872_vm4, %v1277_v32  ;;  %v1340_v60 = vsel %vm847_vm7, %v1328_v50, %v1277_v32  ;;  %v375_v32 = vld [vmem:[%s5915_s18 + $0x168] sm:$0xff] }
  0xe3   : > { %v5333_v53 = vunpack.i.h.bf16 %v5331_v33  ;;  %v5332_v29 = vunpack.i.l.bf16 %v5331_v33  ;;  %5505 = vrot.lane.b32.xlu0 %v8839_v57, %s5795_s11  ;;  %1481 = vmatmul.mubr.f32.gmra.mrb[16].mxu1 %v1340_v60  ;;  %v8851_v57 = vld [vmem:[#allocation38_spill] sm:$0xff] }
  0xe5   : > { %v1305_v4 = vsel %vm808_vm3, %v8831_v38, %v5333_v53  ;;  %v818_v43 = vsel %vm808_vm3, %v8830_v19, %v5332_v29  ;;  %1763 = vrot.lane.b32.xlu1 %v8840_v52, %s5797_s17  ;;  %v5336_v3 = vpop.permute.xlu0 %5335  ;;  %v8845_v19 = vld [vmem:[#allocation36_spill] sm:$0xff] }
  0xe6   : > { %v5338_v8 = vunpack.i.h.bf16 %v5336_v3  ;;  %v5337_v49 = vunpack.i.l.bf16 %v5336_v3  ;;  %v5341_v44 = vpop.permute.xlu1 %5340 }
  0xe7   : > { %v5343_v0 = vunpack.i.h.bf16 %v5341_v44  ;;  %v5342_v2 = vunpack.i.l.bf16 %v5341_v44  ;;  %2226 = vrot.lane.b32.xlu0 %v8841_v62, %s5797_s17 }
  0xe8   : > { %v831_v61 = vsel %vm821_vm5, %v818_v43, %v5337_v49  ;;  %v1317_v17 = vsel %vm821_vm5, %v1305_v4, %v5338_v8  ;;  %v8852_v4 = vld [vmem:[#allocation40_spill] sm:$0xff] }
  0xe9   : > { %5510 = vrot.lane.b32.xlu1 %v8844_v48, %s5794_s25  ;;  %v791_v11 = vpop.permute.xlu0 %790  ;;  %v844_v12 = vsel %vm834_vm6, %v831_v61, %v5342_v2  ;;  %v1329_v13 = vsel %vm834_vm6, %v1317_v17, %v5343_v0  ;;  %v5544_v43 = vpack.i.bf16 %v8852_v4, %v8851_v57  ;;  %v5549_v8 = vpack.i.bf16 %v375_v32, %v8852_v4  ;;  %v8853_v2 = vld [vmem:[#allocation39_spill] sm:$0xff]  ;;  %v5767_v57 = vld [vmem:[%s5915_s18 + $0x110] sm:$0xff] }
  0xea   : > { %v1279_v40 = vpop.permute.xlu1 %1278  ;;  %4290 = vmatprep.mubr.msk.f32.mxu0 %vm872_vm4, %v791_v11  ;;  %v857_v14 = vsel %vm847_vm7, %v844_v12, %v791_v11  ;;  %v389_v11 = vld [vmem:[%s5915_s18 + $0x1e8] sm:$0xff] }
  0xeb   : > { %4304 = vmatprep.mubr.msk.f32.mxu1 %vm872_vm4, %v1279_v40  ;;  %5515 = vrot.lane.b32.xlu0 %v5514_v28, %s5796_s16  ;;  %v1341_v16 = vsel %vm847_vm7, %v1329_v13, %v1279_v40  ;;  %v5762_v40 = vld [vmem:[%s5915_s18 + $0x180] sm:$0xff] }
  0xec   : > { %1023 = vmatmul.mubr.f32.gmra.mrb[18].mxu0 %v857_v14  ;;  %1487 = vmatmul.mubr.f32.gmra.mrb[18].mxu1 %v1341_v16  ;;  %v5763_v16 = vld [vmem:[%s5915_s18 + $0x100] sm:$0xff] }
  0xed   : > { %5520 = vrot.lane.b32.xlu1 %v8845_v19, %s5795_s11  ;;  %v5346_v38 = vpop.permute.xlu0 %5345 }
  0xee   : > { %v5348_v18 = vunpack.i.h.bf16 %v5346_v38  ;;  %v5347_v6 = vunpack.i.l.bf16 %v5346_v38  ;;  %v5351_v22 = vpop.permute.xlu1 %5350 }
  0xef   : > { %v5353_v26 = vunpack.i.h.bf16 %v5351_v22  ;;  %v5352_v15 = vunpack.i.l.bf16 %v5351_v22  ;;  %1765 = vrot.lane.b32.xlu0 %v8846_v5, %s5797_s17 }
  0xf0   : > { %v1306_v24 = vsel %vm808_vm3, %v8837_v55, %v5348_v18  ;;  %v819_v25 = vsel %vm808_vm3, %v8836_v35, %v5347_v6 }
  0xf1   : > { %v5356_v20 = vpop.permute.xlu0 %5355  ;;  %2228 = vrot.lane.b32.xlu1 %v8849_v31, %s5797_s17  ;;  %v832_v63 = vsel %vm821_vm5, %v819_v25, %v5352_v15  ;;  %v1318_v54 = vsel %vm821_vm5, %v1306_v24, %v5353_v26  ;;  %v5764_v31 = vld [vmem:[%s5915_s18 + $0x188] sm:$0xff] }
  0xf2   : > { %v5358_v9 = vunpack.i.h.bf16 %v5356_v20  ;;  %v5357_v23 = vunpack.i.l.bf16 %v5356_v20  ;;  %v793_v51 = vpop.permute.xlu1 %792 }
  0xf3   : > { %5525 = vrot.lane.b32.xlu0 %v8850_v58, %s5794_s25  ;;  %4291 = vmatprep.mubr.msk.f32.mxu0 %vm872_vm4, %v793_v51 }
  0xf4   : > { %v845_v34 = vsel %vm834_vm6, %v832_v63, %v5357_v23  ;;  %v1330_v35 = vsel %vm834_vm6, %v1318_v54, %v5358_v9  ;;  %v5765_v23 = vld [vmem:[%s5915_s18 + $0x108] sm:$0xff] }
  0xf5   : > { %v1281_v55 = vpop.permute.xlu0 %1280  ;;  %5530 = vrot.lane.b32.xlu1 %v5529_v27, %s5796_s16  ;;  %v858_v59 = vsel %vm847_vm7, %v845_v34, %v793_v51 }
  0xf6   : > { %v5361_v56 = vpop.permute.xlu1 %5360  ;;  %1029 = vmatmul.mubr.f32.gmra.mrb[20].mxu0 %v858_v59  ;;  %4305 = vmatprep.mubr.msk.f32.mxu1 %vm872_vm4, %v1281_v55  ;;  %v1342_v37 = vsel %vm847_vm7, %v1330_v35, %v1281_v55 }
  0xf7   : > { %v5363_v46 = vunpack.i.h.bf16 %v5361_v56  ;;  %v5362_v30 = vunpack.i.l.bf16 %v5361_v56  ;;  %5535 = vrot.lane.b32.xlu0 %v5534_v1, %s5795_s11  ;;  %1493 = vmatmul.mubr.f32.gmra.mrb[20].mxu1 %v1342_v37 }
  0xf9   : > { %v1307_v39 = vsel %vm808_vm3, %v8843_v41, %v5363_v46  ;;  %v820_v47 = vsel %vm808_vm3, %v8842_v42, %v5362_v30  ;;  %v5366_v50 = vpop.permute.xlu0 %5365  ;;  %1767 = vrot.lane.b32.xlu1 %v374_v10, %s5797_s17 }
  0xfa   : > { %v5368_v7 = vunpack.i.h.bf16 %v5366_v50  ;;  %v5367_v33 = vunpack.i.l.bf16 %v5366_v50  ;;  %v5371_v60 = vpop.permute.xlu1 %5370 }
  0xfb   : > { %v5373_v53 = vunpack.i.h.bf16 %v5371_v60  ;;  %v5372_v29 = vunpack.i.l.bf16 %v5371_v60  ;;  %2230 = vrot.lane.b32.xlu0 %v388_v45, %s5797_s17 }
  0xfc   : > { %v833_v52 = vsel %vm821_vm5, %v820_v47, %v5367_v33  ;;  %v1319_v3 = vsel %vm821_vm5, %v1307_v39, %v5368_v7 }
  0xfd   : > { %v795_v49 = vpop.permute.xlu0 %794  ;;  %v846_v44 = vsel %vm834_vm6, %v833_v52, %v5372_v29  ;;  %v1331_v0 = vsel %vm834_vm6, %v1319_v3, %v5373_v53  ;;  %5540 = vrot.lane.b32.xlu1 %v8853_v2, %s5794_s25  ;;  %v5766_v53 = vld [vmem:[%s5915_s18 + $0x190] sm:$0xff]  ;;  %s5801_s25 = smov 96  }
  0xfe   : > { %v1283_v62 = vpop.permute.xlu1 %1282  ;;  %4292 = vmatprep.mubr.msk.f32.mxu0 %vm872_vm4, %v795_v49  ;;  %v859_v42 = vsel %vm847_vm7, %v846_v44, %v795_v49 }
  0xff   : > { %4306 = vmatprep.mubr.msk.f32.mxu1 %vm872_vm4, %v1283_v62  ;;  %1035 = vmatmul.mubr.f32.gmra.mrb[22].mxu0 %v859_v42  ;;  %v1343_v41 = vsel %vm847_vm7, %v1331_v0, %v1283_v62 }
 0x100   : > { %1499 = vmatmul.mubr.f32.gmra.mrb[22].mxu1 %v1343_v41  ;;  %5545 = vrot.lane.b32.xlu0 %v5544_v43, %s5796_s16  ;;  %s5799_s16 = smov 8  }
 0x101   : > { %v5376_v28 = vpop.permute.xlu0 %5375  ;;  %5550 = vrot.lane.b32.xlu1 %v5549_v8, %s5795_s11  ;;  %s5802_s11 = smov 104  }
 0x102   : > { %v5378_v61 = vunpack.i.h.bf16 %v5376_v28  ;;  %v5377_v17 = vunpack.i.l.bf16 %v5376_v28  ;;  %v5381_v48 = vpop.permute.xlu1 %5380 }
 0x103   : > { %v5383_v12 = vunpack.i.h.bf16 %v5381_v48  ;;  %v5382_v13 = vunpack.i.l.bf16 %v5381_v48  ;;  %v5768_v48 = vld [vmem:[%s5915_s18 + $0x198] sm:$0xff] }
 0x104   : > { %v2246_v14 = vsel %vm808_vm3, %v5762_v40, %v5378_v61  ;;  %v1783_v19 = vsel %vm808_vm3, %v5763_v16, %v5377_v17  ;;  %1769 = vrot.lane.b32.xlu0 %v375_v32, %s5797_s17 }
 0x105   : > { %v5386_v38 = vpop.permute.xlu0 %5385  ;;  %2232 = vrot.lane.b32.xlu1 %v389_v11, %s5797_s17  ;;  %v1795_v26 = vsel %vm821_vm5, %v1783_v19, %v5382_v13  ;;  %v2258_v15 = vsel %vm821_vm5, %v2246_v14, %v5383_v12  ;;  %v5769_v12 = vld [vmem:[%s5915_s18 + $0x118] sm:$0xff] }
 0x106   : > { %v5388_v18 = vunpack.i.h.bf16 %v5386_v38  ;;  %v5387_v6 = vunpack.i.l.bf16 %v5386_v38  ;;  %v1748_v22 = vpop.permute.xlu1 %1747 }
 0x107   : > { %4309 = vmatprep.mubr.msk.f32.mxu0 %vm872_vm4, %v1748_v22 }
 0x108   : > { %v1807_v5 = vsel %vm834_vm6, %v1795_v26, %v5387_v6  ;;  %v2270_v10 = vsel %vm834_vm6, %v2258_v15, %v5388_v18 }
 0x109   : > { %v1819_v24 = vsel %vm847_vm7, %v1807_v5, %v1748_v22  ;;  %v2211_v25 = vpop.permute.xlu0 %2210 }
 0x10a   : > { %v2282_v21 = vsel %vm847_vm7, %v2270_v10, %v2211_v25  ;;  %v5391_v36 = vpop.permute.xlu1 %5390  ;;  %1920 = vmatmul.mubr.f32.vlgmr.msra.gmra.mrb[24].mxu0 %v1819_v24  ;;  %4323 = vmatprep.mubr.msk.f32.mxu1 %vm872_vm4, %v2211_v25 }
 0x10b   : > { %v5393_v27 = vunpack.i.h.bf16 %v5391_v36  ;;  %v5392_v20 = vunpack.i.l.bf16 %v5391_v36  ;;  %2383 = vmatmul.mubr.f32.vlgmr.msra.gmra.mrb[24].mxu1 %v2282_v21 }
 0x10d   : > { %v2247_v9 = vsel %vm808_vm3, %v5764_v31, %v5393_v27  ;;  %v1784_v51 = vsel %vm808_vm3, %v5765_v23, %v5392_v20  ;;  %v5396_v1 = vpop.permute.xlu0 %5395  ;;  %v5770_v31 = vld [vmem:[%s5915_s18 + $0x1a0] sm:$0xff] }
 0x10e   : > { %v5398_v58 = vunpack.i.h.bf16 %v5396_v1  ;;  %v5397_v63 = vunpack.i.l.bf16 %v5396_v1  ;;  %v5401_v54 = vpop.permute.xlu1 %5400  ;;  %v5771_v23 = vld [vmem:[%s5915_s18 + $0x120] sm:$0xff] }
 0x10f   : > { %v5403_v34 = vunpack.i.h.bf16 %v5401_v54  ;;  %v5402_v35 = vunpack.i.l.bf16 %v5401_v54 }
 0x110   : > { %v1796_v55 = vsel %vm821_vm5, %v1784_v51, %v5397_v63  ;;  %v2259_v59 = vsel %vm821_vm5, %v2247_v9, %v5398_v58 }
 0x111   : > { %v1750_v56 = vpop.permute.xlu0 %1749  ;;  %v1808_v37 = vsel %vm834_vm6, %v1796_v55, %v5402_v35  ;;  %v2271_v46 = vsel %vm834_vm6, %v2259_v59, %v5403_v34 }
 0x112   : > { %v2213_v30 = vpop.permute.xlu1 %2212  ;;  %4310 = vmatprep.mubr.msk.f32.mxu0 %vm872_vm4, %v1750_v56  ;;  %v1820_v45 = vsel %vm847_vm7, %v1808_v37, %v1750_v56 }
 0x113   : > { %4324 = vmatprep.mubr.msk.f32.mxu1 %vm872_vm4, %v2213_v30  ;;  %1926 = vmatmul.mubr.f32.gmra.mrb[26].mxu0 %v1820_v45  ;;  %v2283_v39 = vsel %vm847_vm7, %v2271_v46, %v2213_v30 }
 0x114   : > { %2389 = vmatmul.mubr.f32.gmra.mrb[26].mxu1 %v2283_v39 }
 0x115   : > { %v5406_v47 = vpop.permute.xlu0 %5405 }
 0x116   : > { %v5408_v50 = vunpack.i.h.bf16 %v5406_v47  ;;  %v5407_v32 = vunpack.i.l.bf16 %v5406_v47  ;;  %v5411_v7 = vpop.permute.xlu1 %5410 }
 0x117   : > { %v5413_v33 = vunpack.i.h.bf16 %v5411_v7  ;;  %v5412_v60 = vunpack.i.l.bf16 %v5411_v7  ;;  %v5772_v7 = vld [vmem:[%s5915_s18 + $0x1a8] sm:$0xff] }
 0x118   : > { %v2248_v29 = vsel %vm808_vm3, %v5766_v53, %v5408_v50  ;;  %v1785_v4 = vsel %vm808_vm3, %v5767_v57, %v5407_v32 }
 0x119   : > { %v5416_v43 = vpop.permute.xlu0 %5415  ;;  %v1797_v49 = vsel %vm821_vm5, %v1785_v4, %v5412_v60  ;;  %v2260_v44 = vsel %vm821_vm5, %v2248_v29, %v5413_v33  ;;  %v5773_v60 = vld [vmem:[%s5915_s18 + $0x128] sm:$0xff] }
 0x11a   : > { %v5418_v52 = vunpack.i.h.bf16 %v5416_v43  ;;  %v5417_v3 = vunpack.i.l.bf16 %v5416_v43  ;;  %v1752_v8 = vpop.permute.xlu1 %1751 }
 0x11b   : > { %4311 = vmatprep.mubr.msk.f32.mxu0 %vm872_vm4, %v1752_v8 }
 0x11c   : > { %v1809_v0 = vsel %vm834_vm6, %v1797_v49, %v5417_v3  ;;  %v2272_v2 = vsel %vm834_vm6, %v2260_v44, %v5418_v52 }
 0x11d   : > { %v2215_v62 = vpop.permute.xlu0 %2214  ;;  %v1821_v42 = vsel %vm847_vm7, %v1809_v0, %v1752_v8 }
 0x11e   : > { %v5421_v41 = vpop.permute.xlu1 %5420  ;;  %1932 = vmatmul.mubr.f32.gmra.mrb[28].mxu0 %v1821_v42  ;;  %4325 = vmatprep.mubr.msk.f32.mxu1 %vm872_vm4, %v2215_v62  ;;  %v2284_v28 = vsel %vm847_vm7, %v2272_v2, %v2215_v62 }
 0x11f   : > { %v5423_v61 = vunpack.i.h.bf16 %v5421_v41  ;;  %v5422_v17 = vunpack.i.l.bf16 %v5421_v41  ;;  %2395 = vmatmul.mubr.f32.gmra.mrb[28].mxu1 %v2284_v28 }
 0x121   : > { %v2249_v11 = vsel %vm808_vm3, %v5768_v48, %v5423_v61  ;;  %v1786_v13 = vsel %vm808_vm3, %v5769_v12, %v5422_v17  ;;  %v5426_v40 = vpop.permute.xlu0 %5425  ;;  %v5774_v48 = vld [vmem:[%s5915_s18 + $0x1b0] sm:$0xff] }
 0x122   : > { %v5428_v14 = vunpack.i.h.bf16 %v5426_v40  ;;  %v5427_v16 = vunpack.i.l.bf16 %v5426_v40  ;;  %v5775_v12 = vld [vmem:[%s5915_s18 + $0x130] sm:$0xff] }
 0x123   : > { %v5431_v19 = vpop.permute.xlu1 %5430 }
 0x124   : > { %v5433_v38 = vunpack.i.h.bf16 %v5431_v19  ;;  %v5432_v18 = vunpack.i.l.bf16 %v5431_v19  ;;  %v1798_v6 = vsel %vm821_vm5, %v1786_v13, %v5427_v16  ;;  %v2261_v22 = vsel %vm821_vm5, %v2249_v11, %v5428_v14 }
 0x125   : > { %v1754_v26 = vpop.permute.xlu0 %1753 }
 0x126   : > { %4312 = vmatprep.mubr.msk.f32.mxu0 %vm872_vm4, %v1754_v26  ;;  %v1810_v15 = vsel %vm834_vm6, %v1798_v6, %v5432_v18  ;;  %v2273_v5 = vsel %vm834_vm6, %v2261_v22, %v5433_v38 }
 0x127   : > { %v2217_v10 = vpop.permute.xlu1 %2216  ;;  %v1822_v24 = vsel %vm847_vm7, %v1810_v15, %v1754_v26 }
 0x128   : > { %1938 = vmatmul.mubr.f32.gmra.mrb[30].mxu0 %v1822_v24  ;;  %4326 = vmatprep.mubr.msk.f32.mxu1 %vm872_vm4, %v2217_v10  ;;  %v2285_v25 = vsel %vm847_vm7, %v2273_v5, %v2217_v10 }
 0x129   : > { %v5436_v21 = vpop.permute.xlu0 %5435  ;;  %2401 = vmatmul.mubr.f32.gmra.mrb[30].mxu1 %v2285_v25 }
 0x12a   : > { %v5438_v36 = vunpack.i.h.bf16 %v5436_v21  ;;  %v5437_v27 = vunpack.i.l.bf16 %v5436_v21 }
 0x12b   : > { %v5441_v20 = vpop.permute.xlu1 %5440 }
 0x12c   : > { %v2250_v9 = vsel %vm808_vm3, %v5770_v31, %v5438_v36  ;;  %v1787_v51 = vsel %vm808_vm3, %v5771_v23, %v5437_v27  ;;  %v5443_v1 = vunpack.i.h.bf16 %v5441_v20  ;;  %v5442_v58 = vunpack.i.l.bf16 %v5441_v20  ;;  %v5776_v20 = vld [vmem:[%s5915_s18 + $0x1b8] sm:$0xff] }
 0x12d   : > { %v5446_v63 = vpop.permute.xlu0 %5445 }
 0x12e   : > { %v5448_v54 = vunpack.i.h.bf16 %v5446_v63  ;;  %v5447_v34 = vunpack.i.l.bf16 %v5446_v63  ;;  %v1799_v35 = vsel %vm821_vm5, %v1787_v51, %v5442_v58  ;;  %v2262_v55 = vsel %vm821_vm5, %v2250_v9, %v5443_v1  ;;  %v5777_v9 = vld [vmem:[%s5915_s18 + $0x138] sm:$0xff] }
 0x12f   : > { %v1756_v59 = vpop.permute.xlu1 %1755 }
 0x130   : > { %4313 = vmatprep.mubr.msk.f32.mxu0 %vm872_vm4, %v1756_v59  ;;  %v1811_v56 = vsel %vm834_vm6, %v1799_v35, %v5447_v34  ;;  %v2274_v37 = vsel %vm834_vm6, %v2262_v55, %v5448_v54 }
 0x131   : > { %v2219_v46 = vpop.permute.xlu0 %2218  ;;  %v1823_v30 = vsel %vm847_vm7, %v1811_v56, %v1756_v59 }
 0x132   : > { %1944 = vmatmul.mubr.f32.gmra.mrb[32].mxu0 %v1823_v30  ;;  %4327 = vmatprep.mubr.msk.f32.mxu1 %vm872_vm4, %v2219_v46  ;;  %v2286_v45 = vsel %vm847_vm7, %v2274_v37, %v2219_v46 }
 0x133   : > { %v5451_v39 = vpop.permute.xlu1 %5450  ;;  %2407 = vmatmul.mubr.f32.gmra.mrb[32].mxu1 %v2286_v45 }
 0x134   : > { %v5453_v47 = vunpack.i.h.bf16 %v5451_v39  ;;  %v5452_v50 = vunpack.i.l.bf16 %v5451_v39 }
 0x135   : > { %v5456_v32 = vpop.permute.xlu0 %5455 }
 0x136   : > { %v2251_v33 = vsel %vm808_vm3, %v5772_v7, %v5453_v47  ;;  %v1788_v53 = vsel %vm808_vm3, %v5773_v60, %v5452_v50  ;;  %v5458_v29 = vunpack.i.h.bf16 %v5456_v32  ;;  %v5457_v57 = vunpack.i.l.bf16 %v5456_v32  ;;  %v5778_v32 = vld [vmem:[%s5915_s18 + $0x1c0] sm:$0xff] }
 0x137   : > { %v5461_v4 = vpop.permute.xlu1 %5460 }
 0x138   : > { %v5463_v43 = vunpack.i.h.bf16 %v5461_v4  ;;  %v5462_v52 = vunpack.i.l.bf16 %v5461_v4  ;;  %v1800_v3 = vsel %vm821_vm5, %v1788_v53, %v5457_v57  ;;  %v2263_v8 = vsel %vm821_vm5, %v2251_v33, %v5458_v29  ;;  %v5779_v33 = vld [vmem:[%s5915_s18 + $0x140] sm:$0xff] }
 0x139   : > { %v1758_v49 = vpop.permute.xlu0 %1757 }
 0x13a   : > { %4314 = vmatprep.mubr.msk.f32.mxu0 %vm872_vm4, %v1758_v49  ;;  %v1812_v44 = vsel %vm834_vm6, %v1800_v3, %v5462_v52  ;;  %v2275_v0 = vsel %vm834_vm6, %v2263_v8, %v5463_v43 }
 0x13b   : > { %v2221_v2 = vpop.permute.xlu1 %2220  ;;  %v1824_v62 = vsel %vm847_vm7, %v1812_v44, %v1758_v49  ;;  %v862_v49 = vlaneseq }
 0x13c   : > { %1950 = vmatmul.mubr.f32.gmra.mrb[34].mxu0 %v1824_v62  ;;  %4328 = vmatprep.mubr.msk.f32.mxu1 %vm872_vm4, %v2221_v2  ;;  %v2287_v42 = vsel %vm847_vm7, %v2275_v0, %v2221_v2 }
 0x13d   : > { %v5466_v41 = vpop.permute.xlu0 %5465  ;;  %2413 = vmatmul.mubr.f32.gmra.mrb[34].mxu1 %v2287_v42 }
 0x13e   : > { %v5468_v28 = vunpack.i.h.bf16 %v5466_v41  ;;  %v5467_v61 = vunpack.i.l.bf16 %v5466_v41 }
 0x13f   : > { %v5471_v17 = vpop.permute.xlu1 %5470 }
 0x140   : > { %v2252_v11 = vsel %vm808_vm3, %v5774_v48, %v5468_v28  ;;  %v1789_v13 = vsel %vm808_vm3, %v5775_v12, %v5467_v61  ;;  %v5473_v40 = vunpack.i.h.bf16 %v5471_v17  ;;  %v5472_v14 = vunpack.i.l.bf16 %v5471_v17 }
 0x141   : > { %v5476_v16 = vpop.permute.xlu0 %5475  ;;  %v6849_v28 = vshrl.u32 %v862_v49, 7 }
 0x142   : > { %v5478_v19 = vunpack.i.h.bf16 %v5476_v16  ;;  %v5477_v38 = vunpack.i.l.bf16 %v5476_v16  ;;  %v1801_v18 = vsel %vm821_vm5, %v1789_v13, %v5472_v14  ;;  %v2264_v6 = vsel %vm821_vm5, %v2252_v11, %v5473_v40  ;;  %v5780_v11 = vld [vmem:[%s5915_s18 + $0x1c8] sm:$0xff] }
 0x143   : > { %v1760_v22 = vpop.permute.xlu1 %1759  ;;  %8854 = vst [vmem:[#allocation7_spill] sm:$0xff] %v6849_v28  ;;  %v5781_v13 = vld [vmem:[%s5915_s18 + $0x148] sm:$0xff] }
 0x144   : > { %4315 = vmatprep.mubr.msk.f32.mxu0 %vm872_vm4, %v1760_v22  ;;  %v1813_v26 = vsel %vm834_vm6, %v1801_v18, %v5477_v38  ;;  %v2276_v15 = vsel %vm834_vm6, %v2264_v6, %v5478_v19  ;;  %v8744_v38 = vsub.s32 0, %v6849_v28  ;;  %v8743_v18 = vsub.s32 1, %v6849_v28 }
 0x145   : > { %v2223_v5 = vpop.permute.xlu0 %2222  ;;  %v1825_v10 = vsel %vm847_vm7, %v1813_v26, %v1760_v22 }
 0x146   : > { %1956 = vmatmul.mubr.f32.gmra.mrb[36].mxu0 %v1825_v10  ;;  %4329 = vmatprep.mubr.msk.f32.mxu1 %vm872_vm4, %v2223_v5  ;;  %v2288_v24 = vsel %vm847_vm7, %v2276_v15, %v2223_v5  ;;  %v860_v15 = vld [vmem:[%s8684_s2] sm:$0x3] }
 0x147   : > { %v5481_v25 = vpop.permute.xlu1 %5480  ;;  %2419 = vmatmul.mubr.f32.gmra.mrb[36].mxu1 %v2288_v24 }
 0x148   : > { %v5483_v21 = vunpack.i.h.bf16 %v5481_v25  ;;  %v5482_v36 = vunpack.i.l.bf16 %v5481_v25 }
 0x149   : > { %v5486_v27 = vpop.permute.xlu0 %5485 }
 0x14a   : > { %v2253_v31 = vsel %vm808_vm3, %v5776_v20, %v5483_v21  ;;  %v1790_v23 = vsel %vm808_vm3, %v5777_v9, %v5482_v36  ;;  %v5488_v51 = vunpack.i.h.bf16 %v5486_v27  ;;  %v5487_v1 = vunpack.i.l.bf16 %v5486_v27 }
 0x14b   : > { %v5491_v58 = vpop.permute.xlu1 %5490  ;;  %v6868_v27 = vrot.slane %v860_v15, %v8744_v38  ;;  %v6873_v20 = vrot.slane %v860_v15, %v8743_v18 }
 0x14c   : > { %v5493_v63 = vunpack.i.h.bf16 %v5491_v58  ;;  %v5492_v54 = vunpack.i.l.bf16 %v5491_v58  ;;  %v1802_v34 = vsel %vm821_vm5, %v1790_v23, %v5487_v1  ;;  %v2265_v35 = vsel %vm821_vm5, %v2253_v31, %v5488_v51 }
 0x14d   : > { %v1762_v55 = vpop.permute.xlu0 %1761 }
 0x14e   : > { %4316 = vmatprep.mubr.msk.f32.mxu0 %vm872_vm4, %v1762_v55  ;;  %v1814_v59 = vsel %vm834_vm6, %v1802_v34, %v5492_v54  ;;  %v2277_v56 = vsel %vm834_vm6, %v2265_v35, %v5493_v63  ;;  %v5782_v34 = vld [vmem:[%s5915_s18 + $0x1d0] sm:$0xff] }
 0x14f   : > { %v2225_v37 = vpop.permute.xlu1 %2224  ;;  %v1826_v46 = vsel %vm847_vm7, %v1814_v59, %v1762_v55  ;;  %v5783_v55 = vld [vmem:[%s5915_s18 + $0x150] sm:$0xff] }
 0x150   : > { %1962 = vmatmul.mubr.f32.gmra.mrb[38].mxu0 %v1826_v46  ;;  %4330 = vmatprep.mubr.msk.f32.mxu1 %vm872_vm4, %v2225_v37  ;;  %v2289_v30 = vsel %vm847_vm7, %v2277_v56, %v2225_v37 }
 0x151   : > { %v5496_v45 = vpop.permute.xlu0 %5495  ;;  %2425 = vmatmul.mubr.f32.gmra.mrb[38].mxu1 %v2289_v30 }
 0x152   : > { %v5498_v39 = vunpack.i.h.bf16 %v5496_v45  ;;  %v5497_v47 = vunpack.i.l.bf16 %v5496_v45 }
 0x153   : > { %v5501_v50 = vpop.permute.xlu1 %5500 }
 0x154   : > { %v2254_v7 = vsel %vm808_vm3, %v5778_v32, %v5498_v39  ;;  %v1791_v60 = vsel %vm808_vm3, %v5779_v33, %v5497_v47  ;;  %v5503_v53 = vunpack.i.h.bf16 %v5501_v50  ;;  %v5502_v29 = vunpack.i.l.bf16 %v5501_v50 }
 0x155   : > { %v5506_v57 = vpop.permute.xlu0 %5505 }
 0x156   : > { %v5508_v4 = vunpack.i.h.bf16 %v5506_v57  ;;  %v5507_v43 = vunpack.i.l.bf16 %v5506_v57  ;;  %v1803_v52 = vsel %vm821_vm5, %v1791_v60, %v5502_v29  ;;  %v2266_v3 = vsel %vm821_vm5, %v2254_v7, %v5503_v53 }
 0x157   : > { %v1764_v8 = vpop.permute.xlu1 %1763 }
 0x158   : > { %4317 = vmatprep.mubr.msk.f32.mxu0 %vm872_vm4, %v1764_v8  ;;  %v1815_v44 = vsel %vm834_vm6, %v1803_v52, %v5507_v43  ;;  %v2278_v0 = vsel %vm834_vm6, %v2266_v3, %v5508_v4 }
 0x159   : > { %v2227_v2 = vpop.permute.xlu0 %2226  ;;  %v1827_v62 = vsel %vm847_vm7, %v1815_v44, %v1764_v8 }
 0x15a   : > { %1968 = vmatmul.mubr.f32.gmra.mrb[40].mxu0 %v1827_v62  ;;  %4331 = vmatprep.mubr.msk.f32.mxu1 %vm872_vm4, %v2227_v2  ;;  %v2290_v42 = vsel %vm847_vm7, %v2278_v0, %v2227_v2 }
 0x15b   : > { %v5511_v41 = vpop.permute.xlu1 %5510  ;;  %2431 = vmatmul.mubr.f32.gmra.mrb[40].mxu1 %v2290_v42 }
 0x15c   : > { %v5513_v61 = vunpack.i.h.bf16 %v5511_v41  ;;  %v5512_v17 = vunpack.i.l.bf16 %v5511_v41 }
 0x15d   : > { %v5516_v48 = vpop.permute.xlu0 %5515 }
 0x15e   : > { %v2255_v12 = vsel %vm808_vm3, %v5780_v11, %v5513_v61  ;;  %v1792_v40 = vsel %vm808_vm3, %v5781_v13, %v5512_v17  ;;  %v5518_v14 = vunpack.i.h.bf16 %v5516_v48  ;;  %v5517_v16 = vunpack.i.l.bf16 %v5516_v48  ;;  %v5784_v11 = vld [vmem:[%s5915_s18 + $0x1d8] sm:$0xff] }
 0x15f   : > { %v5521_v19 = vpop.permute.xlu1 %5520  ;;  %v5785_v13 = vld [vmem:[%s5915_s18 + $0x158] sm:$0xff] }
 0x160   : > { %v5523_v6 = vunpack.i.h.bf16 %v5521_v19  ;;  %v5522_v22 = vunpack.i.l.bf16 %v5521_v19  ;;  %v1804_v26 = vsel %vm821_vm5, %v1792_v40, %v5517_v16  ;;  %v2267_v5 = vsel %vm821_vm5, %v2255_v12, %v5518_v14 }
 0x161   : > { %v1766_v10 = vpop.permute.xlu0 %1765 }
 0x162   : > { %4318 = vmatprep.mubr.msk.f32.mxu0 %vm872_vm4, %v1766_v10  ;;  %v1816_v24 = vsel %vm834_vm6, %v1804_v26, %v5522_v22  ;;  %v2279_v25 = vsel %vm834_vm6, %v2267_v5, %v5523_v6 }
 0x163   : > { %v1828_v21 = vsel %vm847_vm7, %v1816_v24, %v1766_v10  ;;  %v2229_v36 = vpop.permute.xlu1 %2228 }
 0x164   : > { %1974 = vmatmul.mubr.f32.gmra.mrb[42].mxu0 %v1828_v21  ;;  %4332 = vmatprep.mubr.msk.f32.mxu1 %vm872_vm4, %v2229_v36  ;;  %v2291_v31 = vsel %vm847_vm7, %v2279_v25, %v2229_v36 }
 0x165   : > { %v5526_v9 = vpop.permute.xlu0 %5525  ;;  %2437 = vmatmul.mubr.f32.gmra.mrb[42].mxu1 %v2291_v31 }
 0x166   : > { %v5528_v23 = vunpack.i.h.bf16 %v5526_v9  ;;  %v5527_v51 = vunpack.i.l.bf16 %v5526_v9  ;;  %v970_v1 = vpop.f32.mrb[0].mxu0 }
 0x167   : > { %v6877_v58 = vadd.f32 %v970_v1, %v6868_v27  ;;  %v1434_v63 = vpop.f32.mrb[0].mxu1  ;;  %v972_v54 = vpop.f32.mrb[1].mxu0 }
 0x168   : > { %v2256_v35 = vsel %vm808_vm3, %v5782_v34, %v5528_v23  ;;  %v1793_v59 = vsel %vm808_vm3, %v5783_v55, %v5527_v51  ;;  %v6884_v56 = vadd.f32 %v1434_v63, %v6868_v27  ;;  %v973_v37 = vadd.f32 %v972_v54, %v6873_v20  ;;  %v1436_v46 = vpop.f32.mrb[1].mxu1  ;;  %v5531_v30 = vpop.permute.xlu1 %5530 }
 0x169   : > { %8855 = vst [vmem:[#allocation4_spill] sm:$0xff] %v6877_v58  ;;  %v1437_v45 = vadd.f32 %v1436_v46, %v6873_v20  ;;  %v5533_v39 = vunpack.i.h.bf16 %v5531_v30  ;;  %v5532_v47 = vunpack.i.l.bf16 %v5531_v30  ;;  %v5536_v50 = vpop.permute.xlu0 %5535 }
 0x16a   : > { %8856 = vst [vmem:[#allocation6_spill] sm:$0xff] %v6884_v56  ;;  %v5554_v32 = vpack.i.bf16 %v973_v37, %v6877_v58  ;;  %v5538_v7 = vunpack.i.h.bf16 %v5536_v50  ;;  %v5537_v33 = vunpack.i.l.bf16 %v5536_v50 }
 0x16b   : > { %v5559_v60 = vpack.i.bf16 %v1437_v45, %v6884_v56  ;;  %v1805_v53 = vsel %vm821_vm5, %v1793_v59, %v5532_v47  ;;  %v2268_v29 = vsel %vm821_vm5, %v2256_v35, %v5533_v39 }
 0x16c   : > { %v1768_v57 = vpop.permute.xlu1 %1767  ;;  %5555 = vrot.lane.b32.xlu0 %v5554_v32, %s5799_s16  ;;  %v1817_v4 = vsel %vm834_vm6, %v1805_v53, %v5537_v33  ;;  %v2280_v43 = vsel %vm834_vm6, %v2268_v29, %v5538_v7 }
 0x16d   : > { %5560 = vrot.lane.b32.xlu1 %v5559_v60, %s5799_s16  ;;  %4319 = vmatprep.mubr.msk.f32.mxu0 %vm872_vm4, %v1768_v57  ;;  %v1829_v52 = vsel %vm847_vm7, %v1817_v4, %v1768_v57  ;;  %v2231_v3 = vpop.permute.xlu0 %2230 }
 0x16e   : > { %1980 = vmatmul.mubr.f32.gmra.mrb[44].mxu0 %v1829_v52  ;;  %4333 = vmatprep.mubr.msk.f32.mxu1 %vm872_vm4, %v2231_v3  ;;  %v2292_v8 = vsel %vm847_vm7, %v2280_v43, %v2231_v3 }
 0x16f   : > { %v6900_v49 = vpop.f32.mrb[2].mxu0  ;;  %2443 = vmatmul.mubr.f32.gmra.mrb[44].mxu1 %v2292_v8 }
 0x170   : > { %v6902_v44 = vpop.f32.mrb[2].mxu1  ;;  %v6904_v0 = vpop.f32.mrb[3].mxu0 }
 0x171   : > { %v6906_v2 = vpop.f32.mrb[3].mxu1  ;;  %v5541_v62 = vpop.permute.xlu1 %5540 }
 0x172   : > { %v5543_v42 = vunpack.i.h.bf16 %v5541_v62  ;;  %v5542_v41 = vunpack.i.l.bf16 %v5541_v62  ;;  %v5546_v61 = vpop.permute.xlu0 %5545 }
 0x173   : > { %v5548_v17 = vunpack.i.h.bf16 %v5546_v61  ;;  %v5547_v48 = vunpack.i.l.bf16 %v5546_v61 }
 0x174   : > { %v2257_v12 = vsel %vm808_vm3, %v5784_v11, %v5543_v42  ;;  %v1794_v40 = vsel %vm808_vm3, %v5785_v13, %v5542_v41 }
 0x175   : > { %v5551_v14 = vpop.permute.xlu1 %5550  ;;  %v1806_v16 = vsel %vm821_vm5, %v1794_v40, %v5547_v48  ;;  %v2269_v19 = vsel %vm821_vm5, %v2257_v12, %v5548_v17 }
 0x176   : > { %v5553_v6 = vunpack.i.h.bf16 %v5551_v14  ;;  %v5552_v22 = vunpack.i.l.bf16 %v5551_v14  ;;  %v1770_v26 = vpop.permute.xlu0 %1769 }
 0x177   : > { %4320 = vmatprep.mubr.msk.f32.mxu0 %vm872_vm4, %v1770_v26 }
 0x178   : > { %v1818_v15 = vsel %vm834_vm6, %v1806_v16, %v5552_v22  ;;  %v2281_v5 = vsel %vm834_vm6, %v2269_v19, %v5553_v6 }
 0x179   : > { %v982_v10 = vpop.f32.mrb[4].mxu0  ;;  %v1830_v24 = vsel %vm847_vm7, %v1818_v15, %v1770_v26  ;;  %v2233_v25 = vpop.permute.xlu1 %2232 }
 0x17a   : > { %v6919_v21 = vadd.f32 %v982_v10, %v6868_v27  ;;  %v984_v36 = vpop.f32.mrb[5].mxu0  ;;  %v1446_v31 = vpop.f32.mrb[4].mxu1  ;;  %1986 = vmatmul.mubr.f32.gmra.mrb[46].mxu0 %v1830_v24  ;;  %4334 = vmatprep.mubr.msk.f32.mxu1 %vm872_vm4, %v2233_v25  ;;  %v2293_v9 = vsel %vm847_vm7, %v2281_v5, %v2233_v25 }
 0x17b   : > { %v985_v23 = vadd.f32 %v984_v36, %v6873_v20  ;;  %v6925_v51 = vadd.f32 %v1446_v31, %v6868_v27  ;;  %v1448_v1 = vpop.f32.mrb[5].mxu1  ;;  %2449 = vmatmul.mubr.f32.gmra.mrb[46].mxu1 %v2293_v9 }
 0x17c   : > { %v1449_v63 = vadd.f32 %v1448_v1, %v6873_v20 }
 0x17d   : > { %v5564_v54 = vpack.i.bf16 %v985_v23, %v6919_v21 }
 0x17e   : > { %v5569_v34 = vpack.i.bf16 %v1449_v63, %v6925_v51 }
 0x17f   : > { %5565 = vrot.lane.b32.xlu0 %v5564_v54, %s5799_s16 }
 0x180   : > { %5570 = vrot.lane.b32.xlu1 %v5569_v34, %s5799_s16 }
 0x183   : > { %v988_v35 = vpop.f32.mrb[6].mxu0  ;;  %v1452_v55 = vpop.f32.mrb[6].mxu1 }
 0x184   : > { %v6933_v59 = vadd.f32 %v988_v35, %v6868_v27  ;;  %v6936_v37 = vadd.f32 %v1452_v55, %v6868_v27  ;;  %v990_v46 = vpop.f32.mrb[7].mxu0  ;;  %v1454_v30 = vpop.f32.mrb[7].mxu1 }
 0x185   : > { %v991_v45 = vadd.f32 %v990_v46, %v6873_v20  ;;  %v1455_v39 = vadd.f32 %v1454_v30, %v6873_v20 }
 0x187   : > { %v5574_v47 = vpack.i.bf16 %v991_v45, %v6933_v59  ;;  %v5579_v50 = vpack.i.bf16 %v1455_v39, %v6936_v37 }
 0x189   : > { %5580 = vrot.lane.b32.xlu1 %v5579_v50, %s5799_s16  ;;  %5575 = vrot.lane.b32.xlu0 %v5574_v47, %s5799_s16 }
 0x18d   : > { %v994_v32 = vpop.f32.mrb[8].mxu0 }
 0x18e   : > { %v6945_v7 = vadd.f32 %v994_v32, %v6868_v27  ;;  %v996_v33 = vpop.f32.mrb[9].mxu0  ;;  %v1458_v60 = vpop.f32.mrb[8].mxu1 }
 0x18f   : > { %v997_v53 = vadd.f32 %v996_v33, %v6873_v20  ;;  %v1460_v29 = vpop.f32.mrb[9].mxu1  ;;  %v6952_v57 = vadd.f32 %v1458_v60, %v6868_v27 }
 0x190   : > { %1081 = vrot.lane.b32.xlu0 %v6945_v7, %s5799_s16  ;;  %v1461_v4 = vadd.f32 %v1460_v29, %v6873_v20 }
 0x191   : > { %1083 = vrot.lane.b32.xlu1 %v997_v53, %s5799_s16 }
 0x194   : > { %1545 = vrot.lane.b32.xlu0 %v6952_v57, %s5799_s16 }
 0x195   : > { %1547 = vrot.lane.b32.xlu1 %v1461_v4, %s5799_s16 }
 0x197   : > { %v1000_v43 = vpop.f32.mrb[10].mxu0  ;;  %v1464_v52 = vpop.f32.mrb[10].mxu1 }
 0x198   : > { %v6959_v3 = vadd.f32 %v1000_v43, %v6868_v27  ;;  %v1002_v8 = vpop.f32.mrb[11].mxu0  ;;  %v1466_v62 = vpop.f32.mrb[11].mxu1  ;;  %v6966_v41 = vadd.f32 %v1464_v52, %v6868_v27 }
 0x199   : > { %v1003_v42 = vadd.f32 %v1002_v8, %v6873_v20  ;;  %v1467_v61 = vadd.f32 %v1466_v62, %v6873_v20 }
 0x19a   : > { %1085 = vrot.lane.b32.xlu0 %v6959_v3, %s5799_s16 }
 0x19b   : > { %1087 = vrot.lane.b32.xlu1 %v1003_v42, %s5799_s16 }
 0x19e   : > { %1549 = vrot.lane.b32.xlu0 %v6966_v41, %s5799_s16 }
 0x19f   : > { %1551 = vrot.lane.b32.xlu1 %v1467_v61, %s5799_s16 }
 0x1a1   : > { %v1006_v17 = vpop.f32.mrb[12].mxu0 }
 0x1a2   : > { %v6973_v48 = vadd.f32 %v1006_v17, %v6868_v27  ;;  %v1008_v11 = vpop.f32.mrb[13].mxu0  ;;  %v1470_v12 = vpop.f32.mrb[12].mxu1 }
 0x1a3   : > { %v1009_v13 = vadd.f32 %v1008_v11, %v6873_v20  ;;  %v1472_v40 = vpop.f32.mrb[13].mxu1  ;;  %v6980_v14 = vadd.f32 %v1470_v12, %v6868_v27 }
 0x1a4   : > { %1089 = vrot.lane.b32.xlu0 %v6973_v48, %s5799_s16  ;;  %v1473_v16 = vadd.f32 %v1472_v40, %v6873_v20 }
 0x1a5   : > { %1091 = vrot.lane.b32.xlu1 %v1009_v13, %s5799_s16 }
 0x1a8   : > { %1553 = vrot.lane.b32.xlu0 %v6980_v14, %s5799_s16 }
 0x1a9   : > { %1555 = vrot.lane.b32.xlu1 %v1473_v16, %s5799_s16 }
 0x1ab   : > { %v1012_v19 = vpop.f32.mrb[14].mxu0  ;;  %v1476_v6 = vpop.f32.mrb[14].mxu1 }
 0x1ac   : > { %v6987_v22 = vadd.f32 %v1012_v19, %v6868_v27  ;;  %v1014_v26 = vpop.f32.mrb[15].mxu0  ;;  %v1478_v15 = vpop.f32.mrb[15].mxu1  ;;  %v6994_v10 = vadd.f32 %v1476_v6, %v6868_v27 }
 0x1ad   : > { %v1015_v5 = vadd.f32 %v1014_v26, %v6873_v20  ;;  %v1479_v24 = vadd.f32 %v1478_v15, %v6873_v20 }
 0x1ae   : > { %8857 = vst [vmem:[#allocation2_spill] sm:$0xff] %v6987_v22  ;;  %1093 = vrot.lane.b32.xlu0 %v6987_v22, %s5799_s16  ;;  %8858 = vst [vmem:[#allocation5_spill] sm:$0xff] %v6994_v10  ;;  %v449_v22 = vld [vmem:[%s8685_s3 + $0xb8] sm:$0xff] }
 0x1af   : > { %1095 = vrot.lane.b32.xlu1 %v1015_v5, %s5799_s16 }
 0x1b2   : > { %1557 = vrot.lane.b32.xlu0 %v6994_v10, %s5799_s16 }
 0x1b3   : > { %1559 = vrot.lane.b32.xlu1 %v1479_v24, %s5799_s16 }
 0x1b5   : > { %v1018_v25 = vpop.f32.mrb[16].mxu0 }
 0x1b6   : > { %v7001_v36 = vadd.f32 %v1018_v25, %v6868_v27  ;;  %v1020_v31 = vpop.f32.mrb[17].mxu0  ;;  %v1482_v9 = vpop.f32.mrb[16].mxu1 }
 0x1b7   : > { %v1021_v23 = vadd.f32 %v1020_v31, %v6873_v20  ;;  %v1484_v1 = vpop.f32.mrb[17].mxu1  ;;  %v7008_v63 = vadd.f32 %v1482_v9, %v6868_v27 }
 0x1b8   : > { %8859 = vst [vmem:[#allocation3_spill] sm:$0xff] %v7001_v36  ;;  %1097 = vrot.lane.b32.xlu0 %v7001_v36, %s5799_s16  ;;  %v1485_v54 = vadd.f32 %v1484_v1, %v6873_v20 }
 0x1b9   : > { %1099 = vrot.lane.b32.xlu1 %v1021_v23, %s5799_s16  ;;  %8860 = vst [vmem:[#allocation12_spill] sm:$0xff] %v7008_v63 }
 0x1bc   : > { %1561 = vrot.lane.b32.xlu0 %v7008_v63, %s5799_s16 }
 0x1bd   : > { %1563 = vrot.lane.b32.xlu1 %v1485_v54, %s5799_s16 }
 0x1bf   : > { %v1024_v34 = vpop.f32.mrb[18].mxu0  ;;  %v1488_v35 = vpop.f32.mrb[18].mxu1 }
 0x1c0   : > { %v7015_v55 = vadd.f32 %v1024_v34, %v6868_v27  ;;  %v7018_v46 = vadd.f32 %v1488_v35, %v6868_v27  ;;  %v1026_v30 = vpop.f32.mrb[19].mxu0  ;;  %v1490_v45 = vpop.f32.mrb[19].mxu1 }
 0x1c1   : > { %v1027_v39 = vadd.f32 %v1026_v30, %v6873_v20  ;;  %v1491_v47 = vadd.f32 %v1490_v45, %v6873_v20 }
 0x1c2   : > { %8861 = vst [vmem:[#allocation10_spill] sm:$0xff] %v7015_v55  ;;  %8862 = vst [vmem:[#allocation13_spill] sm:$0xff] %v7018_v46  ;;  %1101 = vrot.lane.b32.xlu1 %v7015_v55, %s5799_s16  ;;  %1565 = vrot.lane.b32.xlu0 %v7018_v46, %s5799_s16  ;;  %v428_v46 = vld [vmem:[%s8685_s3 + $0x10] sm:$0xff] }
 0x1c6   : > { %1567 = vrot.lane.b32.xlu1 %v1491_v47, %s5799_s16  ;;  %1103 = vrot.lane.b32.xlu0 %v1027_v39, %s5799_s16 }
 0x1c9   : > { %v1030_v50 = vpop.f32.mrb[20].mxu0 }
 0x1ca   : > { %v7029_v32 = vadd.f32 %v1030_v50, %v6868_v27  ;;  %v1032_v33 = vpop.f32.mrb[21].mxu0  ;;  %v1494_v60 = vpop.f32.mrb[20].mxu1 }
 0x1cb   : > { %v1033_v53 = vadd.f32 %v1032_v33, %v6873_v20  ;;  %v1496_v29 = vpop.f32.mrb[21].mxu1  ;;  %v7036_v4 = vadd.f32 %v1494_v60, %v6868_v27 }
 0x1cc   : > { %8863 = vst [vmem:[#allocation8_spill] sm:$0xff] %v7029_v32  ;;  %1105 = vrot.lane.b32.xlu0 %v7029_v32, %s5799_s16  ;;  %v1497_v43 = vadd.f32 %v1496_v29, %v6873_v20 }
 0x1cd   : > { %1107 = vrot.lane.b32.xlu1 %v1033_v53, %s5799_s16  ;;  %8864 = vst [vmem:[#allocation11_spill] sm:$0xff] %v7036_v4 }
 0x1d0   : > { %1569 = vrot.lane.b32.xlu0 %v7036_v4, %s5799_s16 }
 0x1d1   : > { %1571 = vrot.lane.b32.xlu1 %v1497_v43, %s5799_s16 }
 0x1d2   : > { %v1036_v52 = vpop.f32.mrb[22].mxu0 }
 0x1d3   : > { %v7043_v8 = vadd.f32 %v1036_v52, %v6868_v27  ;;  %v7045_v62 = vpop.f32.mrb[22].mxu1  ;;  %v1038_v42 = vpop.f32.mrb[23].mxu0 }
 0x1d4   : > { %v1039_v61 = vadd.f32 %v1038_v42, %v6873_v20  ;;  %v7048_v17 = vpop.f32.mrb[23].mxu1 }
 0x1d5   : > { %8865 = vst [vmem:[#allocation9_spill] sm:$0xff] %v7043_v8  ;;  %1109 = vrot.lane.b32.xlu0 %v7043_v8, %s5799_s16 }
 0x1d6   : > { %1111 = vrot.lane.b32.xlu1 %v1039_v61, %s5799_s16 }
 0x1dd   : > { %v1921_v11 = vpop.f32.mrb[24].mxu0 }
 0x1de   : > { %v7054_v12 = vadd.f32 %v1921_v11, %v6868_v27  ;;  %v2384_v13 = vpop.f32.mrb[24].mxu1  ;;  %v1923_v40 = vpop.f32.mrb[25].mxu0 }
 0x1df   : > { %v1924_v16 = vadd.f32 %v1923_v40, %v6873_v20  ;;  %v2386_v19 = vpop.f32.mrb[25].mxu1  ;;  %v7058_v6 = vadd.f32 %v2384_v13, %v6868_v27  ;;  %v7086_v52 = vpop.permute.xlu0 %5555 }
 0x1e0   : > { %v2387_v15 = vadd.f32 %v2386_v19, %v6873_v20  ;;  %8866 = vst [vmem:[#allocation19_spill] sm:$0xff] %v7086_v52 }
 0x1e1   : > { %v5584_v26 = vpack.i.bf16 %v1924_v16, %v7054_v12 }
 0x1e2   : > { %v5589_v5 = vpack.i.bf16 %v2387_v15, %v7058_v6 }
 0x1e3   : > { %5585 = vrot.lane.b32.xlu0 %v5584_v26, %s5799_s16 }
 0x1e6   : > { %v1927_v24 = vpop.f32.mrb[26].mxu0 }
 0x1e7   : > { %v7065_v25 = vadd.f32 %v1927_v24, %v6868_v27  ;;  %v2390_v31 = vpop.f32.mrb[26].mxu1  ;;  %v1929_v9 = vpop.f32.mrb[27].mxu0  ;;  %5590 = vrot.lane.b32.xlu0 %v5589_v5, %s5799_s16 }
 0x1e8   : > { %v1930_v23 = vadd.f32 %v1929_v9, %v6873_v20  ;;  %v2392_v1 = vpop.f32.mrb[27].mxu1  ;;  %v7070_v54 = vadd.f32 %v2390_v31, %v6868_v27 }
 0x1e9   : > { %v2393_v35 = vadd.f32 %v2392_v1, %v6873_v20 }
 0x1ea   : > { %v5594_v34 = vpack.i.bf16 %v1930_v23, %v7065_v25 }
 0x1eb   : > { %v5599_v30 = vpack.i.bf16 %v2393_v35, %v7070_v54 }
 0x1ec   : > { %5595 = vrot.lane.b32.xlu0 %v5594_v34, %s5799_s16 }
 0x1f0   : > { %5600 = vrot.lane.b32.xlu0 %v5599_v30, %s5799_s16 }
 0x1f1   : > { %v1933_v45 = vpop.f32.mrb[28].mxu0  ;;  %v7090_v61 = vpop.permute.xlu0 %5565 }
 0x1f2   : > { %v7078_v39 = vadd.f32 %v1933_v45, %v6868_v27  ;;  %v2396_v47 = vpop.f32.mrb[28].mxu1  ;;  %v1935_v50 = vpop.f32.mrb[29].mxu0  ;;  %v5567_v10 = vunpack.i.l.bf16 %v7090_v61 }
 0x1f3   : > { %v2398_v33 = vpop.f32.mrb[29].mxu1  ;;  %v1936_v60 = vadd.f32 %v1935_v50, %v6873_v20  ;;  %v7082_v53 = vadd.f32 %v2396_v47, %v6868_v27 }
 0x1f4   : > { %v2399_v43 = vadd.f32 %v2398_v33, %v6873_v20 }
 0x1f5   : > { %v5604_v29 = vpack.i.bf16 %v1936_v60, %v7078_v39 }
 0x1f6   : > { %v5609_v42 = vpack.i.bf16 %v2399_v43, %v7082_v53 }
 0x1f7   : > { %5605 = vrot.lane.b32.xlu1 %v5604_v29, %s5799_s16  ;;  %v7122_v29 = vpop.permute.xlu1 %5560 }
 0x1f8   : > { %8867 = vst [vmem:[#allocation16_spill] sm:$0xff] %v7122_v29 }
 0x1fb   : > { %v1939_v11 = vpop.f32.mrb[30].mxu0  ;;  %5610 = vrot.lane.b32.xlu1 %v5609_v42, %s5799_s16  ;;  %v7100_v5 = vpop.permute.xlu0 %5575 }
 0x1fc   : > { %v7093_v13 = vadd.f32 %v1939_v11, %v6868_v27  ;;  %v1941_v40 = vpop.f32.mrb[31].mxu0  ;;  %v2402_v19 = vpop.f32.mrb[30].mxu1 }
 0x1fd   : > { %v1942_v16 = vadd.f32 %v1941_v40, %v6873_v20  ;;  %v7098_v26 = vadd.f32 %v2402_v19, %v6868_v27  ;;  %v2404_v15 = vpop.f32.mrb[31].mxu1  ;;  %v7129_v11 = vpop.permute.xlu1 %5570 }
 0x1fe   : > { %v2405_v31 = vadd.f32 %v2404_v15, %v6873_v20 }
 0x1ff   : > { %v5614_v24 = vpack.i.bf16 %v1942_v16, %v7093_v13 }
 0x200   : > { %v5619_v9 = vpack.i.bf16 %v2405_v31, %v7098_v26 }
 0x201   : > { %5615 = vrot.lane.b32.xlu1 %v5614_v24, %s5799_s16 }
 0x202   : > { %v7106_v23 = vpop.permute.xlu0 %1081 }
 0x205   : > { %5620 = vrot.lane.b32.xlu1 %v5619_v9, %s5799_s16  ;;  %v1945_v1 = vpop.f32.mrb[32].mxu0 }
 0x206   : > { %v7110_v34 = vadd.f32 %v1945_v1, %v6868_v27  ;;  %v1947_v35 = vpop.f32.mrb[33].mxu0  ;;  %v2408_v45 = vpop.f32.mrb[32].mxu1 }
 0x207   : > { %v1948_v30 = vadd.f32 %v1947_v35, %v6873_v20  ;;  %v7114_v47 = vadd.f32 %v2408_v45, %v6868_v27  ;;  %v2410_v50 = vpop.f32.mrb[33].mxu1  ;;  %v7118_v33 = vpop.permute.xlu0 %1545 }
 0x208   : > { %2032 = vrot.lane.b32.xlu0 %v7110_v34, %s5799_s16  ;;  %v2411_v60 = vadd.f32 %v2410_v50, %v6873_v20  ;;  %v7142_v1 = vpop.permute.xlu1 %5580 }
 0x209   : > { %2034 = vrot.lane.b32.xlu1 %v1948_v30, %s5799_s16 }
 0x20c   : > { %2495 = vrot.lane.b32.xlu0 %v7114_v47, %s5799_s16  ;;  %v7127_v43 = vpop.permute.xlu0 %1085  ;;  %v7149_v30 = vpop.permute.xlu1 %1083 }
 0x20d   : > { %2497 = vrot.lane.b32.xlu1 %v2411_v60, %s5799_s16 }
 0x20f   : > { %v1951_v42 = vpop.f32.mrb[34].mxu0 }
 0x210   : > { %v7132_v40 = vadd.f32 %v1951_v42, %v6868_v27  ;;  %v1953_v16 = vpop.f32.mrb[35].mxu0  ;;  %v2414_v15 = vpop.f32.mrb[34].mxu1 }
 0x211   : > { %v1954_v19 = vadd.f32 %v1953_v16, %v6873_v20  ;;  %v7136_v24 = vadd.f32 %v2414_v15, %v6868_v27  ;;  %v2416_v31 = vpop.f32.mrb[35].mxu1  ;;  %v7144_v35 = vpop.permute.xlu0 %1549 }
 0x212   : > { %8868 = vst [vmem:[#allocation18_spill] sm:$0xff] %v7132_v40  ;;  %2036 = vrot.lane.b32.xlu0 %v7132_v40, %s5799_s16  ;;  %v2417_v9 = vadd.f32 %v2416_v31, %v6873_v20  ;;  %v7164_v18 = vpop.permute.xlu1 %1547 }
 0x213   : > { %8869 = vst [vmem:[#allocation14_spill] sm:$0xff] %v7136_v24  ;;  %2038 = vrot.lane.b32.xlu1 %v1954_v19, %s5799_s16 }
 0x216   : > { %2499 = vrot.lane.b32.xlu0 %v7136_v24, %s5799_s16  ;;  %v7151_v45 = vpop.permute.xlu0 %1089 }
 0x217   : > { %2501 = vrot.lane.b32.xlu1 %v2417_v9, %s5799_s16 }
 0x219   : > { %v1957_v50 = vpop.f32.mrb[36].mxu0 }
 0x21a   : > { %v7154_v60 = vadd.f32 %v1957_v50, %v6868_v27  ;;  %v1959_v42 = vpop.f32.mrb[37].mxu0  ;;  %v2420_v19 = vpop.f32.mrb[36].mxu1 }
 0x21b   : > { %v1960_v16 = vadd.f32 %v1959_v42, %v6873_v20  ;;  %v7158_v15 = vadd.f32 %v2420_v19, %v6868_v27  ;;  %v2422_v31 = vpop.f32.mrb[37].mxu1  ;;  %v7166_v38 = vpop.permute.xlu0 %1553 }
 0x21c   : > { %8870 = vst [vmem:[#allocation17_spill] sm:$0xff] %v7154_v60  ;;  %2040 = vrot.lane.b32.xlu0 %v7154_v60, %s5799_s16  ;;  %v2423_v9 = vadd.f32 %v2422_v31, %v6873_v20  ;;  %v7171_v42 = vpop.permute.xlu1 %1087 }
 0x21d   : > { %8871 = vst [vmem:[#allocation15_spill] sm:$0xff] %v7158_v15  ;;  %2042 = vrot.lane.b32.xlu1 %v1960_v16, %s5799_s16 }
 0x220   : > { %2503 = vrot.lane.b32.xlu0 %v7158_v15, %s5799_s16  ;;  %v7176_v8 = vpop.permute.xlu0 %1093  ;;  %v7186_v52 = vpop.permute.xlu1 %1551 }
 0x221   : > { %2505 = vrot.lane.b32.xlu1 %v2423_v9, %s5799_s16  ;;  %8873 = vst [vmem:[#allocation22_spill] sm:$0xff] %v7176_v8  ;;  %v5573_v8 = vunpack.i.h.bf16 %v7129_v11 }
 0x223   : > { %v1963_v50 = vpop.f32.mrb[38].mxu0 }
 0x224   : > { %v7174_v19 = vadd.f32 %v1963_v50, %v6868_v27  ;;  %v1965_v28 = vpop.f32.mrb[39].mxu0  ;;  %v2426_v31 = vpop.f32.mrb[38].mxu1 }
 0x225   : > { %v1966_v16 = vadd.f32 %v1965_v28, %v6873_v20  ;;  %v7180_v58 = vadd.f32 %v2426_v31, %v6868_v27  ;;  %v2428_v56 = vpop.f32.mrb[39].mxu1  ;;  %v7190_v50 = vpop.permute.xlu0 %1557 }
 0x226   : > { %8872 = vst [vmem:[#allocation24_spill] sm:$0xff] %v7174_v19  ;;  %2044 = vrot.lane.b32.xlu0 %v7174_v19, %s5799_s16  ;;  %v2429_v9 = vadd.f32 %v2428_v56, %v6873_v20  ;;  %8875 = vst [vmem:[#allocation20_spill] sm:$0xff] %v7190_v50  ;;  %v7193_v31 = vpop.permute.xlu1 %1091 }
 0x227   : > { %8874 = vst [vmem:[#allocation25_spill] sm:$0xff] %v7180_v58  ;;  %2046 = vrot.lane.b32.xlu1 %v1966_v16, %s5799_s16 }
 0x22a   : > { %2507 = vrot.lane.b32.xlu0 %v7180_v58, %s5799_s16  ;;  %v7198_v4 = vpop.permute.xlu0 %1097  ;;  %v427_v58 = vld [vmem:[%s8685_s3 + $0x8] sm:$0xff] }
 0x22b   : > { %2509 = vrot.lane.b32.xlu1 %v2429_v9, %s5799_s16  ;;  %8877 = vst [vmem:[#allocation21_spill] sm:$0xff] %v7198_v4  ;;  %v429_v9 = vld [vmem:[%s8685_s3 + $0x18] sm:$0xff] }
 0x22c   : > { %v4685_v55 = vpack.c.bf16 %v429_v9, %v427_v58  ;;  %v431_v58 = vld [vmem:[%s8685_s3 + $0x28] sm:$0xff]  ;;  %v7226_v9 = vpop.permute.xlu1 %1555 }
 0x22d   : > { %v1969_v28 = vpop.f32.mrb[40].mxu0 }
 0x22e   : > { %v7196_v29 = vadd.f32 %v1969_v28, %v6868_v27  ;;  %v1971_v32 = vpop.f32.mrb[41].mxu0  ;;  %v2432_v16 = vpop.f32.mrb[40].mxu1  ;;  %4686 = vmatprep.subr.bf16.mxu0 %v4685_v55  ;;  %4834 = vmatprep.subr.bf16.mxu1 %v4685_v55  ;;  %v430_v55 = vld [vmem:[%s8685_s3 + $0x20] sm:$0xff] }
 0x22f   : > { %v1972_v56 = vadd.f32 %v1971_v32, %v6873_v20  ;;  %v7208_v19 = vadd.f32 %v2432_v16, %v6868_v27  ;;  %v2434_v28 = vpop.f32.mrb[41].mxu1  ;;  %v426_v32 = vld [vmem:[%s8685_s3] sm:$0xff]  ;;  %v433_v16 = vld [vmem:[%s8685_s3 + $0x38] sm:$0xff] }
 0x230   : > { %8876 = vst [vmem:[#allocation23_spill] sm:$0xff] %v7196_v29  ;;  %2048 = vrot.lane.b32.xlu0 %v7196_v29, %s5799_s16  ;;  %v2435_v15 = vadd.f32 %v2434_v28, %v6873_v20  ;;  %v4687_v60 = vpack.c.bf16 %v428_v46, %v426_v32  ;;  %v432_v46 = vld [vmem:[%s8685_s3 + $0x30] sm:$0xff]  ;;  %v7255_v63 = vpop.permute.xlu1 %1095 }
 0x231   : > { %8878 = vst [vmem:[#allocation31_spill] sm:$0xff] %v7208_v19  ;;  %2050 = vrot.lane.b32.xlu1 %v1972_v56, %s5799_s16  ;;  %v4689_v56 = vpack.c.bf16 %v433_v16, %v431_v58  ;;  %v4691_v28 = vpack.c.bf16 %v432_v46, %v430_v55  ;;  %v435_v58 = vld [vmem:[%s8685_s3 + $0x48] sm:$0xff]  ;;  %v437_v16 = vld [vmem:[%s8685_s3 + $0x58] sm:$0xff]  ;;  %8881 = vst [vmem:[#allocation26_spill] sm:$0xff] %v7255_v63  ;;  %v5572_v63 = vunpack.i.l.bf16 %v7129_v11 }
 0x232   : > { %4688 = vmatpush1.bf16.msra.mxu0 %v4687_v60  ;;  %4836 = vmatpush1.bf16.msra.mxu1 %v4687_v60  ;;  %v7236_v60 = vpop.permute.xlu0 %1561  ;;  %v4693_v36 = vpack.c.bf16 %v437_v16, %v435_v58  ;;  %v464_v11 = vld [vmem:[%s8685_s3 + $0x130] sm:$0xff] }
 0x233   : > { %8879 = vst [vmem:[#allocation28_spill] sm:$0xff] %v7236_v60  ;;  %4690 = vmatprep.subr.bf16.mxu0 %v4689_v56  ;;  %4838 = vmatprep.subr.bf16.mxu1 %v4689_v56  ;;  %v436_v56 = vld [vmem:[%s8685_s3 + $0x50] sm:$0xff] }
 0x234   : > { %2511 = vrot.lane.b32.xlu0 %v7208_v19, %s5799_s16 }
 0x235   : > { %2513 = vrot.lane.b32.xlu1 %v2435_v15, %s5799_s16  ;;  %v434_v15 = vld [vmem:[%s8685_s3 + $0x40] sm:$0xff] }
 0x236   : > { %4692 = vmatpush1.bf16.msra.mxu0 %v4691_v28  ;;  %4840 = vmatpush1.bf16.msra.mxu1 %v4691_v28  ;;  %v4695_v28 = vpack.c.bf16 %v436_v56, %v434_v15  ;;  %v7262_v58 = vpop.permute.xlu0 %1565  ;;  %v441_v15 = vld [vmem:[%s8685_s3 + $0x78] sm:$0xff] }
 0x237   : > { %v1975_v32 = vpop.f32.mrb[42].mxu0  ;;  %4694 = vmatprep.subr.bf16.mxu0 %v4693_v36  ;;  %8883 = vst [vmem:[#allocation27_spill] sm:$0xff] %v7262_v58  ;;  %4842 = vmatprep.subr.bf16.mxu1 %v4693_v36 }
 0x238   : > { %v7246_v19 = vadd.f32 %v1975_v32, %v6868_v27  ;;  %v1977_v29 = vpop.f32.mrb[43].mxu0  ;;  %v2438_v46 = vpop.f32.mrb[42].mxu1 }
 0x239   : > { %v1978_v55 = vadd.f32 %v1977_v29, %v6873_v20  ;;  %v7258_v4 = vadd.f32 %v2438_v46, %v6868_v27  ;;  %v2440_v32 = vpop.f32.mrb[43].mxu1  ;;  %v439_v29 = vld [vmem:[%s8685_s3 + $0x68] sm:$0xff]  ;;  %v438_v46 = vld [vmem:[%s8685_s3 + $0x60] sm:$0xff] }
 0x23a   : > { %8880 = vst [vmem:[#allocation30_spill] sm:$0xff] %v7246_v19  ;;  %2052 = vrot.lane.b32.xlu0 %v7246_v19, %s5799_s16  ;;  %v2441_v16 = vadd.f32 %v2440_v32, %v6873_v20  ;;  %4696 = vmatpush1.bf16.msra.mxu0 %v4695_v28  ;;  %v4697_v56 = vpack.c.bf16 %v441_v15, %v439_v29  ;;  %v445_v32 = vld [vmem:[%s8685_s3 + $0x98] sm:$0xff]  ;;  %v7287_v29 = vpop.permute.xlu1 %1559 }
 0x23b   : > { %8882 = vst [vmem:[#allocation29_spill] sm:$0xff] %v7258_v4  ;;  %2054 = vrot.lane.b32.xlu1 %v1978_v55, %s5799_s16  ;;  %4844 = vmatpush1.bf16.msra.mxu1 %v4695_v28  ;;  %v440_v55 = vld [vmem:[%s8685_s3 + $0x70] sm:$0xff]  ;;  %v443_v28 = vld [vmem:[%s8685_s3 + $0x88] sm:$0xff] }
 0x23c   : > { %v4699_v36 = vpack.c.bf16 %v440_v55, %v438_v46  ;;  %4698 = vmatprep.subr.bf16.mxu0 %v4697_v56  ;;  %4846 = vmatprep.subr.bf16.mxu1 %v4697_v56  ;;  %v4701_v15 = vpack.c.bf16 %v445_v32, %v443_v28  ;;  %v442_v46 = vld [vmem:[%s8685_s3 + $0x80] sm:$0xff]  ;;  %v7295_v56 = vpop.permute.xlu0 %1103  ;;  %v447_v32 = vld [vmem:[%s8685_s3 + $0xa8] sm:$0xff] }
 0x23d   : > { %8884 = vst [vmem:[#allocation36_spill] sm:$0xff] %v7295_v56  ;;  %v448_v56 = vld [vmem:[%s8685_s3 + $0xb0] sm:$0xff] }
 0x23e   : > { %2515 = vrot.lane.b32.xlu0 %v7258_v4, %s5799_s16  ;;  %4700 = vmatpush1.bf16.msra.mxu0 %v4699_v36 }
 0x23f   : > { %2517 = vrot.lane.b32.xlu1 %v2441_v16, %s5799_s16  ;;  %4848 = vmatpush1.bf16.msra.mxu1 %v4699_v36  ;;  %v444_v16 = vld [vmem:[%s8685_s3 + $0x90] sm:$0xff] }
 0x240   : > { %v4703_v4 = vpack.c.bf16 %v444_v16, %v442_v46  ;;  %4702 = vmatprep.subr.bf16.mxu0 %v4701_v15  ;;  %4850 = vmatprep.subr.bf16.mxu1 %v4701_v15  ;;  %v446_v46 = vld [vmem:[%s8685_s3 + $0xa0] sm:$0xff]  ;;  %v7310_v16 = vpop.permute.xlu1 %1099  ;;  %v4705_v15 = vpack.c.bf16 %v449_v22, %v447_v32  ;;  %v7320_v60 = vpop.permute.xlu0 %1105  ;;  %v453_v22 = vld [vmem:[%s8685_s3 + $0xd8] sm:$0xff] }
 0x241   : > { %v1981_v55 = vpop.f32.mrb[44].mxu0  ;;  %8886 = vst [vmem:[#allocation32_spill] sm:$0xff] %v7310_v16  ;;  %8888 = vst [vmem:[#allocation37_spill] sm:$0xff] %v7320_v60  ;;  %v4707_v16 = vpack.c.bf16 %v448_v56, %v446_v46  ;;  %v450_v32 = vld [vmem:[%s8685_s3 + $0xc0] sm:$0xff]  ;;  %v452_v56 = vld [vmem:[%s8685_s3 + $0xd0] sm:$0xff] }
 0x242   : > { %v7298_v19 = vadd.f32 %v1981_v55, %v6868_v27  ;;  %v1983_v58 = vpop.f32.mrb[45].mxu0  ;;  %v2444_v28 = vpop.f32.mrb[44].mxu1  ;;  %4704 = vmatpush1.bf16.msra.mxu0 %v4703_v4 }
 0x243   : > { %v1984_v36 = vadd.f32 %v1983_v58, %v6873_v20  ;;  %v7313_v55 = vadd.f32 %v2444_v28, %v6868_v27  ;;  %v2446_v58 = vpop.f32.mrb[45].mxu1  ;;  %4852 = vmatpush1.bf16.msra.mxu1 %v4703_v4  ;;  %4706 = vmatprep.subr.bf16.mxu0 %v4705_v15  ;;  %v451_v28 = vld [vmem:[%s8685_s3 + $0xc8] sm:$0xff] }
 0x244   : > { %8885 = vst [vmem:[#allocation34_spill] sm:$0xff] %v7298_v19  ;;  %2056 = vrot.lane.b32.xlu0 %v7298_v19, %s5799_s16  ;;  %v2447_v40 = vadd.f32 %v2446_v58, %v6873_v20  ;;  %4854 = vmatprep.subr.bf16.mxu1 %v4705_v15  ;;  %v4709_v4 = vpack.c.bf16 %v453_v22, %v451_v28  ;;  %v7339_v46 = vpop.permute.xlu1 %1563  ;;  %v7341_v58 = vpop.permute.xlu0 %1569  ;;  %v455_v15 = vld [vmem:[%s8685_s3 + $0xe8] sm:$0xff]  ;;  %v457_v28 = vld [vmem:[%s8685_s3 + $0xf8] sm:$0xff]  ;;  %v456_v22 = vld [vmem:[%s8685_s3 + $0xf0] sm:$0xff] }
 0x245   : > { %8887 = vst [vmem:[#allocation35_spill] sm:$0xff] %v7313_v55  ;;  %2058 = vrot.lane.b32.xlu1 %v1984_v36, %s5799_s16  ;;  %v4711_v36 = vpack.c.bf16 %v452_v56, %v450_v32  ;;  %8889 = vst [vmem:[#allocation33_spill] sm:$0xff] %v7339_v46  ;;  %v5568_v46 = vunpack.i.h.bf16 %v7090_v61 }
 0x246   : > { %4708 = vmatpush1.bf16.msra.mxu0 %v4707_v16  ;;  %8890 = vst [vmem:[#allocation38_spill] sm:$0xff] %v7341_v58 }
 0x247   : > { %4856 = vmatpush1.bf16.msra.mxu1 %v4707_v16  ;;  %4710 = vmatprep.subr.bf16.mxu0 %v4709_v4  ;;  %v4713_v16 = vpack.c.bf16 %v457_v28, %v455_v15  ;;  %v459_v15 = vld [vmem:[%s8685_s3 + $0x108] sm:$0xff]  ;;  %v461_v28 = vld [vmem:[%s8685_s3 + $0x118] sm:$0xff] }
 0x248   : > { %2519 = vrot.lane.b32.xlu0 %v7313_v55, %s5799_s16  ;;  %4858 = vmatprep.subr.bf16.mxu1 %v4709_v4  ;;  %v7377_v60 = vpop.permute.xlu0 %1109 }
 0x249   : > { %2521 = vrot.lane.b32.xlu1 %v2447_v40, %s5799_s16  ;;  %v454_v40 = vld [vmem:[%s8685_s3 + $0xe0] sm:$0xff]  ;;  %8892 = vst [vmem:[#allocation39_spill] sm:$0xff] %v7377_v60  ;;  %v1579_v60 = vsel %vm1113_vm8, %v5572_v63, %v5573_v8  ;;  %v468_v63 = vld [vmem:[%s8685_s3 + $0x150] sm:$0xff] }
 0x24a   : > { %4712 = vmatpush1.bf16.msra.mxu0 %v4711_v36  ;;  %v4715_v4 = vpack.c.bf16 %v456_v22, %v454_v40  ;;  %v7372_v40 = vpop.permute.xlu1 %1101  ;;  %v4717_v22 = vpack.c.bf16 %v461_v28, %v459_v15  ;;  %v463_v15 = vld [vmem:[%s8685_s3 + $0x128] sm:$0xff]  ;;  %v465_v28 = vld [vmem:[%s8685_s3 + $0x138] sm:$0xff] }
 0x24b   : > { %4860 = vmatpush1.bf16.msra.mxu1 %v4711_v36  ;;  %4714 = vmatprep.subr.bf16.mxu0 %v4713_v16  ;;  %v458_v36 = vld [vmem:[%s8685_s3 + $0x100] sm:$0xff]  ;;  %8891 = vst [vmem:[#allocation40_spill] sm:$0xff] %v7372_v40  ;;  %v4721_v61 = vpack.c.bf16 %v465_v28, %v463_v15  ;;  %v467_v15 = vld [vmem:[%s8685_s3 + $0x148] sm:$0xff]  ;;  %v469_v28 = vld [vmem:[%s8685_s3 + $0x158] sm:$0xff] }
 0x24c   : > { %4862 = vmatprep.subr.bf16.mxu1 %v4713_v16  ;;  %v460_v16 = vld [vmem:[%s8685_s3 + $0x110] sm:$0xff] }
 0x24d   : > { %v7355_v32 = vpop.f32.mrb[46].mxu0  ;;  %v4719_v58 = vpack.c.bf16 %v460_v16, %v458_v36  ;;  %v1116_v16 = vsel %vm1113_vm8, %v5567_v10, %v5568_v46  ;;  %v466_v10 = vld [vmem:[%s8685_s3 + $0x140] sm:$0xff]  ;;  %v1603_v46 = vmax.f32 %v6925_v51, %v1579_v60 }
 0x24e   : > { %v7357_v56 = vpop.f32.mrb[46].mxu1  ;;  %v7359_v55 = vpop.f32.mrb[47].mxu0  ;;  %4716 = vmatpush1.bf16.msra.mxu0 %v4715_v4  ;;  %v1140_v8 = vmax.f32 %v6919_v21, %v1116_v16  ;;  %v473_v21 = vld [vmem:[%s8685_s3 + $0x178] sm:$0xff]  ;;  %v470_v51 = vld [vmem:[%s8685_s3 + $0x160] sm:$0xff] }
 0x24f   : > { %v7361_v19 = vpop.f32.mrb[47].mxu1  ;;  %4864 = vmatpush1.bf16.msra.mxu1 %v4715_v4  ;;  %4718 = vmatprep.subr.bf16.mxu0 %v4717_v22  ;;  %v462_v4 = vld [vmem:[%s8685_s3 + $0x120] sm:$0xff]  ;;  %v7397_v40 = vpop.permute.xlu1 %1567 }
 0x250   : > { %4866 = vmatprep.subr.bf16.mxu1 %v4717_v22  ;;  %v4723_v22 = vpack.c.bf16 %v464_v11, %v462_v4  ;;  %8893 = vst [vmem:[#allocation41_spill] sm:$0xff] %v7397_v40  ;;  %v471_v40 = vld [vmem:[%s8685_s3 + $0x168] sm:$0xff] }
 0x252   : > { %4720 = vmatpush1.bf16.msra.mxu0 %v4719_v58 }
 0x253   : > { %4868 = vmatpush1.bf16.msra.mxu1 %v4719_v58  ;;  %4722 = vmatprep.subr.bf16.mxu0 %v4721_v61  ;;  %v4725_v58 = vpack.c.bf16 %v469_v28, %v467_v15  ;;  %v7413_v11 = vpop.permute.xlu1 %1107 }
 0x254   : > { %4870 = vmatprep.subr.bf16.mxu1 %v4721_v61  ;;  %v4727_v61 = vpack.c.bf16 %v468_v63, %v466_v10 }
 0x255   : > { %v5586_v36 = vpop.permute.xlu0 %5585 }
 0x256   : > { %v5588_v24 = vunpack.i.h.bf16 %v5586_v36  ;;  %v5587_v50 = vunpack.i.l.bf16 %v5586_v36  ;;  %4724 = vmatpush1.bf16.msra.mxu0 %v4723_v22 }
 0x257   : > { %4872 = vmatpush1.bf16.msra.mxu1 %v4723_v22  ;;  %4726 = vmatprep.subr.bf16.mxu0 %v4725_v58  ;;  %v1615_v22 = vmax.f32 %v1140_v8, %v1603_v46  ;;  %v476_v46 = vld [vmem:[%s8685_s3 + $0x190] sm:$0xff] }
 0x258   : > { %v2064_v36 = vsel %vm1113_vm8, %v5587_v50, %v5588_v24  ;;  %4874 = vmatprep.subr.bf16.mxu1 %v4725_v58  ;;  %v4729_v24 = vpack.c.bf16 %v473_v21, %v471_v40  ;;  %v472_v50 = vld [vmem:[%s8685_s3 + $0x170] sm:$0xff]  ;;  %v475_v40 = vld [vmem:[%s8685_s3 + $0x188] sm:$0xff] }
 0x259   : > { %v5591_v4 = vpop.permute.xlu0 %5590  ;;  %v2088_v16 = vmax.f32 %v7054_v12, %v2064_v36  ;;  %v4731_v10 = vpack.c.bf16 %v472_v50, %v470_v51  ;;  %v474_v12 = vld [vmem:[%s8685_s3 + $0x180] sm:$0xff]  ;;  %v5583_v51 = vunpack.i.h.bf16 %v7142_v1  ;;  %v481_v50 = vld [vmem:[%s8685_s3 + $0x1b8] sm:$0xff] }
 0x25a   : > { %v5593_v15 = vunpack.i.h.bf16 %v5591_v4  ;;  %v5592_v28 = vunpack.i.l.bf16 %v5591_v4  ;;  %4728 = vmatpush1.bf16.msra.mxu0 %v4727_v61 }
 0x25b   : > { %4876 = vmatpush1.bf16.msra.mxu1 %v4727_v61  ;;  %4730 = vmatprep.subr.bf16.mxu0 %v4729_v24  ;;  %v7447_v61 = vmax.f32 %v1615_v22, 0.0  ;;  %v478_v22 = vld [vmem:[%s8685_s3 + $0x1a0] sm:$0xff] }
 0x25c   : > { %v2527_v60 = vsel %vm1113_vm8, %v5592_v28, %v5593_v15  ;;  %4878 = vmatprep.subr.bf16.mxu1 %v4729_v24  ;;  %v477_v15 = vld [vmem:[%s8685_s3 + $0x198] sm:$0xff]  ;;  %v4735_v28 = vpack.c.bf16 %v476_v46, %v474_v12  ;;  %v479_v24 = vld [vmem:[%s8685_s3 + $0x1a8] sm:$0xff]  ;;  %v5578_v12 = vunpack.i.h.bf16 %v7100_v5 }
 0x25d   : > { %v2551_v58 = vmax.f32 %v7058_v6, %v2527_v60  ;;  %v7442_v6 = vpop.permute.xlu1 %1571  ;;  %v4733_v8 = vpack.c.bf16 %v477_v15, %v475_v40  ;;  %v4737_v40 = vpack.c.bf16 %v481_v50, %v479_v24  ;;  %v480_v15 = vld [vmem:[%s8685_s3 + $0x1b0] sm:$0xff]  ;;  %v483_v24 = vld [vmem:[%s8685_s3 + $0x1c8] sm:$0xff]  ;;  %v482_v50 = vld [vmem:[%s8685_s3 + $0x1c0] sm:$0xff] }
 0x25e   : > { %v5596_v63 = vpop.permute.xlu0 %5595  ;;  %4732 = vmatpush1.bf16.msra.mxu0 %v4731_v10  ;;  %v4739_v46 = vpack.c.bf16 %v480_v15, %v478_v22 }
 0x25f   : > { %v7431_v4 = vmax.f32 %v2088_v16, %v2551_v58  ;;  %4880 = vmatpush1.bf16.msra.mxu1 %v4731_v10  ;;  %4734 = vmatprep.subr.bf16.mxu0 %v4733_v8  ;;  %v5582_v16 = vunpack.i.l.bf16 %v7142_v1  ;;  %v5598_v1 = vunpack.i.h.bf16 %v5596_v63 }
 0x260   : > { %4882 = vmatprep.subr.bf16.mxu1 %v4733_v8  ;;  %v5577_v8 = vunpack.i.l.bf16 %v7100_v5  ;;  %v485_v5 = vld [vmem:[%s8685_s3 + $0x1d8] sm:$0xff] }
 0x261   : > { %8894 = vst [vmem:[#allocation42_spill] sm:$0xff] %v7431_v4  ;;  %v8772_v36 = vmax.f32 %v7431_v4, 0.0  ;;  %v5597_v4 = vunpack.i.l.bf16 %v5596_v63  ;;  %v4741_v63 = vpack.c.bf16 %v485_v5, %v483_v24 }
 0x262   : > { %v5601_v21 = vpop.permute.xlu0 %5600  ;;  %4736 = vmatpush1.bf16.msra.mxu0 %v4735_v28  ;;  %v1117_v22 = vsel %vm1113_vm8, %v5577_v8, %v5578_v12  ;;  %v487_v12 = vld [vmem:[%s8685_s3 + $0x1e8] sm:$0xff] }
 0x263   : > { %v5624_v60 = vpack.i.bf16 %v7447_v61, %v8772_v36  ;;  %v5603_v58 = vunpack.i.h.bf16 %v5601_v21  ;;  %v5602_v10 = vunpack.i.l.bf16 %v5601_v21  ;;  %4884 = vmatpush1.bf16.msra.mxu1 %v4735_v28  ;;  %v7470_v36 = vpop.permute.xlu1 %1111  ;;  %4738 = vmatprep.subr.bf16.mxu0 %v4737_v40  ;;  %v7474_v21 = vadd.f32 %v7045_v62, %v6868_v27  ;;  %v484_v62 = vld [vmem:[%s8685_s3 + $0x1d0] sm:$0xff] }
 0x264   : > { %4886 = vmatprep.subr.bf16.mxu1 %v4737_v40  ;;  %v1580_v28 = vsel %vm1113_vm8, %v5582_v16, %v5583_v51  ;;  %v7495_v51 = vadd.f32 %v7355_v32, %v6868_v27  ;;  %v4743_v16 = vpack.c.bf16 %v484_v62, %v482_v50  ;;  %v489_v32 = vld [vmem:[%s8685_s3 + $0x1f8] sm:$0xff] }
 0x265   : > { %5625 = vrot.lane.b32.xlu0 %v5624_v60, %s5800_s22  ;;  %v2528_v60 = vsel %vm1113_vm8, %v5602_v10, %v5603_v58  ;;  %v2065_v58 = vsel %vm1113_vm8, %v5597_v4, %v5598_v1  ;;  %v1604_v8 = vmax.f32 %v6936_v37, %v1580_v28  ;;  %v4745_v4 = vpack.c.bf16 %v489_v32, %v487_v12  ;;  %v488_v1 = vld [vmem:[%s8685_s3 + $0x1f0] sm:$0xff] }
 0x266   : > { %4740 = vmatpush1.bf16.msra.mxu0 %v4739_v46  ;;  %v2552_v40 = vmax.f32 %v7070_v54, %v2528_v60  ;;  %v486_v54 = vld [vmem:[%s8685_s3 + $0x1e0] sm:$0xff]  ;;  %v2089_v5 = vmax.f32 %v7065_v25, %v2065_v58  ;;  %v7518_v37 = vadd.f32 %v7357_v56, %v6868_v27  ;;  %v7522_v28 = vadd.f32 %v6900_v49, %v6868_v27 }
 0x267   : > { %4888 = vmatpush1.bf16.msra.mxu1 %v4739_v46  ;;  %4742 = vmatprep.subr.bf16.mxu0 %v4741_v63  ;;  %v1141_v46 = vmax.f32 %v6933_v59, %v1117_v22  ;;  %v4747_v59 = vpack.c.bf16 %v488_v1, %v486_v54  ;;  %v979_v60 = vadd.f32 %v6904_v0, %v6873_v20 }
 0x268   : > { %4890 = vmatprep.subr.bf16.mxu1 %v4741_v63  ;;  %v7527_v22 = vmax.f32 %v2089_v5, %v2552_v40  ;;  %v1582_v56 = vsel %vm1113_vm8, %v7144_v35, %v7186_v52  ;;  %v1581_v0 = vsel %vm1113_vm8, %v7118_v33, %v7164_v18  ;;  %v1119_v58 = vsel %vm1113_vm8, %v7127_v43, %v7171_v42  ;;  %v491_v33 = vld [vmem:[%s8685_s3 + $0x208] sm:$0xff] }
 0x269   : > { %1573 = vrot.lane.b32.xlu0 %v7474_v21, %s5799_s16  ;;  %v5606_v10 = vpop.permute.xlu1 %5605  ;;  %v5634_v35 = vpack.i.bf16 %v979_v60, %v7522_v28  ;;  %v1606_v40 = vmax.f32 %v6966_v41, %v1582_v56  ;;  %v1118_v12 = vsel %vm1113_vm8, %v7106_v23, %v7149_v30  ;;  %v1605_v41 = vmax.f32 %v6952_v57, %v1581_v0 }
 0x26a   : > { %v5608_v15 = vunpack.i.h.bf16 %v5606_v10  ;;  %v5607_v24 = vunpack.i.l.bf16 %v5606_v10  ;;  %4744 = vmatpush1.bf16.msra.mxu0 %v4743_v16  ;;  %v1143_v43 = vmax.f32 %v6959_v3, %v1119_v58 }
 0x26b   : > { %4892 = vmatpush1.bf16.msra.mxu1 %v4743_v16  ;;  %4746 = vmatprep.subr.bf16.mxu0 %v4745_v4  ;;  %v1616_v16 = vmax.f32 %v1141_v46, %v1604_v8  ;;  %v1142_v8 = vmax.f32 %v6945_v7, %v1118_v12 }
 0x26c   : > { %4894 = vmatprep.subr.bf16.mxu1 %v4745_v4  ;;  %v2066_v25 = vsel %vm1113_vm8, %v5607_v24, %v5608_v15  ;;  %v2576_v24 = vmax.f32 %v7527_v22, 0.0  ;;  %v1618_v46 = vmax.f32 %v1143_v43, %v1606_v40 }
 0x26d   : > { %2060 = vrot.lane.b32.xlu0 %v7495_v51, %s5799_s16  ;;  %v5611_v63 = vpop.permute.xlu1 %5610  ;;  %v2090_v10 = vmax.f32 %v7078_v39, %v2066_v25  ;;  %v493_v39 = vld [vmem:[%s8685_s3 + $0x218] sm:$0xff]  ;;  %v1617_v5 = vmax.f32 %v1142_v8, %v1605_v41  ;;  %v8897_v8 = vld [vmem:[#allocation26_spill] sm:$0xff] }
 0x26e   : > { %v5613_v50 = vunpack.i.h.bf16 %v5611_v63  ;;  %v5612_v62 = vunpack.i.l.bf16 %v5611_v63  ;;  %4748 = vmatpush1.bf16.msra.mxu0 %v4747_v59  ;;  %v4749_v42 = vpack.c.bf16 %v493_v39, %v491_v33  ;;  %v7572_v63 = vmax.f32 %v1618_v46, 0.0  ;;  %v8898_v46 = vld [vmem:[#allocation22_spill] sm:$0xff] }
 0x26f   : > { %4896 = vmatpush1.bf16.msra.mxu1 %v4747_v59  ;;  %v7577_v56 = vmax.f32 %v1617_v5, 0.0  ;;  %v8902_v5 = vld [vmem:[#allocation28_spill] sm:$0xff] }
 0x270   : > { %v2529_v49 = vsel %vm1113_vm8, %v5612_v62, %v5613_v50  ;;  %4750 = vmatprep.subr.bf16.mxu0 %v4749_v42  ;;  %4898 = vmatprep.subr.bf16.mxu1 %v4749_v42  ;;  %v1503_v62 = vadd.f32 %v7048_v17, %v6873_v20  ;;  %v8896_v42 = vld [vmem:[#allocation14_spill] sm:$0xff] }
 0x271   : > { %2523 = vrot.lane.b32.xlu0 %v7518_v37, %s5799_s16  ;;  %v2553_v52 = vmax.f32 %v7082_v53, %v2529_v49  ;;  %v7555_v53 = vmax.f32 %v1616_v16, 0.0  ;;  %v1583_v49 = vsel %vm1113_vm8, %v7166_v38, %v7226_v9 }
 0x272   : > { %v1607_v38 = vmax.f32 %v6980_v14, %v1583_v49  ;;  %v1443_v14 = vadd.f32 %v6906_v2, %v6873_v20  ;;  %v8905_v49 = vld [vmem:[#allocation21_spill] sm:$0xff] }
 0x273   : > { %v5616_v15 = vpop.permute.xlu1 %5615  ;;  %v2565_v18 = vmax.f32 %v2090_v10, %v2553_v52  ;;  %v5644_v54 = vpack.i.bf16 %v7555_v53, %v2576_v24  ;;  %v1120_v52 = vsel %vm1113_vm8, %v7151_v45, %v7193_v31  ;;  %v7607_v31 = vadd.f32 %v6902_v44, %v6868_v27 }
 0x274   : > { %v5618_v23 = vunpack.i.h.bf16 %v5616_v15  ;;  %v5617_v30 = vunpack.i.l.bf16 %v5616_v15  ;;  %v1144_v15 = vmax.f32 %v6973_v48, %v1120_v52  ;;  %v8907_v52 = vld [vmem:[#allocation3_spill] sm:$0xff] }
 0x275   : > { %5635 = vrot.lane.b32.xlu0 %v5634_v35, %s5799_s16  ;;  %v7560_v32 = vmax.f32 %v2565_v18, 0.0  ;;  %v5639_v33 = vpack.i.bf16 %v1443_v14, %v7607_v31  ;;  %v8908_v14 = vld [vmem:[#allocation17_spill] sm:$0xff] }
 0x276   : > { %v2067_v59 = vsel %vm1113_vm8, %v5617_v30, %v5618_v23 }
 0x277   : > { %v5621_v4 = vpop.permute.xlu1 %5620  ;;  %v5629_v3 = vpack.i.bf16 %v7560_v32, %v7447_v61  ;;  %v2091_v16 = vmax.f32 %v7093_v13, %v2067_v59  ;;  %v5649_v13 = vpack.i.bf16 %v7577_v56, %v7560_v32 }
 0x278   : > { %v5623_v57 = vunpack.i.h.bf16 %v5621_v4  ;;  %v5622_v1 = vunpack.i.l.bf16 %v5621_v4  ;;  %v1121_v4 = vsel %vm1113_vm8, %v8898_v46, %v8897_v8 }
 0x279   : > { %5645 = vrot.lane.b32.xlu0 %v5644_v54, %s5800_s22  ;;  %5630 = vrot.lane.b32.xlu1 %v5629_v3, %s5797_s17  ;;  %v8899_v54 = vld [vmem:[#allocation5_spill] sm:$0xff] }
 0x27a   : > { %v2530_v7 = vsel %vm1113_vm8, %v5622_v1, %v5623_v57  ;;  %v2033_v60 = vpop.permute.xlu0 %2032  ;;  %v8900_v1 = vld [vmem:[#allocation18_spill] sm:$0xff] }
 0x27b   : > { %v2554_v25 = vmax.f32 %v7098_v26, %v2530_v7  ;;  %v2035_v50 = vpop.permute.xlu1 %2034  ;;  %v1990_v26 = vadd.f32 %v7359_v55, %v6873_v20  ;;  %v2453_v55 = vadd.f32 %v7361_v19, %v6873_v20  ;;  %v8895_v20 = vld [vmem:[#allocation20_spill] sm:$0xff] }
 0x27c   : > { %v2068_v0 = vsel %vm1113_vm8, %v2033_v60, %v2035_v50  ;;  %v1584_v2 = vsel %vm1113_vm8, %v8895_v20, %v7287_v29  ;;  %v8901_v29 = vld [vmem:[#allocation33_spill] sm:$0xff]  ;;  %v8903_v60 = vld [vmem:[#allocation2_spill] sm:$0xff]  ;;  %v8911_v20 = vld [vmem:[#allocation27_spill] sm:$0xff] }
 0x27d   : > { %2681 = vrot.lane.b32.xlu0 %v7572_v63, %s5801_s25  ;;  %1575 = vrot.lane.b32.xlu1 %v1503_v62, %s5799_s16  ;;  %v2566_v58 = vmax.f32 %v2091_v16, %v2554_v25  ;;  %v2092_v9 = vmax.f32 %v7110_v34, %v2068_v0  ;;  %v1608_v57 = vmax.f32 %v8899_v54, %v1584_v2  ;;  %v8904_v16 = vld [vmem:[#allocation32_spill] sm:$0xff] }
 0x27e   : > { %v2496_v17 = vpop.permute.xlu0 %2495  ;;  %v1585_v59 = vsel %vm1113_vm8, %v8902_v5, %v8901_v29  ;;  %v1145_v25 = vmax.f32 %v8903_v60, %v1121_v4  ;;  %v1122_v0 = vsel %vm1113_vm8, %v8905_v49, %v8904_v16  ;;  %v8914_v4 = vld [vmem:[#allocation13_spill] sm:$0xff] }
 0x27f   : > { %v2498_v10 = vpop.permute.xlu1 %2497  ;;  %v7603_v12 = vmax.f32 %v2566_v58, 0.0 }
 0x280   : > { %v2531_v35 = vsel %vm1113_vm8, %v2496_v17, %v2498_v10  ;;  %v8906_v17 = vld [vmem:[#allocation12_spill] sm:$0xff] }
 0x281   : > { %v2555_v40 = vmax.f32 %v7114_v47, %v2531_v35  ;;  %5650 = vrot.lane.b32.xlu0 %v5649_v13, %s5800_s22  ;;  %2062 = vrot.lane.b32.xlu1 %v1990_v26, %s5799_s16  ;;  %v1619_v47 = vmax.f32 %v1144_v15, %v1607_v38  ;;  %v5664_v48 = vpack.i.bf16 %v7572_v63, %v7603_v12 }
 0x282   : > { %v1620_v26 = vmax.f32 %v1145_v25, %v1608_v57  ;;  %v1609_v58 = vmax.f32 %v8906_v17, %v1585_v59  ;;  %v1146_v35 = vmax.f32 %v8907_v52, %v1122_v0  ;;  %v8915_v57 = vld [vmem:[#allocation10_spill] sm:$0xff]  ;;  %v8916_v25 = vld [vmem:[#allocation24_spill] sm:$0xff] }
 0x283   : > { %v2567_v45 = vmax.f32 %v2092_v9, %v2555_v40  ;;  %v7618_v44 = vmax.f32 %v1619_v47, 0.0  ;;  %v8909_v47 = vld [vmem:[#allocation15_spill] sm:$0xff] }
 0x284   : > { %v2037_v34 = vpop.permute.xlu0 %2036  ;;  %v7657_v15 = vmax.f32 %v1620_v26, 0.0 }
 0x285   : > { %v2039_v18 = vpop.permute.xlu1 %2038  ;;  %5655 = vrot.lane.b32.xlu0 %v5649_v13, %s5802_s11  ;;  %2525 = vrot.lane.b32.xlu1 %v2453_v55, %s5799_s16  ;;  %v7613_v19 = vmax.f32 %v2567_v45, 0.0  ;;  %v5659_v55 = vpack.i.bf16 %v7603_v12, %v7555_v53  ;;  %v1621_v45 = vmax.f32 %v1146_v35, %v1609_v58 }
 0x286   : > { %v2069_v41 = vsel %vm1113_vm8, %v2037_v34, %v2039_v18 }
 0x287   : > { %v5679_v30 = vpack.i.bf16 %v7618_v44, %v7613_v19  ;;  %v2093_v3 = vmax.f32 %v8900_v1, %v2069_v41  ;;  %v8912_v41 = vld [vmem:[#allocation36_spill] sm:$0xff]  ;;  %v7673_v8 = vmax.f32 %v1621_v45, 0.0  ;;  %v5674_v59 = vpack.i.bf16 %v7613_v19, %v7577_v56  ;;  %v8918_v45 = vld [vmem:[#allocation23_spill] sm:$0xff] }
 0x288   : > { %v2500_v27 = vpop.permute.xlu0 %2499 }
 0x289   : > { %v2502_v39 = vpop.permute.xlu1 %2501  ;;  %5665 = vrot.lane.b32.xlu0 %v5664_v48, %s5800_s22  ;;  %5640 = vrot.lane.b32.xlu1 %v5639_v33, %s5799_s16 }
 0x28a   : > { %v2532_v43 = vsel %vm1113_vm8, %v2500_v27, %v2502_v39  ;;  %v8910_v39 = vld [vmem:[#allocation41_spill] sm:$0xff] }
 0x28b   : > { %v2556_v23 = vmax.f32 %v8896_v42, %v2532_v43  ;;  %v1586_v2 = vsel %vm1113_vm8, %v8911_v20, %v8910_v39  ;;  %v8913_v43 = vld [vmem:[#allocation40_spill] sm:$0xff] }
 0x28c   : > { %v1123_v42 = vsel %vm1113_vm8, %v8913_v43, %v8912_v41  ;;  %v1610_v54 = vmax.f32 %v8914_v4, %v1586_v2  ;;  %v8920_v43 = vld [vmem:[#allocation38_spill] sm:$0xff] }
 0x28d   : > { %5680 = vrot.lane.b32.xlu0 %v5679_v30, %s5800_s22  ;;  %2679 = vrot.lane.b32.xlu1 %v7577_v56, %s5801_s25  ;;  %v2568_v50 = vmax.f32 %v2093_v3, %v2556_v23  ;;  %v1147_v1 = vmax.f32 %v8915_v57, %v1123_v42  ;;  %v1587_v42 = vsel %vm1113_vm8, %v8920_v43, %v7442_v6  ;;  %v8925_v6 = vld [vmem:[#allocation8_spill] sm:$0xff] }
 0x28e   : > { %v2041_v7 = vpop.permute.xlu0 %2040 }
 0x28f   : > { %v2043_v62 = vpop.permute.xlu1 %2042  ;;  %v7652_v38 = vmax.f32 %v2568_v50, 0.0 }
 0x290   : > { %v2070_v10 = vsel %vm1113_vm8, %v2041_v7, %v2043_v62  ;;  %v8917_v62 = vld [vmem:[#allocation25_spill] sm:$0xff] }
 0x291   : > { %3253 = vrot.lane.b32.xlu0 %v7613_v19, %s5801_s25  ;;  %2683 = vrot.lane.b32.xlu1 %v7618_v44, %s5801_s25  ;;  %v2094_v34 = vmax.f32 %v8908_v14, %v2070_v10  ;;  %v7665_v27 = vpack.i.bf16 %v7657_v15, %v7652_v38  ;;  %v5689_v49 = vpack.i.bf16 %v7652_v38, %v7572_v63 }
 0x292   : > { %v2504_v13 = vpop.permute.xlu0 %2503 }
 0x293   : > { %v2506_v9 = vpop.permute.xlu1 %2505 }
 0x294   : > { %v2533_v40 = vsel %vm1113_vm8, %v2504_v13, %v2506_v9 }
 0x295   : > { %v2557_v18 = vmax.f32 %v8909_v47, %v2533_v40  ;;  %5685 = vrot.lane.b32.xlu0 %v5679_v30, %s5802_s11  ;;  %5660 = vrot.lane.b32.xlu1 %v5659_v55, %s5797_s17 }
 0x297   : > { %v2569_v33 = vmax.f32 %v2094_v34, %v2557_v18  ;;  %v8919_v34 = vld [vmem:[#allocation31_spill] sm:$0xff] }
 0x298   : > { %v2045_v23 = vpop.permute.xlu0 %2044 }
 0x299   : > { %v7675_v46 = vmax.f32 %v2569_v33, 0.0  ;;  %v2047_v30 = vpop.permute.xlu1 %2046  ;;  %5695 = vrot.lane.b32.xlu0 %v7665_v27, %s5800_s22  ;;  %5670 = vrot.lane.b32.xlu1 %v5664_v48, %s5802_s11  ;;  %v1622_v48 = vmax.f32 %v1147_v1, %v1610_v54  ;;  %v8921_v54 = vld [vmem:[#allocation37_spill] sm:$0xff] }
 0x29a   : > { %v2071_v29 = vsel %vm1113_vm8, %v2045_v23, %v2047_v30  ;;  %v1124_v57 = vsel %vm1113_vm8, %v8921_v54, %v7413_v11 }
 0x29b   : > { %v5704_v3 = vpack.i.bf16 %v7673_v8, %v7675_v46  ;;  %v2095_v50 = vmax.f32 %v8916_v25, %v2071_v29  ;;  %v1634_v17 = vmax.f32 %v1622_v48, 0.0  ;;  %v5699_v55 = vpack.i.bf16 %v7675_v46, %v7618_v44  ;;  %v8922_v29 = vld [vmem:[#allocation11_spill] sm:$0xff] }
 0x29c   : > { %v2508_v5 = vpop.permute.xlu0 %2507  ;;  %v1148_v25 = vmax.f32 %v8925_v6, %v1124_v57  ;;  %v495_v6 = vld [vmem:[%s8685_s3 + $0x228] sm:$0xff] }
 0x29d   : > { %v2510_v7 = vpop.permute.xlu1 %2509  ;;  %5705 = vrot.lane.b32.xlu0 %v5704_v3, %s5800_s22  ;;  %5675 = vrot.lane.b32.xlu1 %v5674_v59, %s5797_s17  ;;  %v8923_v59 = vld [vmem:[#allocation30_spill] sm:$0xff] }
 0x29e   : > { %v2534_v60 = vsel %vm1113_vm8, %v2508_v5, %v2510_v7  ;;  %v1611_v5 = vmax.f32 %v8922_v29, %v1587_v42 }
 0x29f   : > { %v2558_v16 = vmax.f32 %v8917_v62, %v2534_v60  ;;  %v8924_v60 = vld [vmem:[#allocation29_spill] sm:$0xff] }
 0x2a1   : > { %v2570_v0 = vmax.f32 %v2095_v50, %v2558_v16  ;;  %5690 = vrot.lane.b32.xlu1 %v5689_v49, %s5797_s17  ;;  %v1623_v16 = vmax.f32 %v1148_v25, %v1611_v5  ;;  %v490_v5 = vld [vmem:[%s8685_s3 + $0x200] sm:$0xff]  ;;  %v497_v25 = vld [vmem:[%s8685_s3 + $0x238] sm:$0xff] }
 0x2a2   : > { %v2049_v26 = vpop.permute.xlu0 %2048 }
 0x2a3   : > { %v7695_v58 = vmax.f32 %v2570_v0, 0.0  ;;  %v2051_v10 = vpop.permute.xlu1 %2050 }
 0x2a4   : > { %v2072_v52 = vsel %vm1113_vm8, %v2049_v26, %v2051_v10 }
 0x2a5   : > { %v5714_v13 = vpack.i.bf16 %v1634_v17, %v7695_v58  ;;  %3255 = vrot.lane.b32.xlu1 %v7652_v38, %s5801_s25  ;;  %v2096_v14 = vmax.f32 %v8918_v45, %v2072_v52  ;;  %v5709_v39 = vpack.i.bf16 %v7695_v58, %v7657_v15  ;;  %v1635_v52 = vmax.f32 %v1623_v16, 0.0 }
 0x2a6   : > { %v2512_v35 = vpop.permute.xlu0 %2511 }
 0x2a7   : > { %5715 = vrot.lane.b32.xlu0 %v5714_v13, %s5800_s22  ;;  %v2514_v9 = vpop.permute.xlu1 %2513  ;;  %s5804_s22 = smov 48  }
 0x2a8   : > { %v2535_v40 = vsel %vm1113_vm8, %v2512_v35, %v2514_v9  ;;  %v8926_v9 = vld [vmem:[#allocation34_spill] sm:$0xff] }
 0x2a9   : > { %v2559_v47 = vmax.f32 %v8919_v34, %v2535_v40  ;;  %5700 = vrot.lane.b32.xlu1 %v5699_v55, %s5797_s17  ;;  %v8927_v55 = vld [vmem:[#allocation35_spill] sm:$0xff] }
 0x2ab   : > { %v2571_v18 = vmax.f32 %v2096_v14, %v2559_v47  ;;  %3257 = vrot.lane.b32.xlu0 %v7675_v46, %s5801_s25 }
 0x2ac   : > { %v2053_v33 = vpop.permute.xlu0 %2052 }
 0x2ad   : > { %v2583_v20 = vmax.f32 %v2571_v18, 0.0  ;;  %v2055_v2 = vpop.permute.xlu1 %2054  ;;  %5710 = vrot.lane.b32.xlu1 %v5709_v39, %s5797_s17  ;;  %v8928_v18 = vld [vmem:[#allocation16_spill] sm:$0xff] }
 0x2ae   : > { %v2073_v23 = vsel %vm1113_vm8, %v2053_v33, %v2055_v2  ;;  %v5563_v33 = vunpack.i.h.bf16 %v8928_v18  ;;  %v5562_v39 = vunpack.i.l.bf16 %v8928_v18 }
 0x2af   : > { %2685 = vrot.lane.b32.xlu0 %v7657_v15, %s5801_s25  ;;  %v5719_v41 = vpack.i.bf16 %v2583_v20, %v7673_v8  ;;  %v2097_v7 = vmax.f32 %v8923_v59, %v2073_v23  ;;  %v5744_v14 = vpack.i.bf16 %v1635_v52, %v2583_v20  ;;  %v8930_v23 = vld [vmem:[#allocation6_spill] sm:$0xff]  ;;  %v492_v59 = vld [vmem:[%s8685_s3 + $0x210] sm:$0xff] }
 0x2b0   : > { %v2516_v30 = vpop.permute.xlu0 %2515 }
 0x2b1   : > { %v2518_v4 = vpop.permute.xlu1 %2517  ;;  %5720 = vrot.lane.b32.xlu1 %v5719_v41, %s5797_s17 }
 0x2b2   : > { %v2536_v1 = vsel %vm1113_vm8, %v2516_v30, %v2518_v4  ;;  %v8931_v4 = vld [vmem:[#allocation4_spill] sm:$0xff] }
 0x2b3   : > { %v2560_v48 = vmax.f32 %v8924_v60, %v2536_v1  ;;  %5735 = vrot.lane.b32.xlu0 %v5704_v3, %s5802_s11 }
 0x2b5   : > { %v2572_v50 = vmax.f32 %v2097_v7, %v2560_v48 }
 0x2b6   : > { %v2057_v62 = vpop.permute.xlu0 %2056 }
 0x2b7   : > { %v7730_v49 = vmax.f32 %v2572_v50, 0.0  ;;  %3261 = vrot.lane.b32.xlu0 %v2583_v20, %s5801_s25  ;;  %v2059_v11 = vpop.permute.xlu1 %2058  ;;  %v8929_v20 = vld [vmem:[#allocation19_spill] sm:$0xff] }
 0x2b8   : > { %v2074_v26 = vsel %vm1113_vm8, %v2057_v62, %v2059_v11  ;;  %v5558_v2 = vunpack.i.h.bf16 %v8929_v20  ;;  %v5557_v41 = vunpack.i.l.bf16 %v8929_v20  ;;  %v4751_v11 = vpack.c.bf16 %v492_v59, %v490_v5 }
 0x2b9   : > { %v5724_v0 = vpack.i.bf16 %v7730_v49, %v1634_v17  ;;  %v2098_v40 = vmax.f32 %v8926_v9, %v2074_v26  ;;  %v494_v9 = vld [vmem:[%s8685_s3 + $0x220] sm:$0xff] }
 0x2ba   : > { %v2520_v10 = vpop.permute.xlu0 %2519 }
 0x2bb   : > { %5725 = vrot.lane.b32.xlu1 %v5724_v0, %s5797_s17  ;;  %2689 = vrot.lane.b32.xlu0 %v1634_v17, %s5801_s25  ;;  %v2522_v3 = vpop.permute.xlu1 %2521  ;;  %v8932_v0 = vld [vmem:[#allocation39_spill] sm:$0xff] }
 0x2bc   : > { %v2537_v35 = vsel %vm1113_vm8, %v2520_v10, %v2522_v3  ;;  %v1125_v26 = vsel %vm1113_vm8, %v8932_v0, %v7470_v36 }
 0x2bd   : > { %v2561_v45 = vmax.f32 %v8927_v55, %v2537_v35  ;;  %v4753_v35 = vpack.c.bf16 %v497_v25, %v495_v6  ;;  %v504_v6 = vld [vmem:[%s8685_s3 + $0x270] sm:$0xff] }
 0x2bf   : > { %v2573_v34 = vmax.f32 %v2098_v40, %v2561_v45  ;;  %5730 = vrot.lane.b32.xlu1 %v7665_v27, %s5802_s11  ;;  %5745 = vrot.lane.b32.xlu0 %v5744_v14, %s5802_s11  ;;  %v496_v40 = vld [vmem:[%s8685_s3 + $0x230] sm:$0xff]  ;;  %v8933_v45 = vld [vmem:[#allocation42_spill] sm:$0xff] }
 0x2c0   : > { %v8934_v14 = vmax.f32 %v8933_v45, 0.0 }
 0x2c1   : > { %v2585_v47 = vmax.f32 %v2573_v34, 0.0 }
 0x2c3   : > { %3259 = vrot.lane.b32.xlu1 %v7695_v58, %s5801_s25  ;;  %3265 = vrot.lane.b32.xlu0 %v2585_v47, %s5801_s25  ;;  %v499_v47 = vld [vmem:[%s8685_s3 + $0x248] sm:$0xff] }
 0x2c7   : > { %2687 = vrot.lane.b32.xlu1 %v7673_v8, %s5801_s25  ;;  %v1577_v8 = vsel %vm1113_vm8, %v5562_v39, %v5563_v33  ;;  %v8935_v33 = vld [vmem:[#allocation9_spill] sm:$0xff] }
 0x2c8   : > { %v1601_v30 = vmax.f32 %v8930_v23, %v1577_v8  ;;  %v1149_v39 = vmax.f32 %v8935_v33, %v1125_v26 }
 0x2cb   : > { %5740 = vrot.lane.b32.xlu1 %v5714_v13, %s5802_s11  ;;  %v1114_v13 = vsel %vm1113_vm8, %v5557_v41, %v5558_v2  ;;  %v4755_v2 = vpack.c.bf16 %v496_v40, %v494_v9 }
 0x2cc   : > { %v1138_v54 = vmax.f32 %v8931_v4, %v1114_v13  ;;  %v498_v13 = vld [vmem:[%s8685_s3 + $0x240] sm:$0xff]  ;;  %v505_v4 = vld [vmem:[%s8685_s3 + $0x278] sm:$0xff] }
 0x2ce   : > { %v1613_v1 = vmax.f32 %v1138_v54, %v1601_v30 }
 0x2cf   : > { %2691 = vrot.lane.b32.xlu1 %v1635_v52, %s5801_s25 }
 0x2d0   : > { %v1625_v16 = vmax.f32 %v1613_v1, 0.0 }
 0x2d3   : > { %3263 = vrot.lane.b32.xlu1 %v7730_v49, %s5801_s25 }
 0x2d7   : > { %v5626_v17 = vpop.permute.xlu0 %5625 }
 0x2d8   : > { %v5628_v7 = vunpack.i.h.bf16 %v5626_v17  ;;  %v5627_v60 = vunpack.i.l.bf16 %v5626_v17  ;;  %v501_v17 = vld [vmem:[%s8685_s3 + $0x258] sm:$0xff] }
 0x2d9   : > { %v4757_v8 = vpack.c.bf16 %v501_v17, %v499_v47 }
 0x2da   : > { %v2704_v55 = vsel %vm2703_vm9, %v1625_v16, %v5627_v60  ;;  %v3277_v34 = vsel %vm2703_vm9, %v8934_v14, %v5628_v7 }
 0x2db   : > { %v1574_v27 = vpop.permute.xlu0 %1573 }
 0x2df   : > { %v2061_v43 = vpop.permute.xlu0 %2060 }
 0x2e3   : > { %v7758_v42 = vpop.permute.xlu0 %2523 }
 0x2e7   : > { %v7762_v57 = vpop.permute.xlu0 %5635 }
 0x2eb   : > { %v7764_v29 = vpop.permute.xlu0 %5645  ;;  %v7772_v48 = vpop.permute.xlu1 %5630 }
 0x2ec   : > { %v5633_v50 = vunpack.i.h.bf16 %v7772_v48  ;;  %v5632_v62 = vunpack.i.l.bf16 %v7772_v48 }
 0x2ee   : > { %v2712_v52 = vsel %vm847_vm7, %v5627_v60, %v5632_v62  ;;  %v3285_v3 = vsel %vm847_vm7, %v5628_v7, %v5633_v50  ;;  %v502_v60 = vld [vmem:[%s8685_s3 + $0x260] sm:$0xff] }
 0x2ef   : > { %v7785_v10 = vpop.permute.xlu0 %2681  ;;  %v1576_v36 = vpop.permute.xlu1 %1575  ;;  %2831 = vmatprep.mubr.f32.mxu0 %v2712_v52  ;;  %3389 = vmatprep.mubr.f32.mxu1 %v3285_v3  ;;  %v5638_v3 = vunpack.i.h.bf16 %v7762_v57 }
 0x2f0   : > { %v1588_v18 = vsel %vm1113_vm8, %v1574_v27, %v1576_v36  ;;  %2832 = vmatmul.mubr.f32.vlgmr.msra.gmra.mrb[48].mxu0 %v2704_v55  ;;  %3390 = vmatmul.mubr.f32.vlgmr.msra.gmra.mrb[48].mxu1 %v3277_v34  ;;  %v500_v27 = vld [vmem:[%s8685_s3 + $0x250] sm:$0xff]  ;;  %v513_v55 = vld [vmem:[%s8685_s3 + $0x2b8] sm:$0xff] }
 0x2f1   : > { %v1612_v20 = vmax.f32 %v7474_v21, %v1588_v18  ;;  %4752 = vmatpush1.bf16.msra.mxu0 %v4751_v11  ;;  %4900 = vmatpush1.bf16.msra.mxu1 %v4751_v11  ;;  %v503_v21 = vld [vmem:[%s8685_s3 + $0x268] sm:$0xff]  ;;  %v4759_v1 = vpack.c.bf16 %v500_v27, %v498_v13  ;;  %v509_v11 = vld [vmem:[%s8685_s3 + $0x298] sm:$0xff] }
 0x2f2   : > { %4754 = vmatprep.subr.bf16.mxu0 %v4753_v35  ;;  %4902 = vmatprep.subr.bf16.mxu1 %v4753_v35  ;;  %v4761_v7 = vpack.c.bf16 %v505_v4, %v503_v21  ;;  %v5637_v35 = vunpack.i.l.bf16 %v7762_v57  ;;  %v511_v57 = vld [vmem:[%s8685_s3 + $0x2a8] sm:$0xff]  ;;  %v517_v27 = vld [vmem:[%s8685_s3 + $0x2d8] sm:$0xff]  ;;  %v514_v4 = vld [vmem:[%s8685_s3 + $0x2c0] sm:$0xff] }
 0x2f3   : > { %v7812_v41 = vpop.permute.xlu0 %5650  ;;  %v1624_v23 = vmax.f32 %v1149_v39, %v1612_v20  ;;  %v2063_v30 = vpop.permute.xlu1 %2062  ;;  %v4769_v33 = vpack.c.bf16 %v513_v55, %v511_v57  ;;  %v510_v39 = vld [vmem:[%s8685_s3 + $0x2a0] sm:$0xff]  ;;  %v512_v20 = vld [vmem:[%s8685_s3 + $0x2b0] sm:$0xff]  ;;  %v515_v13 = vld [vmem:[%s8685_s3 + $0x2c8] sm:$0xff] }
 0x2f4   : > { %v2075_v5 = vsel %vm1113_vm8, %v2061_v43, %v2063_v30  ;;  %v507_v43 = vld [vmem:[%s8685_s3 + $0x288] sm:$0xff]  ;;  %v1115_v17 = vsel %vm1113_vm8, %v5637_v35, %v5638_v3  ;;  %v4771_v21 = vpack.c.bf16 %v512_v20, %v510_v39  ;;  %v5647_v3 = vunpack.i.l.bf16 %v7764_v29  ;;  %v524_v57 = vld [vmem:[%s8685_s3 + $0x310] sm:$0xff] }
 0x2f5   : > { %v1636_v54 = vmax.f32 %v1624_v23, 0.0  ;;  %4756 = vmatpush1.bf16.msra.mxu0 %v4755_v2  ;;  %4904 = vmatpush1.bf16.msra.mxu1 %v4755_v2  ;;  %v2099_v26 = vmax.f32 %v7495_v51, %v2075_v5  ;;  %v4765_v40 = vpack.c.bf16 %v509_v11, %v507_v43  ;;  %v508_v51 = vld [vmem:[%s8685_s3 + $0x290] sm:$0xff]  ;;  %v1139_v30 = vmax.f32 %v7522_v28, %v1115_v17  ;;  %v519_v28 = vld [vmem:[%s8685_s3 + $0x2e8] sm:$0xff] }
 0x2f6   : > { %4758 = vmatprep.subr.bf16.mxu0 %v4757_v8  ;;  %4906 = vmatprep.subr.bf16.mxu1 %v4757_v8  ;;  %v520_v43 = vld [vmem:[%s8685_s3 + $0x2f0] sm:$0xff]  ;;  %v5648_v11 = vunpack.i.h.bf16 %v7764_v29  ;;  %v522_v29 = vld [vmem:[%s8685_s3 + $0x300] sm:$0xff]  ;;  %v5653_v39 = vunpack.i.h.bf16 %v7812_v41  ;;  %v5652_v20 = vunpack.i.l.bf16 %v7812_v41 }
 0x2f7   : > { %v7827_v59 = vpop.permute.xlu0 %5655  ;;  %v5749_v25 = vpack.i.bf16 %v1636_v54, %v7730_v49  ;;  %v2526_v16 = vpop.permute.xlu1 %2525  ;;  %2693 = vrot.lane.b32.xlu0 %v1636_v54, %s5801_s25  ;;  %v4763_v49 = vpack.c.bf16 %v504_v6, %v502_v60  ;;  %v516_v54 = vld [vmem:[%s8685_s3 + $0x2d0] sm:$0xff] }
 0x2f8   : > { %v2538_v0 = vsel %vm1113_vm8, %v7758_v42, %v2526_v16  ;;  %v506_v42 = vld [vmem:[%s8685_s3 + $0x280] sm:$0xff]  ;;  %v4775_v60 = vpack.c.bf16 %v516_v54, %v514_v4 }
 0x2f9   : > { %v2562_v52 = vmax.f32 %v7518_v37, %v2538_v0  ;;  %5750 = vrot.lane.b32.xlu1 %v5749_v25, %s5802_s11  ;;  %4760 = vmatpush1.bf16.msra.mxu0 %v4759_v1  ;;  %v4767_v47 = vpack.c.bf16 %v508_v51, %v506_v42  ;;  %v518_v16 = vld [vmem:[%s8685_s3 + $0x2e0] sm:$0xff] }
 0x2fa   : > { %4908 = vmatpush1.bf16.msra.mxu1 %v4759_v1  ;;  %4762 = vmatprep.subr.bf16.mxu0 %v4761_v7  ;;  %v4779_v42 = vpack.c.bf16 %v520_v43, %v518_v16  ;;  %v2706_v43 = vsel %vm2703_vm9, %v7447_v61, %v5652_v20 }
 0x2fb   : > { %v7850_v9 = vpop.permute.xlu0 %5665  ;;  %v2574_v37 = vmax.f32 %v2099_v26, %v2562_v52  ;;  %v5641_v36 = vpop.permute.xlu1 %5640  ;;  %4910 = vmatprep.subr.bf16.mxu1 %v4761_v7  ;;  %v521_v7 = vld [vmem:[%s8685_s3 + $0x2f8] sm:$0xff]  ;;  %v523_v52 = vld [vmem:[%s8685_s3 + $0x308] sm:$0xff] }
 0x2fc   : > { %v5643_v45 = vunpack.i.h.bf16 %v5641_v36  ;;  %v5642_v14 = vunpack.i.l.bf16 %v5641_v36  ;;  %v4777_v25 = vpack.c.bf16 %v521_v7, %v519_v28  ;;  %v530_v28 = vld [vmem:[%s8685_s3 + $0x340] sm:$0xff]  ;;  %v532_v7 = vld [vmem:[%s8685_s3 + $0x350] sm:$0xff] }
 0x2fd   : > { %v2586_v34 = vmax.f32 %v2574_v37, 0.0  ;;  %4764 = vmatpush1.bf16.msra.mxu0 %v4763_v49  ;;  %v4791_v61 = vpack.c.bf16 %v532_v7, %v530_v28  ;;  %v542_v28 = vld [vmem:[%s8685_s3 + $0x3a0] sm:$0xff]  ;;  %v544_v7 = vld [vmem:[%s8685_s3 + $0x3b0] sm:$0xff] }
 0x2fe   : > { %v1578_v18 = vsel %vm1113_vm8, %v5642_v14, %v5643_v45  ;;  %4912 = vmatpush1.bf16.msra.mxu1 %v4763_v49  ;;  %4766 = vmatprep.subr.bf16.mxu0 %v4765_v40  ;;  %v525_v49 = vld [vmem:[%s8685_s3 + $0x318] sm:$0xff]  ;;  %v3278_v14 = vsel %vm2703_vm9, %v2576_v24, %v5648_v11  ;;  %v526_v24 = vld [vmem:[%s8685_s3 + $0x320] sm:$0xff] }
 0x2ff   : > { %v1602_v2 = vmax.f32 %v7607_v31, %v1578_v18  ;;  %v7873_v8 = vpop.permute.xlu1 %2679  ;;  %3267 = vrot.lane.b32.xlu1 %v2586_v34, %s5801_s25  ;;  %4914 = vmatprep.subr.bf16.mxu1 %v4765_v40  ;;  %v7882_v23 = vpop.permute.xlu0 %5680  ;;  %v4773_v31 = vpack.c.bf16 %v517_v27, %v515_v13  ;;  %v4781_v36 = vpack.c.bf16 %v525_v49, %v523_v52  ;;  %v527_v34 = vld [vmem:[%s8685_s3 + $0x328] sm:$0xff]  ;;  %v533_v27 = vld [vmem:[%s8685_s3 + $0x358] sm:$0xff] }
 0x300   : > { %v4783_v18 = vpack.c.bf16 %v524_v57, %v522_v29  ;;  %v531_v13 = vld [vmem:[%s8685_s3 + $0x348] sm:$0xff]  ;;  %v537_v52 = vld [vmem:[%s8685_s3 + $0x378] sm:$0xff] }
 0x301   : > { %4768 = vmatpush1.bf16.msra.mxu0 %v4767_v47  ;;  %v1614_v5 = vmax.f32 %v1139_v30, %v1602_v2 }
 0x302   : > { %4916 = vmatpush1.bf16.msra.mxu1 %v4767_v47  ;;  %4770 = vmatprep.subr.bf16.mxu0 %v4769_v33  ;;  %v529_v47 = vld [vmem:[%s8685_s3 + $0x338] sm:$0xff] }
 0x303   : > { %v7891_v1 = vpop.permute.xlu1 %2683  ;;  %4918 = vmatprep.subr.bf16.mxu1 %v4769_v33  ;;  %v7899_v6 = vpop.permute.xlu0 %3253  ;;  %v1626_v26 = vmax.f32 %v1614_v5, 0.0  ;;  %v4785_v22 = vpack.c.bf16 %v529_v47, %v527_v34  ;;  %v528_v33 = vld [vmem:[%s8685_s3 + $0x330] sm:$0xff]  ;;  %v4789_v5 = vpack.c.bf16 %v533_v27, %v531_v13 }
 0x305   : > { %4772 = vmatpush1.bf16.msra.mxu0 %v4771_v21  ;;  %v2705_v45 = vsel %vm2703_vm9, %v1626_v26, %v5647_v3  ;;  %v535_v26 = vld [vmem:[%s8685_s3 + $0x368] sm:$0xff] }
 0x306   : > { %4920 = vmatpush1.bf16.msra.mxu1 %v4771_v21  ;;  %4774 = vmatprep.subr.bf16.mxu0 %v4773_v31 }
 0x307   : > { %v7908_v0 = vpop.permute.xlu1 %5660  ;;  %4922 = vmatprep.subr.bf16.mxu1 %v4773_v31  ;;  %v7943_v17 = vpop.permute.xlu0 %5685  ;;  %v4787_v31 = vpack.c.bf16 %v528_v33, %v526_v24  ;;  %v5682_v24 = vunpack.i.l.bf16 %v7882_v23 }
 0x308   : > { %v5663_v35 = vunpack.i.h.bf16 %v7908_v0  ;;  %v5662_v40 = vunpack.i.l.bf16 %v7908_v0 }
 0x309   : > { %4776 = vmatpush1.bf16.msra.mxu0 %v4775_v60 }
 0x30a   : > { %v2713_v51 = vsel %vm847_vm7, %v5647_v3, %v5662_v40  ;;  %v3286_v37 = vsel %vm847_vm7, %v5648_v11, %v5663_v35  ;;  %4924 = vmatpush1.bf16.msra.mxu1 %v4775_v60  ;;  %4778 = vmatprep.subr.bf16.mxu0 %v4777_v25  ;;  %v5668_v60 = vunpack.i.h.bf16 %v7850_v9  ;;  %v3279_v11 = vsel %vm2703_vm9, %v7560_v32, %v5653_v39 }
 0x30b   : > { %v7931_v55 = vpop.permute.xlu1 %5670  ;;  %2837 = vmatprep.mubr.f32.mxu0 %v2713_v51  ;;  %3395 = vmatprep.mubr.f32.mxu1 %v3286_v37  ;;  %v7963_v4 = vpop.permute.xlu0 %5695  ;;  %v534_v51 = vld [vmem:[%s8685_s3 + $0x360] sm:$0xff]  ;;  %v536_v37 = vld [vmem:[%s8685_s3 + $0x370] sm:$0xff] }
 0x30c   : > { %2838 = vmatmul.mubr.f32.gmra.mrb[50].mxu0 %v2705_v45  ;;  %3396 = vmatmul.mubr.f32.gmra.mrb[50].mxu1 %v3278_v14  ;;  %v3280_v57 = vsel %vm2703_vm9, %v7603_v12, %v5668_v60  ;;  %v539_v45 = vld [vmem:[%s8685_s3 + $0x388] sm:$0xff]  ;;  %v541_v14 = vld [vmem:[%s8685_s3 + $0x398] sm:$0xff]  ;;  %v4795_v47 = vpack.c.bf16 %v536_v37, %v534_v51  ;;  %v538_v12 = vld [vmem:[%s8685_s3 + $0x380] sm:$0xff] }
 0x30d   : > { %4926 = vmatprep.subr.bf16.mxu1 %v4777_v25  ;;  %4780 = vmatpush1.bf16.msra.mxu0 %v4779_v42  ;;  %v5667_v25 = vunpack.i.l.bf16 %v7850_v9  ;;  %v546_v37 = vld [vmem:[%s8685_s3 + $0x3c0] sm:$0xff] }
 0x30e   : > { %4928 = vmatpush1.bf16.msra.mxu1 %v4779_v42  ;;  %4782 = vmatprep.subr.bf16.mxu0 %v4781_v36  ;;  %v4793_v42 = vpack.c.bf16 %v537_v52, %v535_v26  ;;  %v547_v52 = vld [vmem:[%s8685_s3 + $0x3c8] sm:$0xff] }
 0x30f   : > { %v7953_v2 = vpop.permute.xlu1 %5675  ;;  %4930 = vmatprep.subr.bf16.mxu1 %v4781_v36  ;;  %v2707_v29 = vsel %vm2703_vm9, %v7555_v53, %v5667_v25  ;;  %v8017_v34 = vpop.permute.xlu0 %5705  ;;  %v4797_v53 = vpack.c.bf16 %v541_v14, %v539_v45 }
 0x310   : > { %v5678_v30 = vunpack.i.h.bf16 %v7953_v2  ;;  %v5677_v21 = vunpack.i.l.bf16 %v7953_v2  ;;  %v5707_v45 = vunpack.i.l.bf16 %v8017_v34 }
 0x311   : > { %4784 = vmatpush1.bf16.msra.mxu0 %v4783_v18 }
 0x312   : > { %v2714_v41 = vsel %vm847_vm7, %v5652_v20, %v5677_v21  ;;  %v3287_v54 = vsel %vm847_vm7, %v5653_v39, %v5678_v30  ;;  %4932 = vmatpush1.bf16.msra.mxu1 %v4783_v18  ;;  %4786 = vmatprep.subr.bf16.mxu0 %v4785_v22  ;;  %v540_v18 = vld [vmem:[%s8685_s3 + $0x390] sm:$0xff]  ;;  %v543_v39 = vld [vmem:[%s8685_s3 + $0x3a8] sm:$0xff]  ;;  %v545_v20 = vld [vmem:[%s8685_s3 + $0x3b8] sm:$0xff] }
 0x313   : > { %v7979_v16 = vpop.permute.xlu1 %5690  ;;  %2843 = vmatprep.mubr.f32.mxu0 %v2714_v41  ;;  %3401 = vmatprep.mubr.f32.mxu1 %v3287_v54  ;;  %v4799_v41 = vpack.c.bf16 %v540_v18, %v538_v12  ;;  %v551_v12 = vld [vmem:[%s8685_s3 + $0x3e8] sm:$0xff]  ;;  %v553_v18 = vld [vmem:[%s8685_s3 + $0x3f8] sm:$0xff] }
 0x314   : > { %v5693_v9 = vunpack.i.h.bf16 %v7979_v16  ;;  %v5692_v49 = vunpack.i.l.bf16 %v7979_v16  ;;  %2844 = vmatmul.mubr.f32.gmra.mrb[52].mxu0 %v2706_v43  ;;  %3402 = vmatmul.mubr.f32.gmra.mrb[52].mxu1 %v3279_v11  ;;  %v2708_v11 = vsel %vm2703_vm9, %v7577_v56, %v5682_v24  ;;  %v4803_v56 = vpack.c.bf16 %v544_v7, %v542_v28  ;;  %v557_v28 = vld [vmem:[%s8685_s3 + $0x418] sm:$0xff] }
 0x315   : > { %4934 = vmatprep.subr.bf16.mxu1 %v4785_v22  ;;  %4788 = vmatpush1.bf16.msra.mxu0 %v4787_v31  ;;  %v5683_v22 = vunpack.i.h.bf16 %v7882_v23 }
 0x316   : > { %v2715_v32 = vsel %vm847_vm7, %v5667_v25, %v5692_v49  ;;  %v3288_v3 = vsel %vm847_vm7, %v5668_v60, %v5693_v9  ;;  %4936 = vmatpush1.bf16.msra.mxu1 %v4787_v31  ;;  %4790 = vmatprep.subr.bf16.mxu0 %v4789_v5  ;;  %v5698_v60 = vunpack.i.h.bf16 %v7963_v4  ;;  %v5697_v25 = vunpack.i.l.bf16 %v7963_v4 }
 0x317   : > { %v8005_v36 = vpop.permute.xlu1 %3255  ;;  %2849 = vmatprep.mubr.f32.mxu0 %v2715_v32  ;;  %3407 = vmatprep.mubr.f32.mxu1 %v3288_v3  ;;  %v3281_v26 = vsel %vm2703_vm9, %v7613_v19, %v5683_v22 }
 0x318   : > { %2850 = vmatmul.mubr.f32.gmra.mrb[54].mxu0 %v2707_v29  ;;  %3408 = vmatmul.mubr.f32.gmra.mrb[54].mxu1 %v3280_v57  ;;  %v548_v29 = vld [vmem:[%s8685_s3 + $0x3d0] sm:$0xff]  ;;  %v5708_v57 = vunpack.i.h.bf16 %v8017_v34 }
 0x319   : > { %4938 = vmatprep.subr.bf16.mxu1 %v4789_v5  ;;  %4792 = vmatpush1.bf16.msra.mxu0 %v4791_v61  ;;  %v8035_v13 = vpop.permute.xlu0 %5715  ;;  %v4801_v5 = vpack.c.bf16 %v545_v20, %v543_v39  ;;  %v4809_v39 = vpack.c.bf16 %v553_v18, %v551_v12  ;;  %v550_v20 = vld [vmem:[%s8685_s3 + $0x3e0] sm:$0xff]  ;;  %v5673_v12 = vunpack.i.h.bf16 %v7931_v55 }
 0x31a   : > { %4940 = vmatpush1.bf16.msra.mxu1 %v4791_v61  ;;  %4794 = vmatprep.subr.bf16.mxu0 %v4793_v42  ;;  %v549_v61 = vld [vmem:[%s8685_s3 + $0x3d8] sm:$0xff] }
 0x31b   : > { %v8027_v33 = vpop.permute.xlu1 %5700  ;;  %4942 = vmatprep.subr.bf16.mxu1 %v4793_v42  ;;  %v4805_v51 = vpack.c.bf16 %v549_v61, %v547_v52  ;;  %v3302_v48 = vsel %vm2729_vm10, %v5673_v12, %v8005_v36 }
 0x31c   : > { %v5703_v27 = vunpack.i.h.bf16 %v8027_v33  ;;  %v5702_v31 = vunpack.i.l.bf16 %v8027_v33 }
 0x31d   : > { %4796 = vmatpush1.bf16.msra.mxu0 %v4795_v47  ;;  %v8067_v3 = vpop.permute.xlu0 %3257 }
 0x31e   : > { %v2716_v23 = vsel %vm847_vm7, %v5682_v24, %v5702_v31  ;;  %v3289_v54 = vsel %vm847_vm7, %v5683_v22, %v5703_v27  ;;  %4944 = vmatpush1.bf16.msra.mxu1 %v4795_v47  ;;  %4798 = vmatprep.subr.bf16.mxu0 %v4797_v53  ;;  %v2709_v47 = vsel %vm2703_vm9, %v7572_v63, %v5697_v25 }
 0x31f   : > { %v8053_v43 = vpop.permute.xlu1 %5710  ;;  %2855 = vmatprep.mubr.f32.mxu0 %v2716_v23  ;;  %3413 = vmatprep.mubr.f32.mxu1 %v3289_v54  ;;  %v4807_v63 = vpack.c.bf16 %v548_v29, %v546_v37  ;;  %v2710_v23 = vsel %vm2703_vm9, %v7618_v44, %v5707_v45  ;;  %v3283_v54 = vsel %vm2703_vm9, %v7675_v46, %v5708_v57  ;;  %v5718_v46 = vunpack.i.h.bf16 %v8035_v13 }
 0x320   : > { %v5713_v4 = vunpack.i.h.bf16 %v8053_v43  ;;  %v5712_v32 = vunpack.i.l.bf16 %v8053_v43  ;;  %2856 = vmatmul.mubr.f32.gmra.mrb[56].mxu0 %v2708_v11  ;;  %3414 = vmatmul.mubr.f32.gmra.mrb[56].mxu1 %v3281_v26 }
 0x321   : > { %4946 = vmatprep.subr.bf16.mxu1 %v4797_v53  ;;  %4800 = vmatpush1.bf16.msra.mxu0 %v4799_v41  ;;  %v3282_v53 = vsel %vm2703_vm9, %v7652_v38, %v5698_v60  ;;  %v8119_v7 = vpop.permute.xlu0 %2685  ;;  %v3284_v29 = vsel %vm2703_vm9, %v7695_v58, %v5718_v46  ;;  %v559_v58 = vld [vmem:[%s8685_s3 + $0x428] sm:$0xff] }
 0x322   : > { %v2717_v19 = vsel %vm847_vm7, %v5697_v25, %v5712_v32  ;;  %v3290_v42 = vsel %vm847_vm7, %v5698_v60, %v5713_v4  ;;  %4948 = vmatpush1.bf16.msra.mxu1 %v4799_v41  ;;  %4802 = vmatprep.subr.bf16.mxu0 %v4801_v5  ;;  %v552_v41 = vld [vmem:[%s8685_s3 + $0x3f0] sm:$0xff]  ;;  %v5717_v25 = vunpack.i.l.bf16 %v8035_v13 }
 0x323   : > { %v8083_v14 = vpop.permute.xlu1 %5720  ;;  %2861 = vmatprep.mubr.f32.mxu0 %v2717_v19  ;;  %3419 = vmatprep.mubr.f32.mxu1 %v3290_v42  ;;  %v4811_v60 = vpack.c.bf16 %v552_v41, %v550_v20  ;;  %v5657_v19 = vunpack.i.l.bf16 %v7827_v59  ;;  %v558_v41 = vld [vmem:[%s8685_s3 + $0x420] sm:$0xff] }
 0x324   : > { %v5723_v34 = vunpack.i.h.bf16 %v8083_v14  ;;  %v5722_v22 = vunpack.i.l.bf16 %v8083_v14  ;;  %2862 = vmatmul.mubr.f32.gmra.mrb[58].mxu0 %v2709_v47  ;;  %3420 = vmatmul.mubr.f32.gmra.mrb[58].mxu1 %v3282_v53  ;;  %v2711_v37 = vsel %vm2703_vm9, %v7657_v15, %v5717_v25  ;;  %v561_v53 = vld [vmem:[%s8685_s3 + $0x438] sm:$0xff] }
 0x325   : > { %4950 = vmatprep.subr.bf16.mxu1 %v4801_v5  ;;  %4804 = vmatpush1.bf16.msra.mxu0 %v4803_v56  ;;  %v555_v5 = vld [vmem:[%s8685_s3 + $0x408] sm:$0xff]  ;;  %v8127_v61 = vpop.permute.xlu0 %5735  ;;  %v2730_v47 = vsel %vm2729_vm10, %v5657_v19, %v7873_v8  ;;  %v4817_v20 = vpack.c.bf16 %v561_v53, %v559_v58  ;;  %v573_v58 = vld [vmem:[%s8685_s3 + $0x498] sm:$0xff] }
 0x326   : > { %v2718_v38 = vsel %vm847_vm7, %v5707_v45, %v5722_v22  ;;  %v3291_v24 = vsel %vm847_vm7, %v5708_v57, %v5723_v34  ;;  %4952 = vmatpush1.bf16.msra.mxu1 %v4803_v56  ;;  %4806 = vmatprep.subr.bf16.mxu0 %v4805_v51  ;;  %v4813_v44 = vpack.c.bf16 %v557_v28, %v555_v5  ;;  %v5658_v56 = vunpack.i.h.bf16 %v7827_v59  ;;  %v554_v59 = vld [vmem:[%s8685_s3 + $0x400] sm:$0xff]  ;;  %v556_v57 = vld [vmem:[%s8685_s3 + $0x410] sm:$0xff] }
 0x327   : > { %2867 = vmatprep.mubr.f32.mxu0 %v2718_v38  ;;  %3425 = vmatprep.mubr.f32.mxu1 %v3291_v24  ;;  %v5672_v45 = vunpack.i.l.bf16 %v7931_v55  ;;  %v4815_v18 = vpack.c.bf16 %v556_v57, %v554_v59  ;;  %v2721_v24 = vsel %vm2720_vm11, %v5632_v62, %v5657_v19  ;;  %v560_v55 = vld [vmem:[%s8685_s3 + $0x430] sm:$0xff]  ;;  %v5688_v5 = vunpack.i.h.bf16 %v7943_v17 }
 0x328   : > { %2868 = vmatmul.mubr.f32.gmra.mrb[60].mxu0 %v2710_v23  ;;  %3426 = vmatmul.mubr.f32.gmra.mrb[60].mxu1 %v3283_v54  ;;  %v3301_v15 = vsel %vm2729_vm10, %v5658_v56, %v7899_v6  ;;  %v5687_v23 = vunpack.i.l.bf16 %v7943_v17  ;;  %v565_v54 = vld [vmem:[%s8685_s3 + $0x458] sm:$0xff]  ;;  %v4819_v28 = vpack.c.bf16 %v560_v55, %v558_v41  ;;  %v564_v17 = vld [vmem:[%s8685_s3 + $0x450] sm:$0xff]  ;;  %v5738_v53 = vunpack.i.h.bf16 %v8127_v61 }
 0x329   : > { %4954 = vmatprep.subr.bf16.mxu1 %v4805_v51  ;;  %4808 = vmatpush1.bf16.msra.mxu0 %v4807_v63  ;;  %v2731_v62 = vsel %vm2729_vm10, %v5672_v45, %v7785_v10 }
 0x32a   : > { %4956 = vmatpush1.bf16.msra.mxu1 %v4807_v63  ;;  %4810 = vmatprep.subr.bf16.mxu0 %v4809_v39  ;;  %v8161_v63 = vpop.permute.xlu0 %3261  ;;  %v2732_v0 = vsel %vm2729_vm10, %v5687_v23, %v7891_v1  ;;  %v2723_v57 = vsel %vm2720_vm11, %v5677_v21, %v5687_v23  ;;  %v572_v23 = vld [vmem:[%s8685_s3 + $0x490] sm:$0xff] }
 0x32b   : > { %4958 = vmatprep.subr.bf16.mxu1 %v4809_v39  ;;  %v3293_v39 = vsel %vm2720_vm11, %v5633_v50, %v5658_v56  ;;  %v563_v50 = vld [vmem:[%s8685_s3 + $0x448] sm:$0xff]  ;;  %v562_v56 = vld [vmem:[%s8685_s3 + $0x440] sm:$0xff]  ;;  %v3305_v16 = vsel %vm2729_vm10, %v5738_v53, %v8161_v63 }
 0x32d   : > { %v8123_v11 = vpop.permute.xlu1 %5725  ;;  %4812 = vmatpush1.bf16.msra.mxu0 %v4811_v60 }
 0x32e   : > { %v5728_v26 = vunpack.i.h.bf16 %v8123_v11  ;;  %v5727_v52 = vunpack.i.l.bf16 %v8123_v11  ;;  %4960 = vmatpush1.bf16.msra.mxu1 %v4811_v60  ;;  %4814 = vmatprep.subr.bf16.mxu0 %v4813_v44 }
 0x32f   : > { %4962 = vmatprep.subr.bf16.mxu1 %v4813_v44  ;;  %v2722_v44 = vsel %vm2720_vm11, %v5662_v40, %v5672_v45  ;;  %v567_v40 = vld [vmem:[%s8685_s3 + $0x468] sm:$0xff]  ;;  %v3295_v45 = vsel %vm2720_vm11, %v5678_v30, %v5688_v5 }
 0x330   : > { %v2719_v13 = vsel %vm847_vm7, %v5717_v25, %v5727_v52  ;;  %v3292_v42 = vsel %vm847_vm7, %v5718_v46, %v5728_v26  ;;  %v3294_v46 = vsel %vm2720_vm11, %v5663_v35, %v5673_v12  ;;  %v4821_v25 = vpack.c.bf16 %v565_v54, %v563_v50  ;;  %v571_v30 = vld [vmem:[%s8685_s3 + $0x488] sm:$0xff] }
 0x331   : > { %v8137_v51 = vpop.permute.xlu1 %5730  ;;  %2873 = vmatprep.mubr.f32.mxu0 %v2719_v13  ;;  %3431 = vmatprep.mubr.f32.mxu1 %v3292_v42  ;;  %v3303_v35 = vsel %vm2729_vm10, %v5688_v5, %v8067_v3  ;;  %v569_v13 = vld [vmem:[%s8685_s3 + $0x478] sm:$0xff]  ;;  %v8214_v42 = vpop.permute.xlu0 %2689  ;;  %v5737_v12 = vunpack.i.l.bf16 %v8127_v61  ;;  %v4829_v55 = vpack.c.bf16 %v573_v58, %v571_v30  ;;  %v570_v61 = vld [vmem:[%s8685_s3 + $0x480] sm:$0xff]  ;;  %v3297_v5 = vsel %vm2720_vm11, %v5703_v27, %v5738_v53  ;;  %v597_v53 = vld [vmem:[%s8687_s5 + $0xa8] sm:$0xff] }
 0x332   : > { %2874 = vmatmul.mubr.f32.gmra.mrb[62].mxu0 %v2711_v37  ;;  %3432 = vmatmul.mubr.f32.gmra.mrb[62].mxu1 %v3284_v29  ;;  %v5732_v19 = vunpack.i.l.bf16 %v8137_v51  ;;  %v5733_v37 = vunpack.i.h.bf16 %v8137_v51  ;;  %v4823_v29 = vpack.c.bf16 %v564_v17, %v562_v56  ;;  %v568_v51 = vld [vmem:[%s8685_s3 + $0x470] sm:$0xff]  ;;  %v574_v17 = vld [vmem:[%s8685_s3 + $0x4a0] sm:$0xff] }
 0x333   : > { %2944 = vmatprep.mubr.f32.mxu0 %v2730_v47  ;;  %3502 = vmatprep.mubr.f32.mxu1 %v3301_v15  ;;  %v4825_v47 = vpack.c.bf16 %v569_v13, %v567_v40  ;;  %v566_v15 = vld [vmem:[%s8685_s3 + $0x460] sm:$0xff]  ;;  %v2725_v54 = vsel %vm2720_vm11, %v5702_v31, %v5737_v12 }
 0x334   : > { %v2733_v21 = vsel %vm2729_vm10, %v5732_v19, %v8119_v7  ;;  %v3296_v41 = vsel %vm2720_vm11, %v5693_v9, %v5733_v37  ;;  %v596_v58 = vld [vmem:[%s8687_s5 + $0xa0] sm:$0xff] }
 0x335   : > { %v8163_v38 = vpop.permute.xlu1 %3259 }
 0x336   : > { %2945 = vmatmul.mubr.f32.vlgmr.msra.gmra.mrb[48].mxu0 %v2721_v24  ;;  %3503 = vmatmul.mubr.f32.vlgmr.msra.gmra.mrb[48].mxu1 %v3293_v39  ;;  %v3304_v2 = vsel %vm2729_vm10, %v5733_v37, %v8163_v38  ;;  %v5746_v24 = vpop.permute.xlu0 %5745 }
 0x337   : > { %2950 = vmatprep.mubr.f32.mxu0 %v2731_v62  ;;  %3508 = vmatprep.mubr.f32.mxu1 %v3302_v48  ;;  %v4831_v48 = vpack.c.bf16 %v572_v23, %v570_v61  ;;  %v5748_v33 = vunpack.i.h.bf16 %v5746_v24  ;;  %v5747_v27 = vunpack.i.l.bf16 %v5746_v24 }
 0x338   : > { %4816 = vmatpush1.bf16.msra.mxu0 %v4815_v18  ;;  %4964 = vmatpush1.bf16.msra.mxu1 %v4815_v18  ;;  %v4827_v18 = vpack.c.bf16 %v568_v51, %v566_v15  ;;  %v587_v15 = vld [vmem:[%s8687_s5 + $0x58] sm:$0xff] }
 0x339   : > { %v8189_v60 = vpop.permute.xlu1 %2687  ;;  %4818 = vmatprep.subr.bf16.mxu0 %v4817_v20  ;;  %4966 = vmatprep.subr.bf16.mxu1 %v4817_v20  ;;  %v2724_v20 = vsel %vm2720_vm11, %v5692_v49, %v5732_v19  ;;  %v2727_v43 = vsel %vm2720_vm11, %v5722_v22, %v5747_v27  ;;  %v5803_v22 = vmov 0.0  }
 0x33a   : > { %2951 = vmatmul.mubr.f32.gmra.mrb[50].mxu0 %v2722_v44  ;;  %3509 = vmatmul.mubr.f32.gmra.mrb[50].mxu1 %v3294_v46  ;;  %v2734_v49 = vsel %vm2729_vm10, %v5737_v12, %v8189_v60  ;;  %v575_v46 = vld [vmem:[%s8685_s3 + $0x4a8] sm:$0xff] }
 0x33b   : > { %2956 = vmatprep.mubr.f32.mxu0 %v2732_v0  ;;  %3514 = vmatprep.mubr.f32.mxu1 %v3303_v35 }
 0x33c   : > { %4820 = vmatpush1.bf16.msra.mxu0 %v4819_v28  ;;  %4968 = vmatpush1.bf16.msra.mxu1 %v4819_v28 }
 0x33d   : > { %v5741_v59 = vpop.permute.xlu1 %5740  ;;  %4822 = vmatprep.subr.bf16.mxu0 %v4821_v25  ;;  %4970 = vmatprep.subr.bf16.mxu1 %v4821_v25  ;;  %v8274_v25 = vpop.permute.xlu0 %3265 }
 0x33e   : > { %2957 = vmatmul.mubr.f32.gmra.mrb[52].mxu0 %v2723_v57  ;;  %3515 = vmatmul.mubr.f32.gmra.mrb[52].mxu1 %v3295_v45  ;;  %v5742_v62 = vunpack.i.l.bf16 %v5741_v59  ;;  %v5743_v9 = vunpack.i.h.bf16 %v5741_v59  ;;  %v3307_v0 = vsel %vm2729_vm10, %v5748_v33, %v8274_v25 }
 0x33f   : > { %2962 = vmatprep.mubr.f32.mxu0 %v2733_v21  ;;  %3520 = vmatprep.mubr.f32.mxu1 %v3304_v2 }
 0x340   : > { %4824 = vmatpush1.bf16.msra.mxu0 %v4823_v29  ;;  %4972 = vmatpush1.bf16.msra.mxu1 %v4823_v29  ;;  %v2735_v28 = vsel %vm2729_vm10, %v5742_v62, %v8214_v42  ;;  %v2726_v31 = vsel %vm2720_vm11, %v5712_v32, %v5742_v62  ;;  %v3298_v56 = vsel %vm2720_vm11, %v5713_v4, %v5743_v9 }
 0x341   : > { %v8241_v39 = vpop.permute.xlu1 %2691  ;;  %4826 = vmatprep.subr.bf16.mxu0 %v4825_v47  ;;  %4974 = vmatprep.subr.bf16.mxu1 %v4825_v47  ;;  %v3299_v4 = vsel %vm2720_vm11, %v5723_v34, %v5748_v33  ;;  %v586_v47 = vld [vmem:[%s8687_s5 + $0x50] sm:$0xff] }
 0x342   : > { %2963 = vmatmul.mubr.f32.gmra.mrb[54].mxu0 %v2724_v20  ;;  %3521 = vmatmul.mubr.f32.gmra.mrb[54].mxu1 %v3296_v41  ;;  %v2736_v19 = vsel %vm2729_vm10, %v5747_v27, %v8241_v39  ;;  %v4981_v30 = vpack.c.bf16 %v587_v15, %v586_v47  ;;  %v588_v20 = vld [vmem:[%s8687_s5 + $0x60] sm:$0xff]  ;;  %v589_v41 = vld [vmem:[%s8687_s5 + $0x68] sm:$0xff]  ;;  %v598_v27 = vld [vmem:[%s8687_s5 + $0xb0] sm:$0xff] }
 0x343   : > { %2968 = vmatprep.mubr.f32.mxu0 %v2734_v49  ;;  %3526 = vmatprep.mubr.f32.mxu1 %v3305_v16  ;;  %v4985_v62 = vpack.c.bf16 %v589_v41, %v588_v20  ;;  %v576_v47 = vld [vmem:[%s8687_s5] sm:$0xff]  ;;  %v577_v15 = vld [vmem:[%s8687_s5 + $0x8] sm:$0xff] }
 0x344   : > { %4828 = vmatpush1.bf16.msra.mxu0 %v4827_v18  ;;  %4976 = vmatpush1.bf16.msra.mxu1 %v4827_v18  ;;  %v5021_v18 = vpack.c.bf16 %v597_v53, %v596_v58  ;;  %v603_v58 = vld [vmem:[%s8687_s5 + $0xd8] sm:$0xff]  ;;  %v8469_v53 = vpack.c.bf16 %v577_v15, %v576_v47 }
 0x345   : > { %v8259_v50 = vpop.permute.xlu1 %3263  ;;  %4830 = vmatprep.subr.bf16.mxu0 %v4829_v55  ;;  %4978 = vmatprep.subr.bf16.mxu1 %v4829_v55 }
 0x346   : > { %2969 = vmatmul.mubr.f32.gmra.mrb[56].mxu0 %v2725_v54  ;;  %3527 = vmatmul.mubr.f32.gmra.mrb[56].mxu1 %v3297_v5  ;;  %v3306_v44 = vsel %vm2729_vm10, %v5743_v9, %v8259_v50 }
 0x347   : > { %2974 = vmatprep.mubr.f32.mxu0 %v2735_v28  ;;  %3532 = vmatprep.mubr.f32.mxu1 %v3306_v44 }
 0x348   : > { %4832 = vmatpush1.bf16.msra.mxu0 %v4831_v48  ;;  %4980 = vmatpush1.bf16.msra.mxu1 %v4831_v48  ;;  %v590_v48 = vld [vmem:[%s8687_s5 + $0x70] sm:$0xff] }
 0x349   : > { %3013 = vmatprep.subr.mxu0 %v575_v46  ;;  %3571 = vmatprep.subr.mxu1 %v575_v46 }
 0x34a   : > { %2975 = vmatmul.mubr.f32.gmra.mrb[58].mxu0 %v2726_v31  ;;  %3533 = vmatmul.mubr.f32.gmra.mrb[58].mxu1 %v3298_v56  ;;  %v599_v31 = vld [vmem:[%s8687_s5 + $0xb8] sm:$0xff]  ;;  %v592_v56 = vld [vmem:[%s8687_s5 + $0x80] sm:$0xff] }
 0x34b   : > { %2980 = vmatprep.mubr.f32.mxu0 %v2736_v19  ;;  %3538 = vmatprep.mubr.f32.mxu1 %v3307_v0 }
 0x34c   : > { %3014 = vmatpush1.msra.mxu0 %v574_v17  ;;  %3572 = vmatpush1.msra.mxu1 %v574_v17 }
 0x34d   : > { %4982 = vmatprep.subr.bf16.mxu1 %v4981_v30  ;;  %5022 = vmatprep.subr.bf16.mxu0 %v5021_v18 }
 0x34e   : > { %2981 = vmatmul.mubr.f32.gmra.mrb[60].mxu0 %v2727_v43  ;;  %3539 = vmatmul.mubr.f32.gmra.mrb[60].mxu1 %v3299_v4  ;;  %v5025_v43 = vpack.c.bf16 %v599_v31, %v598_v27  ;;  %v593_v4 = vld [vmem:[%s8687_s5 + $0x88] sm:$0xff] }
 0x369   : > { %v2694_v40 = vpop.permute.xlu0 %2693 }
 0x36b   : > { %v5751_v32 = vpop.permute.xlu1 %5750 }
 0x36c   : > { %v5752_v35 = vunpack.i.l.bf16 %v5751_v32  ;;  %v5753_v29 = vunpack.i.h.bf16 %v5751_v32 }
 0x36e   : > { %v2737_v13 = vsel %vm2729_vm10, %v5752_v35, %v2694_v40  ;;  %v2728_v37 = vsel %vm2720_vm11, %v5727_v52, %v5752_v35  ;;  %v3300_v34 = vsel %vm2720_vm11, %v5728_v26, %v5753_v29  ;;  %v4993_v35 = vpack.c.bf16 %v593_v4, %v592_v56 }
 0x36f   : > { %2986 = vmatprep.mubr.f32.mxu0 %v2737_v13 }
 0x370   : > { %2987 = vmatmul.mubr.f32.gmra.mrb[62].mxu0 %v2728_v37  ;;  %v594_v37 = vld [vmem:[%s8687_s5 + $0x90] sm:$0xff] }
 0x371   : > { %v3268_v59 = vpop.permute.xlu1 %3267  ;;  %3057 = vmatprep.mubr.f32.mxu0 %v5803_v22 }
 0x372   : > { %v3308_v14 = vsel %vm2729_vm10, %v5753_v29, %v3268_v59  ;;  %v595_v29 = vld [vmem:[%s8687_s5 + $0x98] sm:$0xff] }
 0x373   : > { %3544 = vmatprep.mubr.f32.mxu1 %v3308_v14 }
 0x374   : > { %4335 = vmatmul.mubr.msk.f32.vlgmr.msra.gmra.mrb[48].mxu0 %vm2750_vm12, %v7873_v8  ;;  %3545 = vmatmul.mubr.f32.gmra.mrb[62].mxu1 %v3300_v34  ;;  %v8936_v8 = vld [vmem:[#allocation7_spill] sm:$0xff]  ;;  %v4997_v34 = vpack.c.bf16 %v595_v29, %v594_v37 }
 0x375   : > { %3063 = vmatprep.mubr.f32.mxu0 %v5803_v22  ;;  %3615 = vmatprep.mubr.f32.mxu1 %v5803_v22 }
 0x376   : > { %5024 = vmatpush3.bf16.msra.mxu0 %v5021_v18 }
 0x377   : > { %5026 = vmatprep.subr.bf16.mxu0 %v5025_v43 }
 0x378   : > { %4336 = vmatmul.mubr.msk.f32.gmra.mrb[50].mxu0 %vm2750_vm12, %v7785_v10  ;;  %4343 = vmatmul.mubr.msk.f32.vlgmr.msra.gmra.mrb[48].mxu1 %vm2750_vm12, %v7899_v6  ;;  %v2738_v10 = vld [vmem:[%s8686_s4] sm:$0x3] }
 0x379   : > { %3069 = vmatprep.mubr.f32.mxu0 %v5803_v22  ;;  %3621 = vmatprep.mubr.f32.mxu1 %v5803_v22 }
 0x37a   : > { %4984 = vmatpush3.bf16.msra.mxu1 %v4981_v30  ;;  %5028 = vmatpush3.bf16.msra.mxu0 %v5025_v43  ;;  %v602_v30 = vld [vmem:[%s8687_s5 + $0xd0] sm:$0xff] }
 0x37b   : > { %4986 = vmatprep.subr.bf16.mxu1 %v4985_v62 }
 0x37c   : > { %4337 = vmatmul.mubr.msk.f32.gmra.mrb[52].mxu0 %vm2750_vm12, %v7891_v1  ;;  %4344 = vmatmul.mubr.msk.f32.gmra.mrb[50].mxu1 %vm2750_vm12, %v8005_v36  ;;  %v8937_v1 = vsub.s32 0, %v8936_v8  ;;  %v8938_v36 = vsub.s32 1, %v8936_v8 }
 0x37d   : > { %3075 = vmatprep.mubr.f32.mxu0 %v5803_v22  ;;  %3627 = vmatprep.mubr.f32.mxu1 %v5803_v22 }
 0x37e   : > { %v8338_v6 = vrot.slane %v2738_v10, %v8937_v1  ;;  %4988 = vmatpush3.bf16.msra.mxu1 %v4985_v62 }
 0x380   : > { %4338 = vmatmul.mubr.msk.f32.gmra.mrb[54].mxu0 %vm2750_vm12, %v8119_v7  ;;  %4345 = vmatmul.mubr.msk.f32.gmra.mrb[52].mxu1 %vm2750_vm12, %v8067_v3  ;;  %v8342_v3 = vrot.slane %v2738_v10, %v8938_v36  ;;  %v600_v36 = vld [vmem:[%s8687_s5 + $0xc0] sm:$0xff] }
 0x381   : > { %3081 = vmatprep.mubr.f32.mxu0 %v5803_v22  ;;  %3633 = vmatprep.mubr.f32.mxu1 %v5803_v22 }
 0x384   : > { %4339 = vmatmul.mubr.msk.f32.gmra.mrb[56].mxu0 %vm2750_vm12, %v8189_v60  ;;  %4346 = vmatmul.mubr.msk.f32.gmra.mrb[54].mxu1 %vm2750_vm12, %v8163_v38 }
 0x385   : > { %3087 = vmatprep.mubr.f32.mxu0 %v5803_v22  ;;  %3639 = vmatprep.mubr.f32.mxu1 %v5803_v22 }
 0x388   : > { %4340 = vmatmul.mubr.msk.f32.gmra.mrb[58].mxu0 %vm2750_vm12, %v8214_v42  ;;  %4347 = vmatmul.mubr.msk.f32.gmra.mrb[56].mxu1 %vm2750_vm12, %v8161_v63 }
 0x389   : > { %3093 = vmatprep.mubr.f32.mxu0 %v5803_v22  ;;  %3645 = vmatprep.mubr.f32.mxu1 %v5803_v22 }
 0x38c   : > { %4341 = vmatmul.mubr.msk.f32.gmra.mrb[60].mxu0 %vm2750_vm12, %v8241_v39  ;;  %4348 = vmatmul.mubr.msk.f32.gmra.mrb[58].mxu1 %vm2750_vm12, %v8259_v50  ;;  %v591_v50 = vld [vmem:[%s8687_s5 + $0x78] sm:$0xff] }
 0x38d   : > { %3099 = vmatprep.mubr.f32.mxu0 %v5803_v22  ;;  %3651 = vmatprep.mubr.f32.mxu1 %v5803_v22  ;;  %v4989_v44 = vpack.c.bf16 %v591_v50, %v590_v48  ;;  %v607_v48 = vld [vmem:[%s8687_s5 + $0xf8] sm:$0xff] }
 0x38f   : > { %4990 = vmatprep.subr.bf16.mxu1 %v4989_v44 }
 0x390   : > { %4342 = vmatmul.mubr.msk.f32.gmra.mrb[62].mxu0 %vm2750_vm12, %v2694_v40  ;;  %4349 = vmatmul.mubr.msk.f32.gmra.mrb[60].mxu1 %vm2750_vm12, %v8274_v25 }
 0x391   : > { %3657 = vmatprep.mubr.f32.mxu1 %v5803_v22  ;;  %4992 = vmatpush3.bf16.msra.mxu1 %v4989_v44 }
 0x392   : > { %4994 = vmatprep.subr.bf16.mxu1 %v4993_v35 }
 0x394   : > { %4350 = vmatmul.mubr.msk.f32.gmra.mrb[62].mxu1 %vm2750_vm12, %v3268_v59 }
 0x395   : > { %4996 = vmatpush3.bf16.msra.mxu1 %v4993_v35 }
 0x396   : > { %4998 = vmatprep.subr.bf16.mxu1 %v4997_v34 }
 0x399   : > { %5000 = vmatpush3.bf16.msra.mxu1 %v4997_v34 }
 0x39a   : > { %5002 = vmatprep.subr.bf16.mxu1 %v8469_v53 }
 0x447   : > { %v3059_v7 = vpop.f32.mrb[48].mxu0 }
 0x448   : > { %v8345_v11 = vadd.f32 %v3059_v7, %v8338_v6  ;;  %v3061_v26 = vpop.f32.mrb[49].mxu0  ;;  %v601_v7 = vld [vmem:[%s8687_s5 + $0xc8] sm:$0xff] }
 0x449   : > { %v5074_v52 = vadd.f32 %v3061_v26, %v8342_v3 }
 0x44a   : > { %3122 = vrot.lane.b32.xlu0 %v8345_v11, %s5804_s22 }
 0x44b   : > { %v8350_v63 = vpop.f32.mrb[50].mxu0  ;;  %v3617_v38 = vpop.f32.mrb[48].mxu1  ;;  %3124 = vrot.lane.b32.xlu1 %v5074_v52, %s5804_s22 }
 0x44c   : > { %v8353_v60 = vpop.f32.mrb[51].mxu0  ;;  %v3619_v42 = vpop.f32.mrb[49].mxu1  ;;  %v8385_v55 = vadd.f32 %v3617_v38, %v8338_v6 }
 0x44d   : > { %v5090_v49 = vadd.f32 %v3619_v42, %v8342_v3  ;;  %v5029_v42 = vpack.c.bf16 %v601_v7, %v600_v36 }
 0x44f   : > { %v3071_v57 = vpop.f32.mrb[52].mxu0  ;;  %v8355_v45 = vpop.f32.mrb[50].mxu1  ;;  %5030 = vmatprep.subr.bf16.mxu0 %v5029_v42 }
 0x450   : > { %v8364_v51 = vadd.f32 %v3071_v57, %v8338_v6  ;;  %v3073_v21 = vpop.f32.mrb[53].mxu0  ;;  %v8366_v2 = vpop.f32.mrb[51].mxu1  ;;  %5032 = vmatpush3.bf16.msra.mxu0 %v5029_v42 }
 0x451   : > { %v5078_v12 = vadd.f32 %v3073_v21, %v8342_v3  ;;  %v5092_v31 = vadd.f32 %v8366_v2, %v8342_v3 }
 0x452   : > { %3130 = vrot.lane.b32.xlu0 %v8364_v51, %s5804_s22 }
 0x453   : > { %v3077_v24 = vpop.f32.mrb[54].mxu0  ;;  %v3629_v39 = vpop.f32.mrb[52].mxu1  ;;  %3132 = vrot.lane.b32.xlu1 %v5078_v12, %s5804_s22 }
 0x454   : > { %v3079_v61 = vpop.f32.mrb[55].mxu0  ;;  %v3631_v23 = vpop.f32.mrb[53].mxu1  ;;  %v8400_v54 = vadd.f32 %v3077_v24, %v8338_v6  ;;  %v8436_v59 = vadd.f32 %v3629_v39, %v8338_v6  ;;  %v5033_v39 = vpack.c.bf16 %v603_v58, %v602_v30 }
 0x455   : > { %v5080_v46 = vadd.f32 %v3079_v61, %v8342_v3  ;;  %v5094_v10 = vadd.f32 %v3631_v23, %v8342_v3  ;;  %v604_v61 = vld [vmem:[%s8687_s5 + $0xe0] sm:$0xff]  ;;  %v605_v23 = vld [vmem:[%s8687_s5 + $0xe8] sm:$0xff] }
 0x456   : > { %3680 = vrot.lane.b32.xlu0 %v8385_v55, %s5804_s22  ;;  %5034 = vmatprep.subr.bf16.mxu0 %v5033_v39 }
 0x457   : > { %v3083_v16 = vpop.f32.mrb[56].mxu0  ;;  %v8390_v9 = vpop.f32.mrb[54].mxu1  ;;  %3682 = vrot.lane.b32.xlu1 %v5090_v49, %s5804_s22  ;;  %5036 = vmatpush3.bf16.msra.mxu0 %v5033_v39  ;;  %v5037_v49 = vpack.c.bf16 %v605_v23, %v604_v61  ;;  %v579_v39 = vld [vmem:[%s8687_s5 + $0x18] sm:$0xff] }
 0x458   : > { %v3085_v5 = vpop.f32.mrb[57].mxu0  ;;  %v3637_v28 = vpop.f32.mrb[55].mxu1  ;;  %v8418_v17 = vadd.f32 %v3083_v16, %v8338_v6  ;;  %v8473_v12 = vadd.f32 %v8390_v9, %v8338_v6  ;;  %v606_v9 = vld [vmem:[%s8687_s5 + $0xf0] sm:$0xff] }
 0x459   : > { %v5082_v32 = vadd.f32 %v3085_v5, %v8342_v3  ;;  %v5096_v20 = vadd.f32 %v3637_v28, %v8342_v3  ;;  %5038 = vmatprep.subr.bf16.mxu0 %v5037_v49  ;;  %v8507_v5 = vpack.c.bf16 %v607_v48, %v606_v9  ;;  %v580_v9 = vld [vmem:[%s8687_s5 + $0x20] sm:$0xff]  ;;  %v581_v48 = vld [vmem:[%s8687_s5 + $0x28] sm:$0xff] }
 0x45a   : > { %3134 = vrot.lane.b32.xlu0 %v8400_v54, %s5804_s22 }
 0x45b   : > { %v3089_v25 = vpop.f32.mrb[58].mxu0  ;;  %v8405_v33 = vpop.f32.mrb[56].mxu1  ;;  %3136 = vrot.lane.b32.xlu1 %v5080_v46, %s5804_s22  ;;  %5040 = vmatpush3.bf16.msra.mxu0 %v5037_v49 }
 0x45c   : > { %v3091_v19 = vpop.f32.mrb[59].mxu0  ;;  %v3643_v0 = vpop.f32.mrb[57].mxu1  ;;  %v8451_v26 = vadd.f32 %v3089_v25, %v8338_v6  ;;  %v8492_v62 = vadd.f32 %v8405_v33, %v8338_v6  ;;  %5042 = vmatprep.subr.bf16.mxu0 %v8507_v5  ;;  %v8524_v25 = vadd.f32 %v8350_v63, %v8338_v6  ;;  %v5076_v33 = vadd.f32 %v8353_v60, %v8342_v3 }
 0x45d   : > { %v5084_v57 = vadd.f32 %v3091_v19, %v8342_v3  ;;  %v5098_v16 = vadd.f32 %v3643_v0, %v8342_v3  ;;  %v8541_v63 = vadd.f32 %v8355_v45, %v8338_v6 }
 0x45e   : > { %3138 = vrot.lane.b32.xlu0 %v8418_v17, %s5804_s22 }
 0x45f   : > { %v3095_v40 = vpop.f32.mrb[60].mxu0  ;;  %v8426_v13 = vpop.f32.mrb[58].mxu1  ;;  %3140 = vrot.lane.b32.xlu1 %v5082_v32, %s5804_s22 }
 0x460   : > { %v3097_v22 = vpop.f32.mrb[61].mxu0  ;;  %v3649_v14 = vpop.f32.mrb[59].mxu1  ;;  %v8505_v50 = vadd.f32 %v3095_v40, %v8338_v6  ;;  %v8516_v44 = vadd.f32 %v8426_v13, %v8338_v6 }
 0x461   : > { %v5086_v28 = vadd.f32 %v3097_v22, %v8342_v3  ;;  %v5100_v46 = vadd.f32 %v3649_v14, %v8342_v3 }
 0x462   : > { %3688 = vrot.lane.b32.xlu0 %v8436_v59, %s5804_s22 }
 0x463   : > { %v3101_v8 = vpop.f32.mrb[62].mxu0  ;;  %v8441_v1 = vpop.f32.mrb[60].mxu1  ;;  %3690 = vrot.lane.b32.xlu1 %v5094_v10, %s5804_s22 }
 0x464   : > { %v3103_v52 = vpop.f32.mrb[63].mxu0  ;;  %v3655_v38 = vpop.f32.mrb[61].mxu1  ;;  %v8532_v27 = vadd.f32 %v3101_v8, %v8338_v6  ;;  %v8549_v56 = vadd.f32 %v8441_v1, %v8338_v6 }
 0x465   : > { %v5088_v60 = vadd.f32 %v3103_v52, %v8342_v3  ;;  %v5102_v2 = vadd.f32 %v3655_v38, %v8342_v3 }
 0x466   : > { %3142 = vrot.lane.b32.xlu0 %v8451_v26, %s5804_s22 }
 0x467   : > { %v3659_v21 = vpop.f32.mrb[62].mxu1  ;;  %3144 = vrot.lane.b32.xlu1 %v5084_v57, %s5804_s22 }
 0x468   : > { %v8476_v18 = vadd.f32 %v3659_v21, %v8338_v6  ;;  %v3661_v24 = vpop.f32.mrb[63].mxu1 }
 0x469   : > { %v5104_v41 = vadd.f32 %v3661_v24, %v8342_v3 }
 0x46a   : > { %3692 = vrot.lane.b32.xlu0 %v8473_v12, %s5804_s22 }
 0x46b   : > { %3694 = vrot.lane.b32.xlu1 %v5096_v20, %s5804_s22 }
 0x46e   : > { %3696 = vrot.lane.b32.xlu0 %v8492_v62, %s5804_s22 }
 0x46f   : > { %3698 = vrot.lane.b32.xlu1 %v5098_v16, %s5804_s22 }
 0x472   : > { %3146 = vrot.lane.b32.xlu0 %v8505_v50, %s5804_s22 }
 0x473   : > { %3148 = vrot.lane.b32.xlu1 %v5086_v28, %s5804_s22 }
 0x476   : > { %3700 = vrot.lane.b32.xlu0 %v8516_v44, %s5804_s22 }
 0x477   : > { %3702 = vrot.lane.b32.xlu1 %v5100_v46, %s5804_s22 }
 0x47a   : > { %3126 = vrot.lane.b32.xlu0 %v8524_v25, %s5804_s22 }
 0x47b   : > { %3128 = vrot.lane.b32.xlu1 %v5076_v33, %s5804_s22 }
 0x47e   : > { %3150 = vrot.lane.b32.xlu0 %v8532_v27, %s5804_s22 }
 0x47f   : > { %3686 = vrot.lane.b32.xlu1 %v5092_v31, %s5804_s22 }
 0x482   : > { %3684 = vrot.lane.b32.xlu0 %v8541_v63, %s5804_s22 }
 0x483   : > { %3152 = vrot.lane.b32.xlu1 %v5088_v60, %s5804_s22  ;;  %v582_v60 = vld [vmem:[%s8687_s5 + $0x30] sm:$0xff] }
 0x486   : > { %3704 = vrot.lane.b32.xlu0 %v8549_v56, %s5804_s22 }
 0x487   : > { %3706 = vrot.lane.b32.xlu1 %v5102_v2, %s5804_s22  ;;  %v583_v2 = vld [vmem:[%s8687_s5 + $0x38] sm:$0xff] }
 0x48a   : > { %3708 = vrot.lane.b32.xlu0 %v8476_v18, %s5804_s22 }
 0x48b   : > { %3710 = vrot.lane.b32.xlu1 %v5104_v41, %s5804_s22 }
 0x4bc   : > { %v3123_v45 = vpop.permute.xlu0 %3122 }
 0x4bd   : > { %v3125_v19 = vpop.permute.xlu1 %3124 }
 0x4be   : > { %v3155_v7 = vsel %vm3154_vm13, %v3123_v45, %v3125_v19 }
 0x4c4   : > { %v3131_v0 = vpop.permute.xlu0 %3130 }
 0x4c5   : > { %v3133_v43 = vpop.permute.xlu1 %3132 }
 0x4c6   : > { %v3157_v13 = vsel %vm3154_vm13, %v3131_v0, %v3133_v43  ;;  %v5013_v43 = vpack.c.bf16 %v583_v2, %v582_v60  ;;  %v4359_v2 = vld [vmem:[%s8688_s6] ss:$0 sm:$0xff] }
 0x4c7   : > { %v3173_v14 = vmax.f32 %v8364_v51, %v3157_v13  ;;  %v3171_v51 = vmax.f32 %v8345_v11, %v3155_v7  ;;  %v613_v7 = vld [vmem:[%s8687_s5 + $0x128] sm:$0xff] }
 0x4c8   : > { %v3681_v4 = vpop.permute.xlu0 %3680 }
 0x4c9   : > { %v3683_v32 = vpop.permute.xlu1 %3682 }
 0x4ca   : > { %v3712_v8 = vsel %vm3154_vm13, %v3681_v4, %v3683_v32  ;;  %v608_v4 = vld [vmem:[%s8687_s5 + $0x100] sm:$0xff] }
 0x4cb   : > { %v3728_v38 = vmax.f32 %v8385_v55, %v3712_v8  ;;  %v578_v55 = vld [vmem:[%s8687_s5 + $0x10] sm:$0xff] }
 0x4cc   : > { %v3135_v6 = vpop.permute.xlu0 %3134  ;;  %v5005_v23 = vpack.c.bf16 %v579_v39, %v578_v55 }
 0x4cd   : > { %v3137_v35 = vpop.permute.xlu1 %3136  ;;  %v3736_v30 = vmax.f32 %v3171_v51, %v3728_v38 }
 0x4ce   : > { %v3158_v42 = vsel %vm3154_vm13, %v3135_v6, %v3137_v35  ;;  %v609_v6 = vld [vmem:[%s8687_s5 + $0x108] sm:$0xff]  ;;  %v584_v35 = vld [vmem:[%s8687_s5 + $0x40] sm:$0xff] }
 0x4cf   : > { %v3174_v15 = vmax.f32 %v8400_v54, %v3158_v42  ;;  %v3744_v49 = vmax.f32 %v3736_v30, 0.0  ;;  %v5045_v13 = vpack.c.bf16 %v609_v6, %v608_v4  ;;  %v4360_v6 = vld [vmem:[%s8690_s8] ss:$0 sm:$0xff] }
 0x4d0   : > { %v3139_v40 = vpop.permute.xlu0 %3138 }
 0x4d1   : > { %v3141_v3 = vpop.permute.xlu1 %3140 }
 0x4d2   : > { %v3159_v58 = vsel %vm3154_vm13, %v3139_v40, %v3141_v3 }
 0x4d3   : > { %v3175_v54 = vmax.f32 %v8418_v17, %v3159_v58 }
 0x4d4   : > { %v3689_v37 = vpop.permute.xlu0 %3688 }
 0x4d5   : > { %v3691_v29 = vpop.permute.xlu1 %3690 }
 0x4d6   : > { %v3714_v22 = vsel %vm3154_vm13, %v3689_v37, %v3691_v29 }
 0x4d7   : > { %v3730_v34 = vmax.f32 %v8436_v59, %v3714_v22  ;;  %v610_v22 = vld [vmem:[%s8687_s5 + $0x110] sm:$0xff] }
 0x4d8   : > { %v3143_v10 = vpop.permute.xlu0 %3142 }
 0x4d9   : > { %v3738_v1 = vmax.f32 %v3173_v14, %v3730_v34  ;;  %v3145_v36 = vpop.permute.xlu1 %3144  ;;  %v611_v14 = vld [vmem:[%s8687_s5 + $0x118] sm:$0xff] }
 0x4da   : > { %v3160_v33 = vsel %vm3154_vm13, %v3143_v10, %v3145_v36  ;;  %v5049_v8 = vpack.c.bf16 %v611_v14, %v610_v22  ;;  %v612_v36 = vld [vmem:[%s8687_s5 + $0x120] sm:$0xff] }
 0x4db   : > { %v3746_v52 = vmax.f32 %v3738_v1, 0.0 }
 0x4dc   : > { %v3693_v57 = vpop.permute.xlu0 %3692 }
 0x4dd   : > { %v3695_v47 = vpop.permute.xlu1 %3694  ;;  %4444 = vmatprep.mubr.msk.f32.mxu1 %vm3752_vm14, %v3746_v52 }
 0x4de   : > { %v3715_v59 = vsel %vm3154_vm13, %v3693_v57, %v3695_v47  ;;  %v5053_v57 = vpack.c.bf16 %v613_v7, %v612_v36 }
 0x4df   : > { %v3731_v21 = vmax.f32 %v8473_v12, %v3715_v59 }
 0x4e0   : > { %v3697_v24 = vpop.permute.xlu0 %3696 }
 0x4e1   : > { %v3739_v20 = vmax.f32 %v3174_v15, %v3731_v21  ;;  %v3699_v11 = vpop.permute.xlu1 %3698  ;;  %v614_v15 = vld [vmem:[%s8687_s5 + $0x130] sm:$0xff]  ;;  %v615_v21 = vld [vmem:[%s8687_s5 + $0x138] sm:$0xff] }
 0x4e2   : > { %v3716_v41 = vsel %vm3154_vm13, %v3697_v24, %v3699_v11  ;;  %v5057_v55 = vpack.c.bf16 %v615_v21, %v614_v15 }
 0x4e3   : > { %v3747_v61 = vmax.f32 %v3739_v20, 0.0  ;;  %v3732_v12 = vmax.f32 %v8492_v62, %v3716_v41  ;;  %v5009_v62 = vpack.c.bf16 %v581_v48, %v580_v9  ;;  %v4095_v9 = vld [vmem:[%s8689_s7 + $0x18] sm:$0xff] }
 0x4e4   : > { %v3147_v16 = vpop.permute.xlu0 %3146 }
 0x4e5   : > { %v3740_v28 = vmax.f32 %v3175_v54, %v3732_v12  ;;  %v3149_v46 = vpop.permute.xlu1 %3148  ;;  %4445 = vmatmul.mubr.msk.f32.vlgmr.msra.gmra.mrb[64].mxu1 %vm3752_vm14, %v3747_v61 }
 0x4e6   : > { %4467 = vmatprep.mubr.msk.f32.mxu1 %vm3752_vm14, %v3744_v49  ;;  %5004 = vmatpush3.bf16.msra.mxu1 %v8469_v53  ;;  %v3176_v53 = vmax.f32 %v8451_v26, %v3160_v33  ;;  %v585_v26 = vld [vmem:[%s8687_s5 + $0x48] sm:$0xff]  ;;  %v3161_v47 = vsel %vm3154_vm13, %v3147_v16, %v3149_v46  ;;  %v4092_v49 = vld [vmem:[%s8689_s7] sm:$0xff] }
 0x4e7   : > { %v3748_v17 = vmax.f32 %v3740_v28, 0.0  ;;  %5006 = vmatprep.subr.bf16.mxu1 %v5005_v23  ;;  %v5017_v37 = vpack.c.bf16 %v585_v26, %v584_v35  ;;  %v3177_v58 = vmax.f32 %v8505_v50, %v3161_v47  ;;  %v4093_v16 = vld [vmem:[%s8689_s7 + $0x8] sm:$0xff]  ;;  %v4096_v28 = vld [vmem:[%s8689_s7 + $0x20] sm:$0xff] }
 0x4e8   : > { %v3701_v31 = vpop.permute.xlu0 %3700  ;;  %v4097_v46 = vld [vmem:[%s8689_s7 + $0x28] sm:$0xff] }
 0x4e9   : > { %v3703_v45 = vpop.permute.xlu1 %3702  ;;  %4490 = vmatprep.mubr.msk.f32.mxu0 %vm3752_vm14, %v3748_v17  ;;  %v5069_v17 = vpack.c.bf16 %v4097_v46, %v4096_v28 }
 0x4ea   : > { %v3717_v19 = vsel %vm3154_vm13, %v3701_v31, %v3703_v45  ;;  %5008 = vmatpush3.bf16.msra.mxu1 %v5005_v23 }
 0x4eb   : > { %v3733_v0 = vmax.f32 %v8516_v44, %v3717_v19  ;;  %5010 = vmatprep.subr.bf16.mxu1 %v5009_v62 }
 0x4ec   : > { %v3127_v32 = vpop.permute.xlu0 %3126 }
 0x4ed   : > { %v3741_v44 = vmax.f32 %v3176_v53, %v3733_v0  ;;  %v3129_v40 = vpop.permute.xlu1 %3128 }
 0x4ee   : > { %5012 = vmatpush3.bf16.msra.mxu1 %v5009_v62  ;;  %v3156_v10 = vsel %vm3154_vm13, %v3127_v32, %v3129_v40  ;;  %v4098_v62 = vld [vmem:[%s8689_s7 + $0x30] sm:$0x3] }
 0x4ef   : > { %v3749_v3 = vmax.f32 %v3741_v44, 0.0  ;;  %5014 = vmatprep.subr.bf16.mxu1 %v5013_v43 }
 0x4f0   : > { %v3151_v29 = vpop.permute.xlu0 %3150 }
 0x4f1   : > { %v3687_v34 = vpop.permute.xlu1 %3686  ;;  %4491 = vmatmul.mubr.msk.f32.vlgmr.msra.gmra.mrb[64].mxu0 %vm3752_vm14, %v3749_v3 }
 0x4f2   : > { %5044 = vmatpush3.bf16.msra.mxu0 %v8507_v5  ;;  %5016 = vmatpush3.bf16.msra.mxu1 %v5013_v43  ;;  %v3172_v5 = vmax.f32 %v8524_v25, %v3156_v10 }
 0x4f3   : > { %5046 = vmatprep.subr.bf16.mxu0 %v5045_v13  ;;  %5018 = vmatprep.subr.bf16.mxu1 %v5017_v37 }
 0x4f4   : > { %v3685_v1 = vpop.permute.xlu0 %3684 }
 0x4f5   : > { %v3713_v52 = vsel %vm3154_vm13, %v3685_v1, %v3687_v34  ;;  %v3153_v38 = vpop.permute.xlu1 %3152 }
 0x4f6   : > { %v3729_v42 = vmax.f32 %v8541_v63, %v3713_v52  ;;  %5048 = vmatpush3.bf16.msra.mxu0 %v5045_v13  ;;  %5020 = vmatpush3.bf16.msra.mxu1 %v5017_v37  ;;  %v3162_v39 = vsel %vm3154_vm13, %v3151_v29, %v3153_v38 }
 0x4f7   : > { %5050 = vmatprep.subr.bf16.mxu0 %v5049_v8  ;;  %v3178_v61 = vmax.f32 %v8532_v27, %v3162_v39  ;;  %v5061_v27 = vpack.c.bf16 %v4093_v16, %v4092_v49 }
 0x4f8   : > { %v3737_v51 = vmax.f32 %v3172_v5, %v3729_v42  ;;  %v3705_v59 = vpop.permute.xlu0 %3704 }
 0x4f9   : > { %v3707_v30 = vpop.permute.xlu1 %3706  ;;  %5062 = vmatprep.subr.bf16.mxu1 %v5061_v27 }
 0x4fa   : > { %v3745_v25 = vmax.f32 %v3737_v51, 0.0  ;;  %v3718_v63 = vsel %vm3154_vm13, %v3705_v59, %v3707_v30  ;;  %5052 = vmatpush3.bf16.msra.mxu0 %v5049_v8 }
 0x4fb   : > { %v3734_v24 = vmax.f32 %v8549_v56, %v3718_v63  ;;  %5054 = vmatprep.subr.bf16.mxu0 %v5053_v57 }
 0x4fc   : > { %4468 = vmatmul.mubr.msk.f32.vlgmr.msra.gmra.mrb[64].mxu1 %vm3752_vm14, %v3745_v25  ;;  %v3709_v20 = vpop.permute.xlu0 %3708 }
 0x4fd   : > { %v3742_v11 = vmax.f32 %v3177_v58, %v3734_v24  ;;  %v3711_v41 = vpop.permute.xlu1 %3710  ;;  %5064 = vmatpush3.bf16.msra.mxu1 %v5061_v27 }
 0x4fe   : > { %v3719_v54 = vsel %vm3154_vm13, %v3709_v20, %v3711_v41  ;;  %5056 = vmatpush3.bf16.msra.mxu0 %v5053_v57 }
 0x4ff   : > { %v3750_v12 = vmax.f32 %v3742_v11, 0.0  ;;  %v3735_v23 = vmax.f32 %v8476_v18, %v3719_v54  ;;  %5058 = vmatprep.subr.bf16.mxu0 %v5057_v55  ;;  %v4094_v18 = vld [vmem:[%s8689_s7 + $0x10] sm:$0xff] }
 0x500   : > { %v5065_v48 = vpack.c.bf16 %v4095_v9, %v4094_v18 }
 0x501   : > { %v3743_v50 = vmax.f32 %v3178_v61, %v3735_v23  ;;  %4513 = vmatprep.mubr.msk.f32.mxu0 %vm3752_vm14, %v3750_v12 }
 0x502   : > { %5060 = vmatpush3.bf16.msra.mxu0 %v5057_v55  ;;  %5066 = vmatprep.subr.bf16.mxu1 %v5065_v48 }
 0x503   : > { %v3751_v56 = vmax.f32 %v3743_v50, 0.0  ;;  %5068 = vmatpush3.bf16.msra.mxu1 %v5065_v48 }
 0x504   : > { %5070 = vmatprep.subr.bf16.mxu1 %v5069_v17 }
 0x505   : > { %4514 = vmatmul.mubr.msk.f32.vlgmr.msra.gmra.mrb[64].mxu0 %vm3752_vm14, %v3751_v56 }
 0x507   : > { %5072 = vmatpush3.bf16.msra.mxu1 %v5069_v17 }
 0x508   : > { %4528 = vmatprep.subr.msk.mxu1 %vm4113_vm15, %v4098_v62 }
 0x50b   : > { %4529 = vmatpush3.msk.msra.mxu1 %vm4113_vm15, %v4098_v62 }
 0x5cf   : > { %v4469_v33 = vpop.f32.mrb[64].mxu1 }
 0x5d0   : > { %v3906_v31 = vpop.f32.mrb[65].mxu1 }
 0x5d8   : > { %v4515_v60 = vpop.f32.mrb[64].mxu0 }
 0x5d9   : > { %v5105_v45 = vadd.f32 %v4515_v60, %v4469_v33  ;;  %v4070_v19 = vpop.f32.mrb[65].mxu0 }
 0x5da   : > { %v5106_v53 = vadd.f32 %v4070_v19, %v3906_v31 }
 0x5db   : > { %v4089_v0 = vadd.f32 %v5105_v45, %v4359_v2 }
 0x5dc   : > { %v4088_v43 = vadd.f32 %v5106_v53, %v4359_v2 }
 0x5dd   : > { %v4091_v32 = vmax.f32 %v4089_v0, 0.0 }
 0x5de   : > { %v4090_v4 = vmax.f32 %v4088_v43, 0.0 }
 0x5e0   : > { %4530 = vmatprep.mubr.msk.f32.mxu1 %vm4106_vm0, %v4090_v4 }
 0x5e1   : > { %4531 = vmatmul.mubr.msk.f32.vlgmr.msra.gmra.mrb[66].mxu1 %vm4106_vm0, %v4091_v32 }
 0x6b4   : > { %v4532_v35 = vpop.f32.mrb[66].mxu1 }
 0x6b5   : > { %v4189_v26 = vadd.f32 %v4532_v35, %v4360_v6  ;;  %v4183_v44 = vpop.f32.mrb[67].mxu1 }
 0x6b6   : > { %v4184_v40 = vadd.f32 %v4360_v6, %v4183_v44 }
 0x6b7   : > { %4194 = vmax.xlane.f32.xlu1 %v4189_v26 }
 0x6b8   : > { %4192 = vmax.xlane.f32.xlu0 %v4184_v40 }
 0x744   : > { %v4195_v3 = vpop.xlane.xlu1 %4194 }
 0x745   : > { %v4193_v13 = vpop.xlane.xlu0 %4192  ;;  %v4197_v37 = vsub.f32 %v4189_v26, %v4195_v3 }
 0x746   : > { %v4196_v29 = vsub.f32 %v4184_v40, %v4193_v13 }
 0x747   : > { %v4200_v14 = vmul.f32 1.442695, %v4197_v37 }
 0x748   : > { %v4198_v22 = vmul.f32 1.442695, %v4196_v29 }
 0x74a   : > { %5754 = vpow2.f32 %v4198_v22 }
 0x74b   : > { %5756 = vpow2.f32 %v4200_v14 }
 0x754   : > { %v5755_v34 = vpop.eup %5754 }
 0x755   : > { %4202 = vadd.xlane.f32.xlu0 %v5755_v34  ;;  %v5757_v10 = vpop.eup %5756 }
 0x759   : > { %4204 = vadd.xlane.f32.xlu0 %v5757_v10 }
 0x7e2   : > { %v4203_v8 = vpop.xlane.xlu0 %4202 }
 0x7e3   : > { %5758 = vlog2.f32 %v4203_v8 }
 0x7e6   : > { %v4205_v1 = vpop.xlane.xlu0 %4204 }
 0x7e7   : > { %5760 = vlog2.f32 %v4205_v1 }
 0x7ed   : > { %v5759_v36 = vpop.eup %5758 }
 0x7ee   : > { %v4207_v7 = vmul.f32 0.6931472, %v5759_v36 }
 0x7f0   : > { %v4210_v52 = vsub.f32 %v4196_v29, %v4207_v7 }
 0x7f1   : > { %v5761_v38 = vpop.eup %5760 }
 0x7f2   : > { %4212 = vst [vmem:[%s332_s21] sm:$0xff] %v4210_v52  ;;  %v4209_v5 = vmul.f32 0.6931472, %v5761_v38 }
 0x7f4   : > { %v4211_v42 = vsub.f32 %v4197_v37, %v4209_v5 }
 0x7f6   : > { %4213 = vst [vmem:[%s332_s21 + $0x8] sm:$0xff] %v4211_v42 }
 0x7f7 PF: > { %s19_s30 = sadd.s32 1, %s5792_s30  }
 0x7f8   : > { %p16_p5 = scmp.ge.s32.totalorder %s19_s30, 4  }
 0x7fa   :  { %18 = sbr.rel (!%p16_p5) target bundleno = 1 (0x1), region = 86 }

</bundles_post_ra>
